<compile_context>
chip_gen: v5e
topology: v5e:2x2
jax: 0.10.0
libtpu: 0.0.40
codegen_flags: <defaults>
</compile_context>

<pallas_src>
import jax
import jax.numpy as jnp
from jax import lax
from jax.experimental import pallas as pl
from jax.experimental.pallas import tpu as pltpu


# ----------------------------- Pallas kernel ------------------------------ #
def _conv3x3_s2_relu_kernel(xp_ref, w_ref, b_ref, o_ref):
    """Fused im2col + 3x3/stride-2 conv + bias + ReLU for one (image, row-tile).

    xp_ref: (1, 4*Hq, Cin, Wq)  bf16  parity-split padded image (whole image)
            row layout: ((kh&1)*2 + (kw&1)) * Hq + i  maps to padded row 2i+(kh&1)
    w_ref : (9, Cout, Cin)      bf16  per-tap weights, tap = kh*3 + kw
    b_ref : (Cout, 1)           f32
    o_ref : (1, TH, Cout, Wo)   f32   TH output rows, each a (Cout, Wo) plane
    """
    _, TH, Cout, Wo = o_ref.shape
    Hq = xp_ref.shape[1] // 4
    t = pl.program_id(1)
    row0 = t * TH
    bias = b_ref[...]                      # (Cout, 1), broadcasts over lanes

    def row_body(lr, carry):
        oh = row0 + lr                     # global output row
        acc = jnp.zeros((Cout, Wo), jnp.float32)
        for kh in range(3):
            for kw in range(3):
                par = (kh & 1) * 2 + (kw & 1)      # parity plane
                oi, oj = kh // 2, kw // 2          # shift inside the plane
                # contiguous (Cin, Wo) tap slice straight from VMEM
                xt = xp_ref[0, par * Hq + oh + oi, :, oj:oj + Wo]
                wt = w_ref[kh * 3 + kw]            # (Cout, Cin)
                acc = acc + jnp.dot(wt, xt, preferred_element_type=jnp.float32)
        acc = jnp.maximum(acc + bias, 0.0)
        o_ref[0, lr] = acc.astype(o_ref.dtype)     # lane dim = Wo (dense)
        return carry

    lax.fori_loop(0, TH, row_body, 0, unroll=(TH <= 8))


def _pick_row_tile(Ho, Cout, Wo, budget_bytes=4 << 20):
    """Largest divisor of Ho whose (TH, Cout, Wo) f32 output block fits budget."""
    th = Ho
    while th > 1 and th * Cout * Wo * 4 > budget_bytes:
        th -= 1
        while Ho % th:
            th -= 1
    return th


def conv3x3_s2_relu(x_nchw, w_oihw, b):
    """3x3 conv, stride 2, pad 1, + bias + ReLU. NCHW in, NCHW out."""
    N, Cin, H, W = x_nchw.shape
    assert H % 2 == 0 and W % 2 == 0, "even spatial dims expected"
    Cout = w_oihw.shape[0]
    Ho, Wo = H // 2, W // 2
    Hq, Wq = Ho + 1, Wo + 1                      # parity-plane extents

    # pad + parity space-to-depth (1x input traffic, no im2col inflation)
    xpad = jnp.pad(x_nchw, ((0, 0), (0, 0), (1, 1), (1, 1)))          # (N,Cin,2Hq,2Wq)
    xp = xpad.reshape(N, Cin, Hq, 2, Wq, 2).transpose(0, 3, 5, 2, 1, 4)
    xp = xp.reshape(N, 4 * Hq, Cin, Wq).astype(jnp.bfloat16)          # (N,4Hq,Cin,Wq)

    w9 = w_oihw.transpose(2, 3, 0, 1).reshape(9, Cout, Cin).astype(jnp.bfloat16)
    b2 = b.reshape(Cout, 1).astype(jnp.float32)

    TH = _pick_row_tile(Ho, Cout, Wo)
    n_tiles = Ho // TH

    # VMEM budget with headroom (double-buffered in/out blocks + weights)
    bytes_xp = 4 * Hq * Cin * Wq * 2
    bytes_out = TH * Cout * Wo * 4
    est = 2 * bytes_xp + 2 * bytes_out + 9 * Cout * Cin * 2 + Cout * 4 + (1 << 20)
    vmem_limit = int(min(max(2 * est, 16 << 20), 32 << 20))

    out = pl.pallas_call(
        _conv3x3_s2_relu_kernel,
        out_shape=jax.ShapeDtypeStruct((N, Ho, Cout, Wo), jnp.float32),
        grid_spec=pltpu.PrefetchScalarGridSpec(
            num_scalar_prefetch=0,
            grid=(N, n_tiles),
            in_specs=[
                # whole parity image per batch; resident across row tiles
                pl.BlockSpec((1, 4 * Hq, Cin, Wq), lambda n, t: (n, 0, 0, 0)),
                # weights / bias resident for the whole call
                pl.BlockSpec((9, Cout, Cin), lambda n, t: (0, 0, 0)),
                pl.BlockSpec((Cout, 1), lambda n, t: (0, 0)),
            ],
            out_specs=pl.BlockSpec((1, TH, Cout, Wo), lambda n, t: (n, t, 0, 0)),
        ),
        compiler_params=pltpu.CompilerParams(
            dimension_semantics=("parallel", "parallel"),
            vmem_limit_bytes=vmem_limit,
        ),
    )(xp, w9, b2)                                 # (N, Ho, Cout, Wo)

    return jnp.transpose(out, (0, 2, 1, 3))       # -> NCHW


# --------------------------- Synthetic backbone ---------------------------- #
class UNetConvBackbone:
    """Concrete AbstractUNetBackbone: 3 stages of (3x3 conv s=2 p=1) + ReLU."""

    def __init__(self, in_channels, stage_channels, key):
        self.stage_channels = list(stage_channels)
        self.params = []
        c_in = in_channels
        for c_out in stage_channels:
            key, k_w, k_b = jax.random.split(key, 3)
            fan_in = 9 * c_in
            w = jax.random.normal(k_w, (c_out, c_in, 3, 3), jnp.float32) / jnp.sqrt(fan_in)
            b = 0.01 * jax.random.normal(k_b, (c_out,), jnp.float32)
            self.params.append((w, b))
            c_in = c_out

    def get_backbone_output_number_of_channels(self):
        return list(self.stage_channels)

    def get_all_number_of_channels(self):
        return list(self.stage_channels)

    def __call__(self, x_nchw):
        feats = []
        out = x_nchw
        for (w, b) in self.params:
            out = conv3x3_s2_relu(out, w, b)
            feats.append(out)
        return feats


# -------------------------------- Encoder ---------------------------------- #
class Encoder:
    """JAX/Pallas equivalent of the PyTorch Encoder module (NCHW in/out)."""

    def __init__(self, backbone, context_module=None):
        self.backbone = backbone
        # context_module=None -> nn.Identity()
        self.context_module = (lambda t: t) if context_module is None else context_module

    def __call__(self, x_nchw):
        feats = self.backbone(x_nchw)
        feats[-1] = self.context_module(feats[-1])
        return feats

    def get_output_number_of_channels(self):
        channels_list = self.backbone.get_backbone_output_number_of_channels()
        out_ch = getattr(self.context_module, "out_channels", None)
        if out_ch is not None:
            channels_list[-1] = out_ch
        return channels_list

    def get_all_number_of_channels(self):
        channels_list = self.backbone.get_all_number_of_channels()
        if hasattr(self.context_module, "output_channels"):
            channels_list[-1] = self.context_module.output_channels()
        return channels_list


# ------------------------------ Reference ---------------------------------- #
def _reference_forward(x_nchw, backbone):
    """Pure-JAX reference (lax conv) with the same bf16 operand rounding."""
    feats = []
    out = x_nchw
    for (w, b) in backbone.params:
        lhs = out.astype(jnp.bfloat16).astype(jnp.float32)
        rhs = w.astype(jnp.bfloat16).astype(jnp.float32)
        y = lax.conv_general_dilated(
            lhs, rhs, window_strides=(2, 2), padding=((1, 1), (1, 1)),
            dimension_numbers=("NCHW", "OIHW", "NCHW"),
            precision=lax.Precision.HIGHEST)
        out = jnp.maximum(y + b[None, :, None, None], 0.0)
        feats.append(out)
    return feats


if __name__ == "__main__":
    key = jax.random.PRNGKey(0)
    k_x, k_p = jax.random.split(key)

    N, C, H, W = 2, 4, 16, 16
    x = jax.random.normal(k_x, (N, C, H, W), jnp.float32)

    backbone = UNetConvBackbone(in_channels=C, stage_channels=[8, 16, 32], key=k_p)
    encoder = Encoder(backbone, context_module=None)

    feats = encoder(x)
    feats = [jax.block_until_ready(f) for f in feats]

    # Sanity check against a pure-JAX reference (same bf16 operand rounding,
    # f32 accumulation -> tolerance covers summation-order / requant effects).
    ref = _reference_forward(x, backbone)
    for got, want in zip(feats, ref):
        assert got.shape == want.shape, (got.shape, want.shape)
        assert jnp.allclose(got, want, atol=1e-2, rtol=1e-2), "mismatch vs reference"

    print("KERNEL_OK")
</pallas_src>

<mosaic_0001>
module attributes {stable_mosaic.version = 11 : i64} {
  func.func @_conv3x3_s2_relu_kernel(%arg0: i32, %arg1: i32, %arg2: memref<1x36x4x9xbf16, #tpu.memory_space<vmem>>, %arg3: memref<9x8x4xbf16, #tpu.memory_space<vmem>>, %arg4: memref<8x1xf32, #tpu.memory_space<vmem>>, %arg5: memref<1x8x8x8xf32, #tpu.memory_space<vmem>>) attributes {dimension_semantics = [#tpu.dimension_semantics<parallel>, #tpu.dimension_semantics<parallel>], iteration_bounds = array<i64: 2, 1>, scalar_prefetch = 0 : i64, scratch_operands = 0 : i64, tpu.core_type = #tpu.core_type<tc>, window_params = [{transform_indices = @transform_0, window_bounds = array<i64: 1, 36, 4, 9>}, {pipeline_mode = #tpu.pipeline_mode<synchronous>, transform_indices = @transform_1, window_bounds = array<i64: 9, 8, 4>}, {pipeline_mode = #tpu.pipeline_mode<synchronous>, transform_indices = @transform_2, window_bounds = array<i64: 8, 1>}, {transform_indices = @transform_3, window_bounds = array<i64: 1, 8, 8, 8>}]} {
    %c8_i32 = arith.constant 8 : i32
    %0 = arith.muli %arg1, %c8_i32 : i32
    %c0 = arith.constant 0 : index
    %c0_0 = arith.constant 0 : index
    %1 = vector.load %arg4[%c0, %c0_0] : memref<8x1xf32, #tpu.memory_space<vmem>>, vector<8x1xf32>
    %c0_i32 = arith.constant 0 : i32
    %2 = arith.addi %0, %c0_i32 : i32
    %cst = arith.constant 0.000000e+00 : f32
    %3 = vector.broadcast %cst : f32 to vector<8x8xf32>
    %c0_i32_1 = arith.constant 0 : i32
    %4 = arith.addi %c0_i32_1, %2 : i32
    %c0_i32_2 = arith.constant 0 : i32
    %5 = arith.addi %4, %c0_i32_2 : i32
    %c0_3 = arith.constant 0 : index
    %6 = arith.index_cast %5 : i32 to index
    %c0_4 = arith.constant 0 : index
    %c0_5 = arith.constant 0 : index
    %7 = vector.load %arg2[%c0_3, %6, %c0_4, %c0_5] : memref<1x36x4x9xbf16, #tpu.memory_space<vmem>>, vector<1x1x4x8xbf16>
    %8 = vector.shape_cast %7 : vector<1x1x4x8xbf16> to vector<4x8xbf16>
    %c0_6 = arith.constant 0 : index
    %c0_7 = arith.constant 0 : index
    %c0_8 = arith.constant 0 : index
    %9 = vector.load %arg3[%c0_6, %c0_7, %c0_8] : memref<9x8x4xbf16, #tpu.memory_space<vmem>>, vector<1x8x4xbf16>
    %10 = vector.shape_cast %9 : vector<1x8x4xbf16> to vector<8x4xbf16>
    %cst_9 = arith.constant dense<0.000000e+00> : vector<8x8xf32>
    %11 = tpu.matmul %10, %8, %cst_9 {dimension_numbers = #tpu.dot_dimension_numbers<[1], [0], [0], [1], [0, 0, 1, 1], [], []>} : vector<8x4xbf16>, vector<4x8xbf16>, vector<8x8xf32> -> vector<8x8xf32>
    %12 = arith.addf %3, %11 : vector<8x8xf32>
    %c9_i32 = arith.constant 9 : i32
    %13 = arith.addi %c9_i32, %2 : i32
    %c0_i32_10 = arith.constant 0 : i32
    %14 = arith.addi %13, %c0_i32_10 : i32
    %c0_11 = arith.constant 0 : index
    %15 = arith.index_cast %14 : i32 to index
    %c0_12 = arith.constant 0 : index
    %c0_13 = arith.constant 0 : index
    %16 = vector.load %arg2[%c0_11, %15, %c0_12, %c0_13] : memref<1x36x4x9xbf16, #tpu.memory_space<vmem>>, vector<1x1x4x8xbf16>
    %17 = vector.shape_cast %16 : vector<1x1x4x8xbf16> to vector<4x8xbf16>
    %c1 = arith.constant 1 : index
    %c0_14 = arith.constant 0 : index
    %c0_15 = arith.constant 0 : index
    %18 = vector.load %arg3[%c1, %c0_14, %c0_15] : memref<9x8x4xbf16, #tpu.memory_space<vmem>>, vector<1x8x4xbf16>
    %19 = vector.shape_cast %18 : vector<1x8x4xbf16> to vector<8x4xbf16>
    %cst_16 = arith.constant dense<0.000000e+00> : vector<8x8xf32>
    %20 = tpu.matmul %19, %17, %cst_16 {dimension_numbers = #tpu.dot_dimension_numbers<[1], [0], [0], [1], [0, 0, 1, 1], [], []>} : vector<8x4xbf16>, vector<4x8xbf16>, vector<8x8xf32> -> vector<8x8xf32>
    %21 = arith.addf %12, %20 : vector<8x8xf32>
    %c0_i32_17 = arith.constant 0 : i32
    %22 = arith.addi %c0_i32_17, %2 : i32
    %c0_i32_18 = arith.constant 0 : i32
    %23 = arith.addi %22, %c0_i32_18 : i32
    %c0_19 = arith.constant 0 : index
    %24 = arith.index_cast %23 : i32 to index
    %c0_20 = arith.constant 0 : index
    %c1_21 = arith.constant 1 : index
    %25 = vector.load %arg2[%c0_19, %24, %c0_20, %c1_21] : memref<1x36x4x9xbf16, #tpu.memory_space<vmem>>, vector<1x1x4x8xbf16>
    %26 = vector.shape_cast %25 : vector<1x1x4x8xbf16> to vector<4x8xbf16>
    %c2 = arith.constant 2 : index
    %c0_22 = arith.constant 0 : index
    %c0_23 = arith.constant 0 : index
    %27 = vector.load %arg3[%c2, %c0_22, %c0_23] : memref<9x8x4xbf16, #tpu.memory_space<vmem>>, vector<1x8x4xbf16>
    %28 = vector.shape_cast %27 : vector<1x8x4xbf16> to vector<8x4xbf16>
    %cst_24 = arith.constant dense<0.000000e+00> : vector<8x8xf32>
    %29 = tpu.matmul %28, %26, %cst_24 {dimension_numbers = #tpu.dot_dimension_numbers<[1], [0], [0], [1], [0, 0, 1, 1], [], []>} : vector<8x4xbf16>, vector<4x8xbf16>, vector<8x8xf32> -> vector<8x8xf32>
    %30 = arith.addf %21, %29 : vector<8x8xf32>
    %c18_i32 = arith.constant 18 : i32
    %31 = arith.addi %c18_i32, %2 : i32
    %c0_i32_25 = arith.constant 0 : i32
    %32 = arith.addi %31, %c0_i32_25 : i32
    %c0_26 = arith.constant 0 : index
    %33 = arith.index_cast %32 : i32 to index
    %c0_27 = arith.constant 0 : index
    %c0_28 = arith.constant 0 : index
    %34 = vector.load %arg2[%c0_26, %33, %c0_27, %c0_28] : memref<1x36x4x9xbf16, #tpu.memory_space<vmem>>, vector<1x1x4x8xbf16>
    %35 = vector.shape_cast %34 : vector<1x1x4x8xbf16> to vector<4x8xbf16>
    %c3 = arith.constant 3 : index
    %c0_29 = arith.constant 0 : index
    %c0_30 = arith.constant 0 : index
    %36 = vector.load %arg3[%c3, %c0_29, %c0_30] : memref<9x8x4xbf16, #tpu.memory_space<vmem>>, vector<1x8x4xbf16>
    %37 = vector.shape_cast %36 : vector<1x8x4xbf16> to vector<8x4xbf16>
    %cst_31 = arith.constant dense<0.000000e+00> : vector<8x8xf32>
    %38 = tpu.matmul %37, %35, %cst_31 {dimension_numbers = #tpu.dot_dimension_numbers<[1], [0], [0], [1], [0, 0, 1, 1], [], []>} : vector<8x4xbf16>, vector<4x8xbf16>, vector<8x8xf32> -> vector<8x8xf32>
    %39 = arith.addf %30, %38 : vector<8x8xf32>
    %c27_i32 = arith.constant 27 : i32
    %40 = arith.addi %c27_i32, %2 : i32
    %c0_i32_32 = arith.constant 0 : i32
    %41 = arith.addi %40, %c0_i32_32 : i32
    %c0_33 = arith.constant 0 : index
    %42 = arith.index_cast %41 : i32 to index
    %c0_34 = arith.constant 0 : index
    %c0_35 = arith.constant 0 : index
    %43 = vector.load %arg2[%c0_33, %42, %c0_34, %c0_35] : memref<1x36x4x9xbf16, #tpu.memory_space<vmem>>, vector<1x1x4x8xbf16>
    %44 = vector.shape_cast %43 : vector<1x1x4x8xbf16> to vector<4x8xbf16>
    %c4 = arith.constant 4 : index
    %c0_36 = arith.constant 0 : index
    %c0_37 = arith.constant 0 : index
    %45 = vector.load %arg3[%c4, %c0_36, %c0_37] : memref<9x8x4xbf16, #tpu.memory_space<vmem>>, vector<1x8x4xbf16>
    %46 = vector.shape_cast %45 : vector<1x8x4xbf16> to vector<8x4xbf16>
    %cst_38 = arith.constant dense<0.000000e+00> : vector<8x8xf32>
    %47 = tpu.matmul %46, %44, %cst_38 {dimension_numbers = #tpu.dot_dimension_numbers<[1], [0], [0], [1], [0, 0, 1, 1], [], []>} : vector<8x4xbf16>, vector<4x8xbf16>, vector<8x8xf32> -> vector<8x8xf32>
    %48 = arith.addf %39, %47 : vector<8x8xf32>
    %c18_i32_39 = arith.constant 18 : i32
    %49 = arith.addi %c18_i32_39, %2 : i32
    %c0_i32_40 = arith.constant 0 : i32
    %50 = arith.addi %49, %c0_i32_40 : i32
    %c0_41 = arith.constant 0 : index
    %51 = arith.index_cast %50 : i32 to index
    %c0_42 = arith.constant 0 : index
    %c1_43 = arith.constant 1 : index
    %52 = vector.load %arg2[%c0_41, %51, %c0_42, %c1_43] : memref<1x36x4x9xbf16, #tpu.memory_space<vmem>>, vector<1x1x4x8xbf16>
    %53 = vector.shape_cast %52 : vector<1x1x4x8xbf16> to vector<4x8xbf16>
    %c5 = arith.constant 5 : index
    %c0_44 = arith.constant 0 : index
    %c0_45 = arith.constant 0 : index
    %54 = vector.load %arg3[%c5, %c0_44, %c0_45] : memref<9x8x4xbf16, #tpu.memory_space<vmem>>, vector<1x8x4xbf16>
    %55 = vector.shape_cast %54 : vector<1x8x4xbf16> to vector<8x4xbf16>
    %cst_46 = arith.constant dense<0.000000e+00> : vector<8x8xf32>
    %56 = tpu.matmul %55, %53, %cst_46 {dimension_numbers = #tpu.dot_dimension_numbers<[1], [0], [0], [1], [0, 0, 1, 1], [], []>} : vector<8x4xbf16>, vector<4x8xbf16>, vector<8x8xf32> -> vector<8x8xf32>
    %57 = arith.addf %48, %56 : vector<8x8xf32>
    %c0_i32_47 = arith.constant 0 : i32
    %58 = arith.addi %c0_i32_47, %2 : i32
    %c1_i32 = arith.constant 1 : i32
    %59 = arith.addi %58, %c1_i32 : i32
    %c0_48 = arith.constant 0 : index
    %60 = arith.index_cast %59 : i32 to index
    %c0_49 = arith.constant 0 : index
    %c0_50 = arith.constant 0 : index
    %61 = vector.load %arg2[%c0_48, %60, %c0_49, %c0_50] : memref<1x36x4x9xbf16, #tpu.memory_space<vmem>>, vector<1x1x4x8xbf16>
    %62 = vector.shape_cast %61 : vector<1x1x4x8xbf16> to vector<4x8xbf16>
    %c6 = arith.constant 6 : index
    %c0_51 = arith.constant 0 : index
    %c0_52 = arith.constant 0 : index
    %63 = vector.load %arg3[%c6, %c0_51, %c0_52] : memref<9x8x4xbf16, #tpu.memory_space<vmem>>, vector<1x8x4xbf16>
    %64 = vector.shape_cast %63 : vector<1x8x4xbf16> to vector<8x4xbf16>
    %cst_53 = arith.constant dense<0.000000e+00> : vector<8x8xf32>
    %65 = tpu.matmul %64, %62, %cst_53 {dimension_numbers = #tpu.dot_dimension_numbers<[1], [0], [0], [1], [0, 0, 1, 1], [], []>} : vector<8x4xbf16>, vector<4x8xbf16>, vector<8x8xf32> -> vector<8x8xf32>
    %66 = arith.addf %57, %65 : vector<8x8xf32>
    %c9_i32_54 = arith.constant 9 : i32
    %67 = arith.addi %c9_i32_54, %2 : i32
    %c1_i32_55 = arith.constant 1 : i32
    %68 = arith.addi %67, %c1_i32_55 : i32
    %c0_56 = arith.constant 0 : index
    %69 = arith.index_cast %68 : i32 to index
    %c0_57 = arith.constant 0 : index
    %c0_58 = arith.constant 0 : index
    %70 = vector.load %arg2[%c0_56, %69, %c0_57, %c0_58] : memref<1x36x4x9xbf16, #tpu.memory_space<vmem>>, vector<1x1x4x8xbf16>
    %71 = vector.shape_cast %70 : vector<1x1x4x8xbf16> to vector<4x8xbf16>
    %c7 = arith.constant 7 : index
    %c0_59 = arith.constant 0 : index
    %c0_60 = arith.constant 0 : index
    %72 = vector.load %arg3[%c7, %c0_59, %c0_60] : memref<9x8x4xbf16, #tpu.memory_space<vmem>>, vector<1x8x4xbf16>
    %73 = vector.shape_cast %72 : vector<1x8x4xbf16> to vector<8x4xbf16>
    %cst_61 = arith.constant dense<0.000000e+00> : vector<8x8xf32>
    %74 = tpu.matmul %73, %71, %cst_61 {dimension_numbers = #tpu.dot_dimension_numbers<[1], [0], [0], [1], [0, 0, 1, 1], [], []>} : vector<8x4xbf16>, vector<4x8xbf16>, vector<8x8xf32> -> vector<8x8xf32>
    %75 = arith.addf %66, %74 : vector<8x8xf32>
    %c0_i32_62 = arith.constant 0 : i32
    %76 = arith.addi %c0_i32_62, %2 : i32
    %c1_i32_63 = arith.constant 1 : i32
    %77 = arith.addi %76, %c1_i32_63 : i32
    %c0_64 = arith.constant 0 : index
    %78 = arith.index_cast %77 : i32 to index
    %c0_65 = arith.constant 0 : index
    %c1_66 = arith.constant 1 : index
    %79 = vector.load %arg2[%c0_64, %78, %c0_65, %c1_66] : memref<1x36x4x9xbf16, #tpu.memory_space<vmem>>, vector<1x1x4x8xbf16>
    %80 = vector.shape_cast %79 : vector<1x1x4x8xbf16> to vector<4x8xbf16>
    %c8 = arith.constant 8 : index
    %c0_67 = arith.constant 0 : index
    %c0_68 = arith.constant 0 : index
    %81 = vector.load %arg3[%c8, %c0_67, %c0_68] : memref<9x8x4xbf16, #tpu.memory_space<vmem>>, vector<1x8x4xbf16>
    %82 = vector.shape_cast %81 : vector<1x8x4xbf16> to vector<8x4xbf16>
    %cst_69 = arith.constant dense<0.000000e+00> : vector<8x8xf32>
    %83 = tpu.matmul %82, %80, %cst_69 {dimension_numbers = #tpu.dot_dimension_numbers<[1], [0], [0], [1], [0, 0, 1, 1], [], []>} : vector<8x4xbf16>, vector<4x8xbf16>, vector<8x8xf32> -> vector<8x8xf32>
    %84 = arith.addf %75, %83 : vector<8x8xf32>
    %85 = vector.broadcast %1 : vector<8x1xf32> to vector<8x8xf32>
    %86 = arith.addf %84, %85 : vector<8x8xf32>
    %cst_70 = arith.constant 0.000000e+00 : f32
    %87 = vector.broadcast %cst_70 : f32 to vector<8x8xf32>
    %88 = arith.maximumf %86, %87 : vector<8x8xf32>
    %c0_71 = arith.constant 0 : index
    %89 = arith.index_cast %c0_i32 : i32 to index
    %c0_72 = arith.constant 0 : index
    %c0_73 = arith.constant 0 : index
    %90 = vector.load %arg5[%c0_71, %89, %c0_72, %c0_73] : memref<1x8x8x8xf32, #tpu.memory_space<vmem>>, vector<1x1x8x8xf32>
    %91 = vector.shape_cast %90 : vector<1x1x8x8xf32> to vector<8x8xf32>
    %92 = vector.shape_cast %88 : vector<8x8xf32> to vector<1x1x8x8xf32>
    tpu.vector_store %arg5[%c0_71, %89, %c0_72, %c0_73], %92 {strides = array<i32>} : memref<1x8x8x8xf32, #tpu.memory_space<vmem>>, vector<1x1x8x8xf32>,
    %c1_i32_74 = arith.constant 1 : i32
    %93 = arith.addi %0, %c1_i32_74 : i32
    %cst_75 = arith.constant 0.000000e+00 : f32
    %94 = vector.broadcast %cst_75 : f32 to vector<8x8xf32>
    %c0_i32_76 = arith.constant 0 : i32
    %95 = arith.addi %c0_i32_76, %93 : i32
    %c0_i32_77 = arith.constant 0 : i32
    %96 = arith.addi %95, %c0_i32_77 : i32
    %c0_78 = arith.constant 0 : index
    %97 = arith.index_cast %96 : i32 to index
    %c0_79 = arith.constant 0 : index
    %c0_80 = arith.constant 0 : index
    %98 = vector.load %arg2[%c0_78, %97, %c0_79, %c0_80] : memref<1x36x4x9xbf16, #tpu.memory_space<vmem>>, vector<1x1x4x8xbf16>
    %99 = vector.shape_cast %98 : vector<1x1x4x8xbf16> to vector<4x8xbf16>
    %c0_81 = arith.constant 0 : index
    %c0_82 = arith.constant 0 : index
    %c0_83 = arith.constant 0 : index
    %100 = vector.load %arg3[%c0_81, %c0_82, %c0_83] : memref<9x8x4xbf16, #tpu.memory_space<vmem>>, vector<1x8x4xbf16>
    %101 = vector.shape_cast %100 : vector<1x8x4xbf16> to vector<8x4xbf16>
    %cst_84 = arith.constant dense<0.000000e+00> : vector<8x8xf32>
    %102 = tpu.matmul %101, %99, %cst_84 {dimension_numbers = #tpu.dot_dimension_numbers<[1], [0], [0], [1], [0, 0, 1, 1], [], []>} : vector<8x4xbf16>, vector<4x8xbf16>, vector<8x8xf32> -> vector<8x8xf32>
    %103 = arith.addf %94, %102 : vector<8x8xf32>
    %c9_i32_85 = arith.constant 9 : i32
    %104 = arith.addi %c9_i32_85, %93 : i32
    %c0_i32_86 = arith.constant 0 : i32
    %105 = arith.addi %104, %c0_i32_86 : i32
    %c0_87 = arith.constant 0 : index
    %106 = arith.index_cast %105 : i32 to index
    %c0_88 = arith.constant 0 : index
    %c0_89 = arith.constant 0 : index
    %107 = vector.load %arg2[%c0_87, %106, %c0_88, %c0_89] : memref<1x36x4x9xbf16, #tpu.memory_space<vmem>>, vector<1x1x4x8xbf16>
    %108 = vector.shape_cast %107 : vector<1x1x4x8xbf16> to vector<4x8xbf16>
    %c1_90 = arith.constant 1 : index
    %c0_91 = arith.constant 0 : index
    %c0_92 = arith.constant 0 : index
    %109 = vector.load %arg3[%c1_90, %c0_91, %c0_92] : memref<9x8x4xbf16, #tpu.memory_space<vmem>>, vector<1x8x4xbf16>
    %110 = vector.shape_cast %109 : vector<1x8x4xbf16> to vector<8x4xbf16>
    %cst_93 = arith.constant dense<0.000000e+00> : vector<8x8xf32>
    %111 = tpu.matmul %110, %108, %cst_93 {dimension_numbers = #tpu.dot_dimension_numbers<[1], [0], [0], [1], [0, 0, 1, 1], [], []>} : vector<8x4xbf16>, vector<4x8xbf16>, vector<8x8xf32> -> vector<8x8xf32>
    %112 = arith.addf %103, %111 : vector<8x8xf32>
    %c0_i32_94 = arith.constant 0 : i32
    %113 = arith.addi %c0_i32_94, %93 : i32
    %c0_i32_95 = arith.constant 0 : i32
    %114 = arith.addi %113, %c0_i32_95 : i32
    %c0_96 = arith.constant 0 : index
    %115 = arith.index_cast %114 : i32 to index
    %c0_97 = arith.constant 0 : index
    %c1_98 = arith.constant 1 : index
    %116 = vector.load %arg2[%c0_96, %115, %c0_97, %c1_98] : memref<1x36x4x9xbf16, #tpu.memory_space<vmem>>, vector<1x1x4x8xbf16>
    %117 = vector.shape_cast %116 : vector<1x1x4x8xbf16> to vector<4x8xbf16>
    %c2_99 = arith.constant 2 : index
    %c0_100 = arith.constant 0 : index
    %c0_101 = arith.constant 0 : index
    %118 = vector.load %arg3[%c2_99, %c0_100, %c0_101] : memref<9x8x4xbf16, #tpu.memory_space<vmem>>, vector<1x8x4xbf16>
    %119 = vector.shape_cast %118 : vector<1x8x4xbf16> to vector<8x4xbf16>
    %cst_102 = arith.constant dense<0.000000e+00> : vector<8x8xf32>
    %120 = tpu.matmul %119, %117, %cst_102 {dimension_numbers = #tpu.dot_dimension_numbers<[1], [0], [0], [1], [0, 0, 1, 1], [], []>} : vector<8x4xbf16>, vector<4x8xbf16>, vector<8x8xf32> -> vector<8x8xf32>
    %121 = arith.addf %112, %120 : vector<8x8xf32>
    %c18_i32_103 = arith.constant 18 : i32
    %122 = arith.addi %c18_i32_103, %93 : i32
    %c0_i32_104 = arith.constant 0 : i32
    %123 = arith.addi %122, %c0_i32_104 : i32
    %c0_105 = arith.constant 0 : index
    %124 = arith.index_cast %123 : i32 to index
    %c0_106 = arith.constant 0 : index
    %c0_107 = arith.constant 0 : index
    %125 = vector.load %arg2[%c0_105, %124, %c0_106, %c0_107] : memref<1x36x4x9xbf16, #tpu.memory_space<vmem>>, vector<1x1x4x8xbf16>
    %126 = vector.shape_cast %125 : vector<1x1x4x8xbf16> to vector<4x8xbf16>
    %c3_108 = arith.constant 3 : index
    %c0_109 = arith.constant 0 : index
    %c0_110 = arith.constant 0 : index
    %127 = vector.load %arg3[%c3_108, %c0_109, %c0_110] : memref<9x8x4xbf16, #tpu.memory_space<vmem>>, vector<1x8x4xbf16>
    %128 = vector.shape_cast %127 : vector<1x8x4xbf16> to vector<8x4xbf16>
    %cst_111 = arith.constant dense<0.000000e+00> : vector<8x8xf32>
    %129 = tpu.matmul %128, %126, %cst_111 {dimension_numbers = #tpu.dot_dimension_numbers<[1], [0], [0], [1], [0, 0, 1, 1], [], []>} : vector<8x4xbf16>, vector<4x8xbf16>, vector<8x8xf32> -> vector<8x8xf32>
    %130 = arith.addf %121, %129 : vector<8x8xf32>
    %c27_i32_112 = arith.constant 27 : i32
    %131 = arith.addi %c27_i32_112, %93 : i32
    %c0_i32_113 = arith.constant 0 : i32
    %132 = arith.addi %131, %c0_i32_113 : i32
    %c0_114 = arith.constant 0 : index
    %133 = arith.index_cast %132 : i32 to index
    %c0_115 = arith.constant 0 : index
    %c0_116 = arith.constant 0 : index
    %134 = vector.load %arg2[%c0_114, %133, %c0_115, %c0_116] : memref<1x36x4x9xbf16, #tpu.memory_space<vmem>>, vector<1x1x4x8xbf16>
    %135 = vector.shape_cast %134 : vector<1x1x4x8xbf16> to vector<4x8xbf16>
    %c4_117 = arith.constant 4 : index
    %c0_118 = arith.constant 0 : index
    %c0_119 = arith.constant 0 : index
    %136 = vector.load %arg3[%c4_117, %c0_118, %c0_119] : memref<9x8x4xbf16, #tpu.memory_space<vmem>>, vector<1x8x4xbf16>
    %137 = vector.shape_cast %136 : vector<1x8x4xbf16> to vector<8x4xbf16>
    %cst_120 = arith.constant dense<0.000000e+00> : vector<8x8xf32>
    %138 = tpu.matmul %137, %135, %cst_120 {dimension_numbers = #tpu.dot_dimension_numbers<[1], [0], [0], [1], [0, 0, 1, 1], [], []>} : vector<8x4xbf16>, vector<4x8xbf16>, vector<8x8xf32> -> vector<8x8xf32>
    %139 = arith.addf %130, %138 : vector<8x8xf32>
    %c18_i32_121 = arith.constant 18 : i32
    %140 = arith.addi %c18_i32_121, %93 : i32
    %c0_i32_122 = arith.constant 0 : i32
    %141 = arith.addi %140, %c0_i32_122 : i32
    %c0_123 = arith.constant 0 : index
    %142 = arith.index_cast %141 : i32 to index
    %c0_124 = arith.constant 0 : index
    %c1_125 = arith.constant 1 : index
    %143 = vector.load %arg2[%c0_123, %142, %c0_124, %c1_125] : memref<1x36x4x9xbf16, #tpu.memory_space<vmem>>, vector<1x1x4x8xbf16>
    %144 = vector.shape_cast %143 : vector<1x1x4x8xbf16> to vector<4x8xbf16>
    %c5_126 = arith.constant 5 : index
    %c0_127 = arith.constant 0 : index
    %c0_128 = arith.constant 0 : index
    %145 = vector.load %arg3[%c5_126, %c0_127, %c0_128] : memref<9x8x4xbf16, #tpu.memory_space<vmem>>, vector<1x8x4xbf16>
    %146 = vector.shape_cast %145 : vector<1x8x4xbf16> to vector<8x4xbf16>
    %cst_129 = arith.constant dense<0.000000e+00> : vector<8x8xf32>
    %147 = tpu.matmul %146, %144, %cst_129 {dimension_numbers = #tpu.dot_dimension_numbers<[1], [0], [0], [1], [0, 0, 1, 1], [], []>} : vector<8x4xbf16>, vector<4x8xbf16>, vector<8x8xf32> -> vector<8x8xf32>
    %148 = arith.addf %139, %147 : vector<8x8xf32>
    %c0_i32_130 = arith.constant 0 : i32
    %149 = arith.addi %c0_i32_130, %93 : i32
    %c1_i32_131 = arith.constant 1 : i32
    %150 = arith.addi %149, %c1_i32_131 : i32
    %c0_132 = arith.constant 0 : index
    %151 = arith.index_cast %150 : i32 to index
    %c0_133 = arith.constant 0 : index
    %c0_134 = arith.constant 0 : index
    %152 = vector.load %arg2[%c0_132, %151, %c0_133, %c0_134] : memref<1x36x4x9xbf16, #tpu.memory_space<vmem>>, vector<1x1x4x8xbf16>
    %153 = vector.shape_cast %152 : vector<1x1x4x8xbf16> to vector<4x8xbf16>
    %c6_135 = arith.constant 6 : index
    %c0_136 = arith.constant 0 : index
    %c0_137 = arith.constant 0 : index
    %154 = vector.load %arg3[%c6_135, %c0_136, %c0_137] : memref<9x8x4xbf16, #tpu.memory_space<vmem>>, vector<1x8x4xbf16>
    %155 = vector.shape_cast %154 : vector<1x8x4xbf16> to vector<8x4xbf16>
    %cst_138 = arith.constant dense<0.000000e+00> : vector<8x8xf32>
    %156 = tpu.matmul %155, %153, %cst_138 {dimension_numbers = #tpu.dot_dimension_numbers<[1], [0], [0], [1], [0, 0, 1, 1], [], []>} : vector<8x4xbf16>, vector<4x8xbf16>, vector<8x8xf32> -> vector<8x8xf32>
    %157 = arith.addf %148, %156 : vector<8x8xf32>
    %c9_i32_139 = arith.constant 9 : i32
    %158 = arith.addi %c9_i32_139, %93 : i32
    %c1_i32_140 = arith.constant 1 : i32
    %159 = arith.addi %158, %c1_i32_140 : i32
    %c0_141 = arith.constant 0 : index
    %160 = arith.index_cast %159 : i32 to index
    %c0_142 = arith.constant 0 : index
    %c0_143 = arith.constant 0 : index
    %161 = vector.load %arg2[%c0_141, %160, %c0_142, %c0_143] : memref<1x36x4x9xbf16, #tpu.memory_space<vmem>>, vector<1x1x4x8xbf16>
    %162 = vector.shape_cast %161 : vector<1x1x4x8xbf16> to vector<4x8xbf16>
    %c7_144 = arith.constant 7 : index
    %c0_145 = arith.constant 0 : index
    %c0_146 = arith.constant 0 : index
    %163 = vector.load %arg3[%c7_144, %c0_145, %c0_146] : memref<9x8x4xbf16, #tpu.memory_space<vmem>>, vector<1x8x4xbf16>
    %164 = vector.shape_cast %163 : vector<1x8x4xbf16> to vector<8x4xbf16>
    %cst_147 = arith.constant dense<0.000000e+00> : vector<8x8xf32>
    %165 = tpu.matmul %164, %162, %cst_147 {dimension_numbers = #tpu.dot_dimension_numbers<[1], [0], [0], [1], [0, 0, 1, 1], [], []>} : vector<8x4xbf16>, vector<4x8xbf16>, vector<8x8xf32> -> vector<8x8xf32>
    %166 = arith.addf %157, %165 : vector<8x8xf32>
    %c0_i32_148 = arith.constant 0 : i32
    %167 = arith.addi %c0_i32_148, %93 : i32
    %c1_i32_149 = arith.constant 1 : i32
    %168 = arith.addi %167, %c1_i32_149 : i32
    %c0_150 = arith.constant 0 : index
    %169 = arith.index_cast %168 : i32 to index
    %c0_151 = arith.constant 0 : index
    %c1_152 = arith.constant 1 : index
    %170 = vector.load %arg2[%c0_150, %169, %c0_151, %c1_152] : memref<1x36x4x9xbf16, #tpu.memory_space<vmem>>, vector<1x1x4x8xbf16>
    %171 = vector.shape_cast %170 : vector<1x1x4x8xbf16> to vector<4x8xbf16>
    %c8_153 = arith.constant 8 : index
    %c0_154 = arith.constant 0 : index
    %c0_155 = arith.constant 0 : index
    %172 = vector.load %arg3[%c8_153, %c0_154, %c0_155] : memref<9x8x4xbf16, #tpu.memory_space<vmem>>, vector<1x8x4xbf16>
    %173 = vector.shape_cast %172 : vector<1x8x4xbf16> to vector<8x4xbf16>
    %cst_156 = arith.constant dense<0.000000e+00> : vector<8x8xf32>
    %174 = tpu.matmul %173, %171, %cst_156 {dimension_numbers = #tpu.dot_dimension_numbers<[1], [0], [0], [1], [0, 0, 1, 1], [], []>} : vector<8x4xbf16>, vector<4x8xbf16>, vector<8x8xf32> -> vector<8x8xf32>
    %175 = arith.addf %166, %174 : vector<8x8xf32>
    %176 = vector.broadcast %1 : vector<8x1xf32> to vector<8x8xf32>
    %177 = arith.addf %175, %176 : vector<8x8xf32>
    %cst_157 = arith.constant 0.000000e+00 : f32
    %178 = vector.broadcast %cst_157 : f32 to vector<8x8xf32>
    %179 = arith.maximumf %177, %178 : vector<8x8xf32>
    %c0_158 = arith.constant 0 : index
    %180 = arith.index_cast %c1_i32_74 : i32 to index
    %c0_159 = arith.constant 0 : index
    %c0_160 = arith.constant 0 : index
    %181 = vector.load %arg5[%c0_158, %180, %c0_159, %c0_160] : memref<1x8x8x8xf32, #tpu.memory_space<vmem>>, vector<1x1x8x8xf32>
    %182 = vector.shape_cast %181 : vector<1x1x8x8xf32> to vector<8x8xf32>
    %183 = vector.shape_cast %179 : vector<8x8xf32> to vector<1x1x8x8xf32>
    tpu.vector_store %arg5[%c0_158, %180, %c0_159, %c0_160], %183 {strides = array<i32>} : memref<1x8x8x8xf32, #tpu.memory_space<vmem>>, vector<1x1x8x8xf32>,
    %c2_i32 = arith.constant 2 : i32
    %184 = arith.addi %0, %c2_i32 : i32
    %cst_161 = arith.constant 0.000000e+00 : f32
    %185 = vector.broadcast %cst_161 : f32 to vector<8x8xf32>
    %c0_i32_162 = arith.constant 0 : i32
    %186 = arith.addi %c0_i32_162, %184 : i32
    %c0_i32_163 = arith.constant 0 : i32
    %187 = arith.addi %186, %c0_i32_163 : i32
    %c0_164 = arith.constant 0 : index
    %188 = arith.index_cast %187 : i32 to index
    %c0_165 = arith.constant 0 : index
    %c0_166 = arith.constant 0 : index
    %189 = vector.load %arg2[%c0_164, %188, %c0_165, %c0_166] : memref<1x36x4x9xbf16, #tpu.memory_space<vmem>>, vector<1x1x4x8xbf16>
    %190 = vector.shape_cast %189 : vector<1x1x4x8xbf16> to vector<4x8xbf16>
    %c0_167 = arith.constant 0 : index
    %c0_168 = arith.constant 0 : index
    %c0_169 = arith.constant 0 : index
    %191 = vector.load %arg3[%c0_167, %c0_168, %c0_169] : memref<9x8x4xbf16, #tpu.memory_space<vmem>>, vector<1x8x4xbf16>
    %192 = vector.shape_cast %191 : vector<1x8x4xbf16> to vector<8x4xbf16>
    %cst_170 = arith.constant dense<0.000000e+00> : vector<8x8xf32>
    %193 = tpu.matmul %192, %190, %cst_170 {dimension_numbers = #tpu.dot_dimension_numbers<[1], [0], [0], [1], [0, 0, 1, 1], [], []>} : vector<8x4xbf16>, vector<4x8xbf16>, vector<8x8xf32> -> vector<8x8xf32>
    %194 = arith.addf %185, %193 : vector<8x8xf32>
    %c9_i32_171 = arith.constant 9 : i32
    %195 = arith.addi %c9_i32_171, %184 : i32
    %c0_i32_172 = arith.constant 0 : i32
    %196 = arith.addi %195, %c0_i32_172 : i32
    %c0_173 = arith.constant 0 : index
    %197 = arith.index_cast %196 : i32 to index
    %c0_174 = arith.constant 0 : index
    %c0_175 = arith.constant 0 : index
    %198 = vector.load %arg2[%c0_173, %197, %c0_174, %c0_175] : memref<1x36x4x9xbf16, #tpu.memory_space<vmem>>, vector<1x1x4x8xbf16>
    %199 = vector.shape_cast %198 : vector<1x1x4x8xbf16> to vector<4x8xbf16>
    %c1_176 = arith.constant 1 : index
    %c0_177 = arith.constant 0 : index
    %c0_178 = arith.constant 0 : index
    %200 = vector.load %arg3[%c1_176, %c0_177, %c0_178] : memref<9x8x4xbf16, #tpu.memory_space<vmem>>, vector<1x8x4xbf16>
    %201 = vector.shape_cast %200 : vector<1x8x4xbf16> to vector<8x4xbf16>
    %cst_179 = arith.constant dense<0.000000e+00> : vector<8x8xf32>
    %202 = tpu.matmul %201, %199, %cst_179 {dimension_numbers = #tpu.dot_dimension_numbers<[1], [0], [0], [1], [0, 0, 1, 1], [], []>} : vector<8x4xbf16>, vector<4x8xbf16>, vector<8x8xf32> -> vector<8x8xf32>
    %203 = arith.addf %194, %202 : vector<8x8xf32>
    %c0_i32_180 = arith.constant 0 : i32
    %204 = arith.addi %c0_i32_180, %184 : i32
    %c0_i32_181 = arith.constant 0 : i32
    %205 = arith.addi %204, %c0_i32_181 : i32
    %c0_182 = arith.constant 0 : index
    %206 = arith.index_cast %205 : i32 to index
    %c0_183 = arith.constant 0 : index
    %c1_184 = arith.constant 1 : index
    %207 = vector.load %arg2[%c0_182, %206, %c0_183, %c1_184] : memref<1x36x4x9xbf16, #tpu.memory_space<vmem>>, vector<1x1x4x8xbf16>
    %208 = vector.shape_cast %207 : vector<1x1x4x8xbf16> to vector<4x8xbf16>
    %c2_185 = arith.constant 2 : index
    %c0_186 = arith.constant 0 : index
    %c0_187 = arith.constant 0 : index
    %209 = vector.load %arg3[%c2_185, %c0_186, %c0_187] : memref<9x8x4xbf16, #tpu.memory_space<vmem>>, vector<1x8x4xbf16>
    %210 = vector.shape_cast %209 : vector<1x8x4xbf16> to vector<8x4xbf16>
    %cst_188 = arith.constant dense<0.000000e+00> : vector<8x8xf32>
    %211 = tpu.matmul %210, %208, %cst_188 {dimension_numbers = #tpu.dot_dimension_numbers<[1], [0], [0], [1], [0, 0, 1, 1], [], []>} : vector<8x4xbf16>, vector<4x8xbf16>, vector<8x8xf32> -> vector<8x8xf32>
    %212 = arith.addf %203, %211 : vector<8x8xf32>
    %c18_i32_189 = arith.constant 18 : i32
    %213 = arith.addi %c18_i32_189, %184 : i32
    %c0_i32_190 = arith.constant 0 : i32
    %214 = arith.addi %213, %c0_i32_190 : i32
    %c0_191 = arith.constant 0 : index
    %215 = arith.index_cast %214 : i32 to index
    %c0_192 = arith.constant 0 : index
    %c0_193 = arith.constant 0 : index
    %216 = vector.load %arg2[%c0_191, %215, %c0_192, %c0_193] : memref<1x36x4x9xbf16, #tpu.memory_space<vmem>>, vector<1x1x4x8xbf16>
    %217 = vector.shape_cast %216 : vector<1x1x4x8xbf16> to vector<4x8xbf16>
    %c3_194 = arith.constant 3 : index
    %c0_195 = arith.constant 0 : index
    %c0_196 = arith.constant 0 : index
    %218 = vector.load %arg3[%c3_194, %c0_195, %c0_196] : memref<9x8x4xbf16, #tpu.memory_space<vmem>>, vector<1x8x4xbf16>
    %219 = vector.shape_cast %218 : vector<1x8x4xbf16> to vector<8x4xbf16>
    %cst_197 = arith.constant dense<0.000000e+00> : vector<8x8xf32>
    %220 = tpu.matmul %219, %217, %cst_197 {dimension_numbers = #tpu.dot_dimension_numbers<[1], [0], [0], [1], [0, 0, 1, 1], [], []>} : vector<8x4xbf16>, vector<4x8xbf16>, vector<8x8xf32> -> vector<8x8xf32>
    %221 = arith.addf %212, %220 : vector<8x8xf32>
    %c27_i32_198 = arith.constant 27 : i32
    %222 = arith.addi %c27_i32_198, %184 : i32
    %c0_i32_199 = arith.constant 0 : i32
    %223 = arith.addi %222, %c0_i32_199 : i32
    %c0_200 = arith.constant 0 : index
    %224 = arith.index_cast %223 : i32 to index
    %c0_201 = arith.constant 0 : index
    %c0_202 = arith.constant 0 : index
    %225 = vector.load %arg2[%c0_200, %224, %c0_201, %c0_202] : memref<1x36x4x9xbf16, #tpu.memory_space<vmem>>, vector<1x1x4x8xbf16>
    %226 = vector.shape_cast %225 : vector<1x1x4x8xbf16> to vector<4x8xbf16>
    %c4_203 = arith.constant 4 : index
    %c0_204 = arith.constant 0 : index
    %c0_205 = arith.constant 0 : index
    %227 = vector.load %arg3[%c4_203, %c0_204, %c0_205] : memref<9x8x4xbf16, #tpu.memory_space<vmem>>, vector<1x8x4xbf16>
    %228 = vector.shape_cast %227 : vector<1x8x4xbf16> to vector<8x4xbf16>
    %cst_206 = arith.constant dense<0.000000e+00> : vector<8x8xf32>
    %229 = tpu.matmul %228, %226, %cst_206 {dimension_numbers = #tpu.dot_dimension_numbers<[1], [0], [0], [1], [0, 0, 1, 1], [], []>} : vector<8x4xbf16>, vector<4x8xbf16>, vector<8x8xf32> -> vector<8x8xf32>
    %230 = arith.addf %221, %229 : vector<8x8xf32>
    %c18_i32_207 = arith.constant 18 : i32
    %231 = arith.addi %c18_i32_207, %184 : i32
    %c0_i32_208 = arith.constant 0 : i32
    %232 = arith.addi %231, %c0_i32_208 : i32
    %c0_209 = arith.constant 0 : index
    %233 = arith.index_cast %232 : i32 to index
    %c0_210 = arith.constant 0 : index
    %c1_211 = arith.constant 1 : index
    %234 = vector.load %arg2[%c0_209, %233, %c0_210, %c1_211] : memref<1x36x4x9xbf16, #tpu.memory_space<vmem>>, vector<1x1x4x8xbf16>
    %235 = vector.shape_cast %234 : vector<1x1x4x8xbf16> to vector<4x8xbf16>
    %c5_212 = arith.constant 5 : index
    %c0_213 = arith.constant 0 : index
    %c0_214 = arith.constant 0 : index
    %236 = vector.load %arg3[%c5_212, %c0_213, %c0_214] : memref<9x8x4xbf16, #tpu.memory_space<vmem>>, vector<1x8x4xbf16>
    %237 = vector.shape_cast %236 : vector<1x8x4xbf16> to vector<8x4xbf16>
    %cst_215 = arith.constant dense<0.000000e+00> : vector<8x8xf32>
    %238 = tpu.matmul %237, %235, %cst_215 {dimension_numbers = #tpu.dot_dimension_numbers<[1], [0], [0], [1], [0, 0, 1, 1], [], []>} : vector<8x4xbf16>, vector<4x8xbf16>, vector<8x8xf32> -> vector<8x8xf32>
    %239 = arith.addf %230, %238 : vector<8x8xf32>
    %c0_i32_216 = arith.constant 0 : i32
    %240 = arith.addi %c0_i32_216, %184 : i32
    %c1_i32_217 = arith.constant 1 : i32
    %241 = arith.addi %240, %c1_i32_217 : i32
    %c0_218 = arith.constant 0 : index
    %242 = arith.index_cast %241 : i32 to index
    %c0_219 = arith.constant 0 : index
    %c0_220 = arith.constant 0 : index
    %243 = vector.load %arg2[%c0_218, %242, %c0_219, %c0_220] : memref<1x36x4x9xbf16, #tpu.memory_space<vmem>>, vector<1x1x4x8xbf16>
    %244 = vector.shape_cast %243 : vector<1x1x4x8xbf16> to vector<4x8xbf16>
    %c6_221 = arith.constant 6 : index
    %c0_222 = arith.constant 0 : index
    %c0_223 = arith.constant 0 : index
    %245 = vector.load %arg3[%c6_221, %c0_222, %c0_223] : memref<9x8x4xbf16, #tpu.memory_space<vmem>>, vector<1x8x4xbf16>
    %246 = vector.shape_cast %245 : vector<1x8x4xbf16> to vector<8x4xbf16>
    %cst_224 = arith.constant dense<0.000000e+00> : vector<8x8xf32>
    %247 = tpu.matmul %246, %244, %cst_224 {dimension_numbers = #tpu.dot_dimension_numbers<[1], [0], [0], [1], [0, 0, 1, 1], [], []>} : vector<8x4xbf16>, vector<4x8xbf16>, vector<8x8xf32> -> vector<8x8xf32>
    %248 = arith.addf %239, %247 : vector<8x8xf32>
    %c9_i32_225 = arith.constant 9 : i32
    %249 = arith.addi %c9_i32_225, %184 : i32
    %c1_i32_226 = arith.constant 1 : i32
    %250 = arith.addi %249, %c1_i32_226 : i32
    %c0_227 = arith.constant 0 : index
    %251 = arith.index_cast %250 : i32 to index
    %c0_228 = arith.constant 0 : index
    %c0_229 = arith.constant 0 : index
    %252 = vector.load %arg2[%c0_227, %251, %c0_228, %c0_229] : memref<1x36x4x9xbf16, #tpu.memory_space<vmem>>, vector<1x1x4x8xbf16>
    %253 = vector.shape_cast %252 : vector<1x1x4x8xbf16> to vector<4x8xbf16>
    %c7_230 = arith.constant 7 : index
    %c0_231 = arith.constant 0 : index
    %c0_232 = arith.constant 0 : index
    %254 = vector.load %arg3[%c7_230, %c0_231, %c0_232] : memref<9x8x4xbf16, #tpu.memory_space<vmem>>, vector<1x8x4xbf16>
    %255 = vector.shape_cast %254 : vector<1x8x4xbf16> to vector<8x4xbf16>
    %cst_233 = arith.constant dense<0.000000e+00> : vector<8x8xf32>
    %256 = tpu.matmul %255, %253, %cst_233 {dimension_numbers = #tpu.dot_dimension_numbers<[1], [0], [0], [1], [0, 0, 1, 1], [], []>} : vector<8x4xbf16>, vector<4x8xbf16>, vector<8x8xf32> -> vector<8x8xf32>
    %257 = arith.addf %248, %256 : vector<8x8xf32>
    %c0_i32_234 = arith.constant 0 : i32
    %258 = arith.addi %c0_i32_234, %184 : i32
    %c1_i32_235 = arith.constant 1 : i32
    %259 = arith.addi %258, %c1_i32_235 : i32
    %c0_236 = arith.constant 0 : index
    %260 = arith.index_cast %259 : i32 to index
    %c0_237 = arith.constant 0 : index
    %c1_238 = arith.constant 1 : index
    %261 = vector.load %arg2[%c0_236, %260, %c0_237, %c1_238] : memref<1x36x4x9xbf16, #tpu.memory_space<vmem>>, vector<1x1x4x8xbf16>
    %262 = vector.shape_cast %261 : vector<1x1x4x8xbf16> to vector<4x8xbf16>
    %c8_239 = arith.constant 8 : index
    %c0_240 = arith.constant 0 : index
    %c0_241 = arith.constant 0 : index
    %263 = vector.load %arg3[%c8_239, %c0_240, %c0_241] : memref<9x8x4xbf16, #tpu.memory_space<vmem>>, vector<1x8x4xbf16>
    %264 = vector.shape_cast %263 : vector<1x8x4xbf16> to vector<8x4xbf16>
    %cst_242 = arith.constant dense<0.000000e+00> : vector<8x8xf32>
    %265 = tpu.matmul %264, %262, %cst_242 {dimension_numbers = #tpu.dot_dimension_numbers<[1], [0], [0], [1], [0, 0, 1, 1], [], []>} : vector<8x4xbf16>, vector<4x8xbf16>, vector<8x8xf32> -> vector<8x8xf32>
    %266 = arith.addf %257, %265 : vector<8x8xf32>
    %267 = vector.broadcast %1 : vector<8x1xf32> to vector<8x8xf32>
    %268 = arith.addf %266, %267 : vector<8x8xf32>
    %cst_243 = arith.constant 0.000000e+00 : f32
    %269 = vector.broadcast %cst_243 : f32 to vector<8x8xf32>
    %270 = arith.maximumf %268, %269 : vector<8x8xf32>
    %c0_244 = arith.constant 0 : index
    %271 = arith.index_cast %c2_i32 : i32 to index
    %c0_245 = arith.constant 0 : index
    %c0_246 = arith.constant 0 : index
    %272 = vector.load %arg5[%c0_244, %271, %c0_245, %c0_246] : memref<1x8x8x8xf32, #tpu.memory_space<vmem>>, vector<1x1x8x8xf32>
    %273 = vector.shape_cast %272 : vector<1x1x8x8xf32> to vector<8x8xf32>
    %274 = vector.shape_cast %270 : vector<8x8xf32> to vector<1x1x8x8xf32>
    tpu.vector_store %arg5[%c0_244, %271, %c0_245, %c0_246], %274 {strides = array<i32>} : memref<1x8x8x8xf32, #tpu.memory_space<vmem>>, vector<1x1x8x8xf32>,
    %c3_i32 = arith.constant 3 : i32
    %275 = arith.addi %0, %c3_i32 : i32
    %cst_247 = arith.constant 0.000000e+00 : f32
    %276 = vector.broadcast %cst_247 : f32 to vector<8x8xf32>
    %c0_i32_248 = arith.constant 0 : i32
    %277 = arith.addi %c0_i32_248, %275 : i32
    %c0_i32_249 = arith.constant 0 : i32
    %278 = arith.addi %277, %c0_i32_249 : i32
    %c0_250 = arith.constant 0 : index
    %279 = arith.index_cast %278 : i32 to index
    %c0_251 = arith.constant 0 : index
    %c0_252 = arith.constant 0 : index
    %280 = vector.load %arg2[%c0_250, %279, %c0_251, %c0_252] : memref<1x36x4x9xbf16, #tpu.memory_space<vmem>>, vector<1x1x4x8xbf16>
    %281 = vector.shape_cast %280 : vector<1x1x4x8xbf16> to vector<4x8xbf16>
    %c0_253 = arith.constant 0 : index
    %c0_254 = arith.constant 0 : index
    %c0_255 = arith.constant 0 : index
    %282 = vector.load %arg3[%c0_253, %c0_254, %c0_255] : memref<9x8x4xbf16, #tpu.memory_space<vmem>>, vector<1x8x4xbf16>
    %283 = vector.shape_cast %282 : vector<1x8x4xbf16> to vector<8x4xbf16>
    %cst_256 = arith.constant dense<0.000000e+00> : vector<8x8xf32>
    %284 = tpu.matmul %283, %281, %cst_256 {dimension_numbers = #tpu.dot_dimension_numbers<[1], [0], [0], [1], [0, 0, 1, 1], [], []>} : vector<8x4xbf16>, vector<4x8xbf16>, vector<8x8xf32> -> vector<8x8xf32>
    %285 = arith.addf %276, %284 : vector<8x8xf32>
    %c9_i32_257 = arith.constant 9 : i32
    %286 = arith.addi %c9_i32_257, %275 : i32
    %c0_i32_258 = arith.constant 0 : i32
    %287 = arith.addi %286, %c0_i32_258 : i32
    %c0_259 = arith.constant 0 : index
    %288 = arith.index_cast %287 : i32 to index
    %c0_260 = arith.constant 0 : index
    %c0_261 = arith.constant 0 : index
    %289 = vector.load %arg2[%c0_259, %288, %c0_260, %c0_261] : memref<1x36x4x9xbf16, #tpu.memory_space<vmem>>, vector<1x1x4x8xbf16>
    %290 = vector.shape_cast %289 : vector<1x1x4x8xbf16> to vector<4x8xbf16>
    %c1_262 = arith.constant 1 : index
    %c0_263 = arith.constant 0 : index
    %c0_264 = arith.constant 0 : index
    %291 = vector.load %arg3[%c1_262, %c0_263, %c0_264] : memref<9x8x4xbf16, #tpu.memory_space<vmem>>, vector<1x8x4xbf16>
    %292 = vector.shape_cast %291 : vector<1x8x4xbf16> to vector<8x4xbf16>
    %cst_265 = arith.constant dense<0.000000e+00> : vector<8x8xf32>
    %293 = tpu.matmul %292, %290, %cst_265 {dimension_numbers = #tpu.dot_dimension_numbers<[1], [0], [0], [1], [0, 0, 1, 1], [], []>} : vector<8x4xbf16>, vector<4x8xbf16>, vector<8x8xf32> -> vector<8x8xf32>
    %294 = arith.addf %285, %293 : vector<8x8xf32>
    %c0_i32_266 = arith.constant 0 : i32
    %295 = arith.addi %c0_i32_266, %275 : i32
    %c0_i32_267 = arith.constant 0 : i32
    %296 = arith.addi %295, %c0_i32_267 : i32
    %c0_268 = arith.constant 0 : index
    %297 = arith.index_cast %296 : i32 to index
    %c0_269 = arith.constant 0 : index
    %c1_270 = arith.constant 1 : index
    %298 = vector.load %arg2[%c0_268, %297, %c0_269, %c1_270] : memref<1x36x4x9xbf16, #tpu.memory_space<vmem>>, vector<1x1x4x8xbf16>
    %299 = vector.shape_cast %298 : vector<1x1x4x8xbf16> to vector<4x8xbf16>
    %c2_271 = arith.constant 2 : index
    %c0_272 = arith.constant 0 : index
    %c0_273 = arith.constant 0 : index
    %300 = vector.load %arg3[%c2_271, %c0_272, %c0_273] : memref<9x8x4xbf16, #tpu.memory_space<vmem>>, vector<1x8x4xbf16>
    %301 = vector.shape_cast %300 : vector<1x8x4xbf16> to vector<8x4xbf16>
    %cst_274 = arith.constant dense<0.000000e+00> : vector<8x8xf32>
    %302 = tpu.matmul %301, %299, %cst_274 {dimension_numbers = #tpu.dot_dimension_numbers<[1], [0], [0], [1], [0, 0, 1, 1], [], []>} : vector<8x4xbf16>, vector<4x8xbf16>, vector<8x8xf32> -> vector<8x8xf32>
    %303 = arith.addf %294, %302 : vector<8x8xf32>
    %c18_i32_275 = arith.constant 18 : i32
    %304 = arith.addi %c18_i32_275, %275 : i32
    %c0_i32_276 = arith.constant 0 : i32
    %305 = arith.addi %304, %c0_i32_276 : i32
    %c0_277 = arith.constant 0 : index
    %306 = arith.index_cast %305 : i32 to index
    %c0_278 = arith.constant 0 : index
    %c0_279 = arith.constant 0 : index
    %307 = vector.load %arg2[%c0_277, %306, %c0_278, %c0_279] : memref<1x36x4x9xbf16, #tpu.memory_space<vmem>>, vector<1x1x4x8xbf16>
    %308 = vector.shape_cast %307 : vector<1x1x4x8xbf16> to vector<4x8xbf16>
    %c3_280 = arith.constant 3 : index
    %c0_281 = arith.constant 0 : index
    %c0_282 = arith.constant 0 : index
    %309 = vector.load %arg3[%c3_280, %c0_281, %c0_282] : memref<9x8x4xbf16, #tpu.memory_space<vmem>>, vector<1x8x4xbf16>
    %310 = vector.shape_cast %309 : vector<1x8x4xbf16> to vector<8x4xbf16>
    %cst_283 = arith.constant dense<0.000000e+00> : vector<8x8xf32>
    %311 = tpu.matmul %310, %308, %cst_283 {dimension_numbers = #tpu.dot_dimension_numbers<[1], [0], [0], [1], [0, 0, 1, 1], [], []>} : vector<8x4xbf16>, vector<4x8xbf16>, vector<8x8xf32> -> vector<8x8xf32>
    %312 = arith.addf %303, %311 : vector<8x8xf32>
    %c27_i32_284 = arith.constant 27 : i32
    %313 = arith.addi %c27_i32_284, %275 : i32
    %c0_i32_285 = arith.constant 0 : i32
    %314 = arith.addi %313, %c0_i32_285 : i32
    %c0_286 = arith.constant 0 : index
    %315 = arith.index_cast %314 : i32 to index
    %c0_287 = arith.constant 0 : index
    %c0_288 = arith.constant 0 : index
    %316 = vector.load %arg2[%c0_286, %315, %c0_287, %c0_288] : memref<1x36x4x9xbf16, #tpu.memory_space<vmem>>, vector<1x1x4x8xbf16>
    %317 = vector.shape_cast %316 : vector<1x1x4x8xbf16> to vector<4x8xbf16>
    %c4_289 = arith.constant 4 : index
    %c0_290 = arith.constant 0 : index
    %c0_291 = arith.constant 0 : index
    %318 = vector.load %arg3[%c4_289, %c0_290, %c0_291] : memref<9x8x4xbf16, #tpu.memory_space<vmem>>, vector<1x8x4xbf16>
    %319 = vector.shape_cast %318 : vector<1x8x4xbf16> to vector<8x4xbf16>
    %cst_292 = arith.constant dense<0.000000e+00> : vector<8x8xf32>
    %320 = tpu.matmul %319, %317, %cst_292 {dimension_numbers = #tpu.dot_dimension_numbers<[1], [0], [0], [1], [0, 0, 1, 1], [], []>} : vector<8x4xbf16>, vector<4x8xbf16>, vector<8x8xf32> -> vector<8x8xf32>
    %321 = arith.addf %312, %320 : vector<8x8xf32>
    %c18_i32_293 = arith.constant 18 : i32
    %322 = arith.addi %c18_i32_293, %275 : i32
    %c0_i32_294 = arith.constant 0 : i32
    %323 = arith.addi %322, %c0_i32_294 : i32
    %c0_295 = arith.constant 0 : index
    %324 = arith.index_cast %323 : i32 to index
    %c0_296 = arith.constant 0 : index
    %c1_297 = arith.constant 1 : index
    %325 = vector.load %arg2[%c0_295, %324, %c0_296, %c1_297] : memref<1x36x4x9xbf16, #tpu.memory_space<vmem>>, vector<1x1x4x8xbf16>
    %326 = vector.shape_cast %325 : vector<1x1x4x8xbf16> to vector<4x8xbf16>
    %c5_298 = arith.constant 5 : index
    %c0_299 = arith.constant 0 : index
    %c0_300 = arith.constant 0 : index
    %327 = vector.load %arg3[%c5_298, %c0_299, %c0_300] : memref<9x8x4xbf16, #tpu.memory_space<vmem>>, vector<1x8x4xbf16>
    %328 = vector.shape_cast %327 : vector<1x8x4xbf16> to vector<8x4xbf16>
    %cst_301 = arith.constant dense<0.000000e+00> : vector<8x8xf32>
    %329 = tpu.matmul %328, %326, %cst_301 {dimension_numbers = #tpu.dot_dimension_numbers<[1], [0], [0], [1], [0, 0, 1, 1], [], []>} : vector<8x4xbf16>, vector<4x8xbf16>, vector<8x8xf32> -> vector<8x8xf32>
    %330 = arith.addf %321, %329 : vector<8x8xf32>
    %c0_i32_302 = arith.constant 0 : i32
    %331 = arith.addi %c0_i32_302, %275 : i32
    %c1_i32_303 = arith.constant 1 : i32
    %332 = arith.addi %331, %c1_i32_303 : i32
    %c0_304 = arith.constant 0 : index
    %333 = arith.index_cast %332 : i32 to index
    %c0_305 = arith.constant 0 : index
    %c0_306 = arith.constant 0 : index
    %334 = vector.load %arg2[%c0_304, %333, %c0_305, %c0_306] : memref<1x36x4x9xbf16, #tpu.memory_space<vmem>>, vector<1x1x4x8xbf16>
    %335 = vector.shape_cast %334 : vector<1x1x4x8xbf16> to vector<4x8xbf16>
    %c6_307 = arith.constant 6 : index
    %c0_308 = arith.constant 0 : index
    %c0_309 = arith.constant 0 : index
    %336 = vector.load %arg3[%c6_307, %c0_308, %c0_309] : memref<9x8x4xbf16, #tpu.memory_space<vmem>>, vector<1x8x4xbf16>
    %337 = vector.shape_cast %336 : vector<1x8x4xbf16> to vector<8x4xbf16>
    %cst_310 = arith.constant dense<0.000000e+00> : vector<8x8xf32>
    %338 = tpu.matmul %337, %335, %cst_310 {dimension_numbers = #tpu.dot_dimension_numbers<[1], [0], [0], [1], [0, 0, 1, 1], [], []>} : vector<8x4xbf16>, vector<4x8xbf16>, vector<8x8xf32> -> vector<8x8xf32>
    %339 = arith.addf %330, %338 : vector<8x8xf32>
    %c9_i32_311 = arith.constant 9 : i32
    %340 = arith.addi %c9_i32_311, %275 : i32
    %c1_i32_312 = arith.constant 1 : i32
    %341 = arith.addi %340, %c1_i32_312 : i32
    %c0_313 = arith.constant 0 : index
    %342 = arith.index_cast %341 : i32 to index
    %c0_314 = arith.constant 0 : index
    %c0_315 = arith.constant 0 : index
    %343 = vector.load %arg2[%c0_313, %342, %c0_314, %c0_315] : memref<1x36x4x9xbf16, #tpu.memory_space<vmem>>, vector<1x1x4x8xbf16>
    %344 = vector.shape_cast %343 : vector<1x1x4x8xbf16> to vector<4x8xbf16>
    %c7_316 = arith.constant 7 : index
    %c0_317 = arith.constant 0 : index
    %c0_318 = arith.constant 0 : index
    %345 = vector.load %arg3[%c7_316, %c0_317, %c0_318] : memref<9x8x4xbf16, #tpu.memory_space<vmem>>, vector<1x8x4xbf16>
    %346 = vector.shape_cast %345 : vector<1x8x4xbf16> to vector<8x4xbf16>
    %cst_319 = arith.constant dense<0.000000e+00> : vector<8x8xf32>
    %347 = tpu.matmul %346, %344, %cst_319 {dimension_numbers = #tpu.dot_dimension_numbers<[1], [0], [0], [1], [0, 0, 1, 1], [], []>} : vector<8x4xbf16>, vector<4x8xbf16>, vector<8x8xf32> -> vector<8x8xf32>
    %348 = arith.addf %339, %347 : vector<8x8xf32>
    %c0_i32_320 = arith.constant 0 : i32
    %349 = arith.addi %c0_i32_320, %275 : i32
    %c1_i32_321 = arith.constant 1 : i32
    %350 = arith.addi %349, %c1_i32_321 : i32
    %c0_322 = arith.constant 0 : index
    %351 = arith.index_cast %350 : i32 to index
    %c0_323 = arith.constant 0 : index
    %c1_324 = arith.constant 1 : index
    %352 = vector.load %arg2[%c0_322, %351, %c0_323, %c1_324] : memref<1x36x4x9xbf16, #tpu.memory_space<vmem>>, vector<1x1x4x8xbf16>
    %353 = vector.shape_cast %352 : vector<1x1x4x8xbf16> to vector<4x8xbf16>
    %c8_325 = arith.constant 8 : index
    %c0_326 = arith.constant 0 : index
    %c0_327 = arith.constant 0 : index
    %354 = vector.load %arg3[%c8_325, %c0_326, %c0_327] : memref<9x8x4xbf16, #tpu.memory_space<vmem>>, vector<1x8x4xbf16>
    %355 = vector.shape_cast %354 : vector<1x8x4xbf16> to vector<8x4xbf16>
    %cst_328 = arith.constant dense<0.000000e+00> : vector<8x8xf32>
    %356 = tpu.matmul %355, %353, %cst_328 {dimension_numbers = #tpu.dot_dimension_numbers<[1], [0], [0], [1], [0, 0, 1, 1], [], []>} : vector<8x4xbf16>, vector<4x8xbf16>, vector<8x8xf32> -> vector<8x8xf32>
    %357 = arith.addf %348, %356 : vector<8x8xf32>
    %358 = vector.broadcast %1 : vector<8x1xf32> to vector<8x8xf32>
    %359 = arith.addf %357, %358 : vector<8x8xf32>
    %cst_329 = arith.constant 0.000000e+00 : f32
    %360 = vector.broadcast %cst_329 : f32 to vector<8x8xf32>
    %361 = arith.maximumf %359, %360 : vector<8x8xf32>
    %c0_330 = arith.constant 0 : index
    %362 = arith.index_cast %c3_i32 : i32 to index
    %c0_331 = arith.constant 0 : index
    %c0_332 = arith.constant 0 : index
    %363 = vector.load %arg5[%c0_330, %362, %c0_331, %c0_332] : memref<1x8x8x8xf32, #tpu.memory_space<vmem>>, vector<1x1x8x8xf32>
    %364 = vector.shape_cast %363 : vector<1x1x8x8xf32> to vector<8x8xf32>
    %365 = vector.shape_cast %361 : vector<8x8xf32> to vector<1x1x8x8xf32>
    tpu.vector_store %arg5[%c0_330, %362, %c0_331, %c0_332], %365 {strides = array<i32>} : memref<1x8x8x8xf32, #tpu.memory_space<vmem>>, vector<1x1x8x8xf32>,
    %c4_i32 = arith.constant 4 : i32
    %366 = arith.addi %0, %c4_i32 : i32
    %cst_333 = arith.constant 0.000000e+00 : f32
    %367 = vector.broadcast %cst_333 : f32 to vector<8x8xf32>
    %c0_i32_334 = arith.constant 0 : i32
    %368 = arith.addi %c0_i32_334, %366 : i32
    %c0_i32_335 = arith.constant 0 : i32
    %369 = arith.addi %368, %c0_i32_335 : i32
    %c0_336 = arith.constant 0 : index
    %370 = arith.index_cast %369 : i32 to index
    %c0_337 = arith.constant 0 : index
    %c0_338 = arith.constant 0 : index
    %371 = vector.load %arg2[%c0_336, %370, %c0_337, %c0_338] : memref<1x36x4x9xbf16, #tpu.memory_space<vmem>>, vector<1x1x4x8xbf16>
    %372 = vector.shape_cast %371 : vector<1x1x4x8xbf16> to vector<4x8xbf16>
    %c0_339 = arith.constant 0 : index
    %c0_340 = arith.constant 0 : index
    %c0_341 = arith.constant 0 : index
    %373 = vector.load %arg3[%c0_339, %c0_340, %c0_341] : memref<9x8x4xbf16, #tpu.memory_space<vmem>>, vector<1x8x4xbf16>
    %374 = vector.shape_cast %373 : vector<1x8x4xbf16> to vector<8x4xbf16>
    %cst_342 = arith.constant dense<0.000000e+00> : vector<8x8xf32>
    %375 = tpu.matmul %374, %372, %cst_342 {dimension_numbers = #tpu.dot_dimension_numbers<[1], [0], [0], [1], [0, 0, 1, 1], [], []>} : vector<8x4xbf16>, vector<4x8xbf16>, vector<8x8xf32> -> vector<8x8xf32>
    %376 = arith.addf %367, %375 : vector<8x8xf32>
    %c9_i32_343 = arith.constant 9 : i32
    %377 = arith.addi %c9_i32_343, %366 : i32
    %c0_i32_344 = arith.constant 0 : i32
    %378 = arith.addi %377, %c0_i32_344 : i32
    %c0_345 = arith.constant 0 : index
    %379 = arith.index_cast %378 : i32 to index
    %c0_346 = arith.constant 0 : index
    %c0_347 = arith.constant 0 : index
    %380 = vector.load %arg2[%c0_345, %379, %c0_346, %c0_347] : memref<1x36x4x9xbf16, #tpu.memory_space<vmem>>, vector<1x1x4x8xbf16>
    %381 = vector.shape_cast %380 : vector<1x1x4x8xbf16> to vector<4x8xbf16>
    %c1_348 = arith.constant 1 : index
    %c0_349 = arith.constant 0 : index
    %c0_350 = arith.constant 0 : index
    %382 = vector.load %arg3[%c1_348, %c0_349, %c0_350] : memref<9x8x4xbf16, #tpu.memory_space<vmem>>, vector<1x8x4xbf16>
    %383 = vector.shape_cast %382 : vector<1x8x4xbf16> to vector<8x4xbf16>
    %cst_351 = arith.constant dense<0.000000e+00> : vector<8x8xf32>
    %384 = tpu.matmul %383, %381, %cst_351 {dimension_numbers = #tpu.dot_dimension_numbers<[1], [0], [0], [1], [0, 0, 1, 1], [], []>} : vector<8x4xbf16>, vector<4x8xbf16>, vector<8x8xf32> -> vector<8x8xf32>
    %385 = arith.addf %376, %384 : vector<8x8xf32>
    %c0_i32_352 = arith.constant 0 : i32
    %386 = arith.addi %c0_i32_352, %366 : i32
    %c0_i32_353 = arith.constant 0 : i32
    %387 = arith.addi %386, %c0_i32_353 : i32
    %c0_354 = arith.constant 0 : index
    %388 = arith.index_cast %387 : i32 to index
    %c0_355 = arith.constant 0 : index
    %c1_356 = arith.constant 1 : index
    %389 = vector.load %arg2[%c0_354, %388, %c0_355, %c1_356] : memref<1x36x4x9xbf16, #tpu.memory_space<vmem>>, vector<1x1x4x8xbf16>
    %390 = vector.shape_cast %389 : vector<1x1x4x8xbf16> to vector<4x8xbf16>
    %c2_357 = arith.constant 2 : index
    %c0_358 = arith.constant 0 : index
    %c0_359 = arith.constant 0 : index
    %391 = vector.load %arg3[%c2_357, %c0_358, %c0_359] : memref<9x8x4xbf16, #tpu.memory_space<vmem>>, vector<1x8x4xbf16>
    %392 = vector.shape_cast %391 : vector<1x8x4xbf16> to vector<8x4xbf16>
    %cst_360 = arith.constant dense<0.000000e+00> : vector<8x8xf32>
    %393 = tpu.matmul %392, %390, %cst_360 {dimension_numbers = #tpu.dot_dimension_numbers<[1], [0], [0], [1], [0, 0, 1, 1], [], []>} : vector<8x4xbf16>, vector<4x8xbf16>, vector<8x8xf32> -> vector<8x8xf32>
    %394 = arith.addf %385, %393 : vector<8x8xf32>
    %c18_i32_361 = arith.constant 18 : i32
    %395 = arith.addi %c18_i32_361, %366 : i32
    %c0_i32_362 = arith.constant 0 : i32
    %396 = arith.addi %395, %c0_i32_362 : i32
    %c0_363 = arith.constant 0 : index
    %397 = arith.index_cast %396 : i32 to index
    %c0_364 = arith.constant 0 : index
    %c0_365 = arith.constant 0 : index
    %398 = vector.load %arg2[%c0_363, %397, %c0_364, %c0_365] : memref<1x36x4x9xbf16, #tpu.memory_space<vmem>>, vector<1x1x4x8xbf16>
    %399 = vector.shape_cast %398 : vector<1x1x4x8xbf16> to vector<4x8xbf16>
    %c3_366 = arith.constant 3 : index
    %c0_367 = arith.constant 0 : index
    %c0_368 = arith.constant 0 : index
    %400 = vector.load %arg3[%c3_366, %c0_367, %c0_368] : memref<9x8x4xbf16, #tpu.memory_space<vmem>>, vector<1x8x4xbf16>
    %401 = vector.shape_cast %400 : vector<1x8x4xbf16> to vector<8x4xbf16>
    %cst_369 = arith.constant dense<0.000000e+00> : vector<8x8xf32>
    %402 = tpu.matmul %401, %399, %cst_369 {dimension_numbers = #tpu.dot_dimension_numbers<[1], [0], [0], [1], [0, 0, 1, 1], [], []>} : vector<8x4xbf16>, vector<4x8xbf16>, vector<8x8xf32> -> vector<8x8xf32>
    %403 = arith.addf %394, %402 : vector<8x8xf32>
    %c27_i32_370 = arith.constant 27 : i32
    %404 = arith.addi %c27_i32_370, %366 : i32
    %c0_i32_371 = arith.constant 0 : i32
    %405 = arith.addi %404, %c0_i32_371 : i32
    %c0_372 = arith.constant 0 : index
    %406 = arith.index_cast %405 : i32 to index
    %c0_373 = arith.constant 0 : index
    %c0_374 = arith.constant 0 : index
    %407 = vector.load %arg2[%c0_372, %406, %c0_373, %c0_374] : memref<1x36x4x9xbf16, #tpu.memory_space<vmem>>, vector<1x1x4x8xbf16>
    %408 = vector.shape_cast %407 : vector<1x1x4x8xbf16> to vector<4x8xbf16>
    %c4_375 = arith.constant 4 : index
    %c0_376 = arith.constant 0 : index
    %c0_377 = arith.constant 0 : index
    %409 = vector.load %arg3[%c4_375, %c0_376, %c0_377] : memref<9x8x4xbf16, #tpu.memory_space<vmem>>, vector<1x8x4xbf16>
    %410 = vector.shape_cast %409 : vector<1x8x4xbf16> to vector<8x4xbf16>
    %cst_378 = arith.constant dense<0.000000e+00> : vector<8x8xf32>
    %411 = tpu.matmul %410, %408, %cst_378 {dimension_numbers = #tpu.dot_dimension_numbers<[1], [0], [0], [1], [0, 0, 1, 1], [], []>} : vector<8x4xbf16>, vector<4x8xbf16>, vector<8x8xf32> -> vector<8x8xf32>
    %412 = arith.addf %403, %411 : vector<8x8xf32>
    %c18_i32_379 = arith.constant 18 : i32
    %413 = arith.addi %c18_i32_379, %366 : i32
    %c0_i32_380 = arith.constant 0 : i32
    %414 = arith.addi %413, %c0_i32_380 : i32
    %c0_381 = arith.constant 0 : index
    %415 = arith.index_cast %414 : i32 to index
    %c0_382 = arith.constant 0 : index
    %c1_383 = arith.constant 1 : index
    %416 = vector.load %arg2[%c0_381, %415, %c0_382, %c1_383] : memref<1x36x4x9xbf16, #tpu.memory_space<vmem>>, vector<1x1x4x8xbf16>
    %417 = vector.shape_cast %416 : vector<1x1x4x8xbf16> to vector<4x8xbf16>
    %c5_384 = arith.constant 5 : index
    %c0_385 = arith.constant 0 : index
    %c0_386 = arith.constant 0 : index
    %418 = vector.load %arg3[%c5_384, %c0_385, %c0_386] : memref<9x8x4xbf16, #tpu.memory_space<vmem>>, vector<1x8x4xbf16>
    %419 = vector.shape_cast %418 : vector<1x8x4xbf16> to vector<8x4xbf16>
    %cst_387 = arith.constant dense<0.000000e+00> : vector<8x8xf32>
    %420 = tpu.matmul %419, %417, %cst_387 {dimension_numbers = #tpu.dot_dimension_numbers<[1], [0], [0], [1], [0, 0, 1, 1], [], []>} : vector<8x4xbf16>, vector<4x8xbf16>, vector<8x8xf32> -> vector<8x8xf32>
    %421 = arith.addf %412, %420 : vector<8x8xf32>
    %c0_i32_388 = arith.constant 0 : i32
    %422 = arith.addi %c0_i32_388, %366 : i32
    %c1_i32_389 = arith.constant 1 : i32
    %423 = arith.addi %422, %c1_i32_389 : i32
    %c0_390 = arith.constant 0 : index
    %424 = arith.index_cast %423 : i32 to index
    %c0_391 = arith.constant 0 : index
    %c0_392 = arith.constant 0 : index
    %425 = vector.load %arg2[%c0_390, %424, %c0_391, %c0_392] : memref<1x36x4x9xbf16, #tpu.memory_space<vmem>>, vector<1x1x4x8xbf16>
    %426 = vector.shape_cast %425 : vector<1x1x4x8xbf16> to vector<4x8xbf16>
    %c6_393 = arith.constant 6 : index
    %c0_394 = arith.constant 0 : index
    %c0_395 = arith.constant 0 : index
    %427 = vector.load %arg3[%c6_393, %c0_394, %c0_395] : memref<9x8x4xbf16, #tpu.memory_space<vmem>>, vector<1x8x4xbf16>
    %428 = vector.shape_cast %427 : vector<1x8x4xbf16> to vector<8x4xbf16>
    %cst_396 = arith.constant dense<0.000000e+00> : vector<8x8xf32>
    %429 = tpu.matmul %428, %426, %cst_396 {dimension_numbers = #tpu.dot_dimension_numbers<[1], [0], [0], [1], [0, 0, 1, 1], [], []>} : vector<8x4xbf16>, vector<4x8xbf16>, vector<8x8xf32> -> vector<8x8xf32>
    %430 = arith.addf %421, %429 : vector<8x8xf32>
    %c9_i32_397 = arith.constant 9 : i32
    %431 = arith.addi %c9_i32_397, %366 : i32
    %c1_i32_398 = arith.constant 1 : i32
    %432 = arith.addi %431, %c1_i32_398 : i32
    %c0_399 = arith.constant 0 : index
    %433 = arith.index_cast %432 : i32 to index
    %c0_400 = arith.constant 0 : index
    %c0_401 = arith.constant 0 : index
    %434 = vector.load %arg2[%c0_399, %433, %c0_400, %c0_401] : memref<1x36x4x9xbf16, #tpu.memory_space<vmem>>, vector<1x1x4x8xbf16>
    %435 = vector.shape_cast %434 : vector<1x1x4x8xbf16> to vector<4x8xbf16>
    %c7_402 = arith.constant 7 : index
    %c0_403 = arith.constant 0 : index
    %c0_404 = arith.constant 0 : index
    %436 = vector.load %arg3[%c7_402, %c0_403, %c0_404] : memref<9x8x4xbf16, #tpu.memory_space<vmem>>, vector<1x8x4xbf16>
    %437 = vector.shape_cast %436 : vector<1x8x4xbf16> to vector<8x4xbf16>
    %cst_405 = arith.constant dense<0.000000e+00> : vector<8x8xf32>
    %438 = tpu.matmul %437, %435, %cst_405 {dimension_numbers = #tpu.dot_dimension_numbers<[1], [0], [0], [1], [0, 0, 1, 1], [], []>} : vector<8x4xbf16>, vector<4x8xbf16>, vector<8x8xf32> -> vector<8x8xf32>
    %439 = arith.addf %430, %438 : vector<8x8xf32>
    %c0_i32_406 = arith.constant 0 : i32
    %440 = arith.addi %c0_i32_406, %366 : i32
    %c1_i32_407 = arith.constant 1 : i32
    %441 = arith.addi %440, %c1_i32_407 : i32
    %c0_408 = arith.constant 0 : index
    %442 = arith.index_cast %441 : i32 to index
    %c0_409 = arith.constant 0 : index
    %c1_410 = arith.constant 1 : index
    %443 = vector.load %arg2[%c0_408, %442, %c0_409, %c1_410] : memref<1x36x4x9xbf16, #tpu.memory_space<vmem>>, vector<1x1x4x8xbf16>
    %444 = vector.shape_cast %443 : vector<1x1x4x8xbf16> to vector<4x8xbf16>
    %c8_411 = arith.constant 8 : index
    %c0_412 = arith.constant 0 : index
    %c0_413 = arith.constant 0 : index
    %445 = vector.load %arg3[%c8_411, %c0_412, %c0_413] : memref<9x8x4xbf16, #tpu.memory_space<vmem>>, vector<1x8x4xbf16>
    %446 = vector.shape_cast %445 : vector<1x8x4xbf16> to vector<8x4xbf16>
    %cst_414 = arith.constant dense<0.000000e+00> : vector<8x8xf32>
    %447 = tpu.matmul %446, %444, %cst_414 {dimension_numbers = #tpu.dot_dimension_numbers<[1], [0], [0], [1], [0, 0, 1, 1], [], []>} : vector<8x4xbf16>, vector<4x8xbf16>, vector<8x8xf32> -> vector<8x8xf32>
    %448 = arith.addf %439, %447 : vector<8x8xf32>
    %449 = vector.broadcast %1 : vector<8x1xf32> to vector<8x8xf32>
    %450 = arith.addf %448, %449 : vector<8x8xf32>
    %cst_415 = arith.constant 0.000000e+00 : f32
    %451 = vector.broadcast %cst_415 : f32 to vector<8x8xf32>
    %452 = arith.maximumf %450, %451 : vector<8x8xf32>
    %c0_416 = arith.constant 0 : index
    %453 = arith.index_cast %c4_i32 : i32 to index
    %c0_417 = arith.constant 0 : index
    %c0_418 = arith.constant 0 : index
    %454 = vector.load %arg5[%c0_416, %453, %c0_417, %c0_418] : memref<1x8x8x8xf32, #tpu.memory_space<vmem>>, vector<1x1x8x8xf32>
    %455 = vector.shape_cast %454 : vector<1x1x8x8xf32> to vector<8x8xf32>
    %456 = vector.shape_cast %452 : vector<8x8xf32> to vector<1x1x8x8xf32>
    tpu.vector_store %arg5[%c0_416, %453, %c0_417, %c0_418], %456 {strides = array<i32>} : memref<1x8x8x8xf32, #tpu.memory_space<vmem>>, vector<1x1x8x8xf32>,
    %c5_i32 = arith.constant 5 : i32
    %457 = arith.addi %0, %c5_i32 : i32
    %cst_419 = arith.constant 0.000000e+00 : f32
    %458 = vector.broadcast %cst_419 : f32 to vector<8x8xf32>
    %c0_i32_420 = arith.constant 0 : i32
    %459 = arith.addi %c0_i32_420, %457 : i32
    %c0_i32_421 = arith.constant 0 : i32
    %460 = arith.addi %459, %c0_i32_421 : i32
    %c0_422 = arith.constant 0 : index
    %461 = arith.index_cast %460 : i32 to index
    %c0_423 = arith.constant 0 : index
    %c0_424 = arith.constant 0 : index
    %462 = vector.load %arg2[%c0_422, %461, %c0_423, %c0_424] : memref<1x36x4x9xbf16, #tpu.memory_space<vmem>>, vector<1x1x4x8xbf16>
    %463 = vector.shape_cast %462 : vector<1x1x4x8xbf16> to vector<4x8xbf16>
    %c0_425 = arith.constant 0 : index
    %c0_426 = arith.constant 0 : index
    %c0_427 = arith.constant 0 : index
    %464 = vector.load %arg3[%c0_425, %c0_426, %c0_427] : memref<9x8x4xbf16, #tpu.memory_space<vmem>>, vector<1x8x4xbf16>
    %465 = vector.shape_cast %464 : vector<1x8x4xbf16> to vector<8x4xbf16>
    %cst_428 = arith.constant dense<0.000000e+00> : vector<8x8xf32>
    %466 = tpu.matmul %465, %463, %cst_428 {dimension_numbers = #tpu.dot_dimension_numbers<[1], [0], [0], [1], [0, 0, 1, 1], [], []>} : vector<8x4xbf16>, vector<4x8xbf16>, vector<8x8xf32> -> vector<8x8xf32>
    %467 = arith.addf %458, %466 : vector<8x8xf32>
    %c9_i32_429 = arith.constant 9 : i32
    %468 = arith.addi %c9_i32_429, %457 : i32
    %c0_i32_430 = arith.constant 0 : i32
    %469 = arith.addi %468, %c0_i32_430 : i32
    %c0_431 = arith.constant 0 : index
    %470 = arith.index_cast %469 : i32 to index
    %c0_432 = arith.constant 0 : index
    %c0_433 = arith.constant 0 : index
    %471 = vector.load %arg2[%c0_431, %470, %c0_432, %c0_433] : memref<1x36x4x9xbf16, #tpu.memory_space<vmem>>, vector<1x1x4x8xbf16>
    %472 = vector.shape_cast %471 : vector<1x1x4x8xbf16> to vector<4x8xbf16>
    %c1_434 = arith.constant 1 : index
    %c0_435 = arith.constant 0 : index
    %c0_436 = arith.constant 0 : index
    %473 = vector.load %arg3[%c1_434, %c0_435, %c0_436] : memref<9x8x4xbf16, #tpu.memory_space<vmem>>, vector<1x8x4xbf16>
    %474 = vector.shape_cast %473 : vector<1x8x4xbf16> to vector<8x4xbf16>
    %cst_437 = arith.constant dense<0.000000e+00> : vector<8x8xf32>
    %475 = tpu.matmul %474, %472, %cst_437 {dimension_numbers = #tpu.dot_dimension_numbers<[1], [0], [0], [1], [0, 0, 1, 1], [], []>} : vector<8x4xbf16>, vector<4x8xbf16>, vector<8x8xf32> -> vector<8x8xf32>
    %476 = arith.addf %467, %475 : vector<8x8xf32>
    %c0_i32_438 = arith.constant 0 : i32
    %477 = arith.addi %c0_i32_438, %457 : i32
    %c0_i32_439 = arith.constant 0 : i32
    %478 = arith.addi %477, %c0_i32_439 : i32
    %c0_440 = arith.constant 0 : index
    %479 = arith.index_cast %478 : i32 to index
    %c0_441 = arith.constant 0 : index
    %c1_442 = arith.constant 1 : index
    %480 = vector.load %arg2[%c0_440, %479, %c0_441, %c1_442] : memref<1x36x4x9xbf16, #tpu.memory_space<vmem>>, vector<1x1x4x8xbf16>
    %481 = vector.shape_cast %480 : vector<1x1x4x8xbf16> to vector<4x8xbf16>
    %c2_443 = arith.constant 2 : index
    %c0_444 = arith.constant 0 : index
    %c0_445 = arith.constant 0 : index
    %482 = vector.load %arg3[%c2_443, %c0_444, %c0_445] : memref<9x8x4xbf16, #tpu.memory_space<vmem>>, vector<1x8x4xbf16>
    %483 = vector.shape_cast %482 : vector<1x8x4xbf16> to vector<8x4xbf16>
    %cst_446 = arith.constant dense<0.000000e+00> : vector<8x8xf32>
    %484 = tpu.matmul %483, %481, %cst_446 {dimension_numbers = #tpu.dot_dimension_numbers<[1], [0], [0], [1], [0, 0, 1, 1], [], []>} : vector<8x4xbf16>, vector<4x8xbf16>, vector<8x8xf32> -> vector<8x8xf32>
    %485 = arith.addf %476, %484 : vector<8x8xf32>
    %c18_i32_447 = arith.constant 18 : i32
    %486 = arith.addi %c18_i32_447, %457 : i32
    %c0_i32_448 = arith.constant 0 : i32
    %487 = arith.addi %486, %c0_i32_448 : i32
    %c0_449 = arith.constant 0 : index
    %488 = arith.index_cast %487 : i32 to index
    %c0_450 = arith.constant 0 : index
    %c0_451 = arith.constant 0 : index
    %489 = vector.load %arg2[%c0_449, %488, %c0_450, %c0_451] : memref<1x36x4x9xbf16, #tpu.memory_space<vmem>>, vector<1x1x4x8xbf16>
    %490 = vector.shape_cast %489 : vector<1x1x4x8xbf16> to vector<4x8xbf16>
    %c3_452 = arith.constant 3 : index
    %c0_453 = arith.constant 0 : index
    %c0_454 = arith.constant 0 : index
    %491 = vector.load %arg3[%c3_452, %c0_453, %c0_454] : memref<9x8x4xbf16, #tpu.memory_space<vmem>>, vector<1x8x4xbf16>
    %492 = vector.shape_cast %491 : vector<1x8x4xbf16> to vector<8x4xbf16>
    %cst_455 = arith.constant dense<0.000000e+00> : vector<8x8xf32>
    %493 = tpu.matmul %492, %490, %cst_455 {dimension_numbers = #tpu.dot_dimension_numbers<[1], [0], [0], [1], [0, 0, 1, 1], [], []>} : vector<8x4xbf16>, vector<4x8xbf16>, vector<8x8xf32> -> vector<8x8xf32>
    %494 = arith.addf %485, %493 : vector<8x8xf32>
    %c27_i32_456 = arith.constant 27 : i32
    %495 = arith.addi %c27_i32_456, %457 : i32
    %c0_i32_457 = arith.constant 0 : i32
    %496 = arith.addi %495, %c0_i32_457 : i32
    %c0_458 = arith.constant 0 : index
    %497 = arith.index_cast %496 : i32 to index
    %c0_459 = arith.constant 0 : index
    %c0_460 = arith.constant 0 : index
    %498 = vector.load %arg2[%c0_458, %497, %c0_459, %c0_460] : memref<1x36x4x9xbf16, #tpu.memory_space<vmem>>, vector<1x1x4x8xbf16>
    %499 = vector.shape_cast %498 : vector<1x1x4x8xbf16> to vector<4x8xbf16>
    %c4_461 = arith.constant 4 : index
    %c0_462 = arith.constant 0 : index
    %c0_463 = arith.constant 0 : index
    %500 = vector.load %arg3[%c4_461, %c0_462, %c0_463] : memref<9x8x4xbf16, #tpu.memory_space<vmem>>, vector<1x8x4xbf16>
    %501 = vector.shape_cast %500 : vector<1x8x4xbf16> to vector<8x4xbf16>
    %cst_464 = arith.constant dense<0.000000e+00> : vector<8x8xf32>
    %502 = tpu.matmul %501, %499, %cst_464 {dimension_numbers = #tpu.dot_dimension_numbers<[1], [0], [0], [1], [0, 0, 1, 1], [], []>} : vector<8x4xbf16>, vector<4x8xbf16>, vector<8x8xf32> -> vector<8x8xf32>
    %503 = arith.addf %494, %502 : vector<8x8xf32>
    %c18_i32_465 = arith.constant 18 : i32
    %504 = arith.addi %c18_i32_465, %457 : i32
    %c0_i32_466 = arith.constant 0 : i32
    %505 = arith.addi %504, %c0_i32_466 : i32
    %c0_467 = arith.constant 0 : index
    %506 = arith.index_cast %505 : i32 to index
    %c0_468 = arith.constant 0 : index
    %c1_469 = arith.constant 1 : index
    %507 = vector.load %arg2[%c0_467, %506, %c0_468, %c1_469] : memref<1x36x4x9xbf16, #tpu.memory_space<vmem>>, vector<1x1x4x8xbf16>
    %508 = vector.shape_cast %507 : vector<1x1x4x8xbf16> to vector<4x8xbf16>
    %c5_470 = arith.constant 5 : index
    %c0_471 = arith.constant 0 : index
    %c0_472 = arith.constant 0 : index
    %509 = vector.load %arg3[%c5_470, %c0_471, %c0_472] : memref<9x8x4xbf16, #tpu.memory_space<vmem>>, vector<1x8x4xbf16>
    %510 = vector.shape_cast %509 : vector<1x8x4xbf16> to vector<8x4xbf16>
    %cst_473 = arith.constant dense<0.000000e+00> : vector<8x8xf32>
    %511 = tpu.matmul %510, %508, %cst_473 {dimension_numbers = #tpu.dot_dimension_numbers<[1], [0], [0], [1], [0, 0, 1, 1], [], []>} : vector<8x4xbf16>, vector<4x8xbf16>, vector<8x8xf32> -> vector<8x8xf32>
    %512 = arith.addf %503, %511 : vector<8x8xf32>
    %c0_i32_474 = arith.constant 0 : i32
    %513 = arith.addi %c0_i32_474, %457 : i32
    %c1_i32_475 = arith.constant 1 : i32
    %514 = arith.addi %513, %c1_i32_475 : i32
    %c0_476 = arith.constant 0 : index
    %515 = arith.index_cast %514 : i32 to index
    %c0_477 = arith.constant 0 : index
    %c0_478 = arith.constant 0 : index
    %516 = vector.load %arg2[%c0_476, %515, %c0_477, %c0_478] : memref<1x36x4x9xbf16, #tpu.memory_space<vmem>>, vector<1x1x4x8xbf16>
    %517 = vector.shape_cast %516 : vector<1x1x4x8xbf16> to vector<4x8xbf16>
    %c6_479 = arith.constant 6 : index
    %c0_480 = arith.constant 0 : index
    %c0_481 = arith.constant 0 : index
    %518 = vector.load %arg3[%c6_479, %c0_480, %c0_481] : memref<9x8x4xbf16, #tpu.memory_space<vmem>>, vector<1x8x4xbf16>
    %519 = vector.shape_cast %518 : vector<1x8x4xbf16> to vector<8x4xbf16>
    %cst_482 = arith.constant dense<0.000000e+00> : vector<8x8xf32>
    %520 = tpu.matmul %519, %517, %cst_482 {dimension_numbers = #tpu.dot_dimension_numbers<[1], [0], [0], [1], [0, 0, 1, 1], [], []>} : vector<8x4xbf16>, vector<4x8xbf16>, vector<8x8xf32> -> vector<8x8xf32>
    %521 = arith.addf %512, %520 : vector<8x8xf32>
    %c9_i32_483 = arith.constant 9 : i32
    %522 = arith.addi %c9_i32_483, %457 : i32
    %c1_i32_484 = arith.constant 1 : i32
    %523 = arith.addi %522, %c1_i32_484 : i32
    %c0_485 = arith.constant 0 : index
    %524 = arith.index_cast %523 : i32 to index
    %c0_486 = arith.constant 0 : index
    %c0_487 = arith.constant 0 : index
    %525 = vector.load %arg2[%c0_485, %524, %c0_486, %c0_487] : memref<1x36x4x9xbf16, #tpu.memory_space<vmem>>, vector<1x1x4x8xbf16>
    %526 = vector.shape_cast %525 : vector<1x1x4x8xbf16> to vector<4x8xbf16>
    %c7_488 = arith.constant 7 : index
    %c0_489 = arith.constant 0 : index
    %c0_490 = arith.constant 0 : index
    %527 = vector.load %arg3[%c7_488, %c0_489, %c0_490] : memref<9x8x4xbf16, #tpu.memory_space<vmem>>, vector<1x8x4xbf16>
    %528 = vector.shape_cast %527 : vector<1x8x4xbf16> to vector<8x4xbf16>
    %cst_491 = arith.constant dense<0.000000e+00> : vector<8x8xf32>
    %529 = tpu.matmul %528, %526, %cst_491 {dimension_numbers = #tpu.dot_dimension_numbers<[1], [0], [0], [1], [0, 0, 1, 1], [], []>} : vector<8x4xbf16>, vector<4x8xbf16>, vector<8x8xf32> -> vector<8x8xf32>
    %530 = arith.addf %521, %529 : vector<8x8xf32>
    %c0_i32_492 = arith.constant 0 : i32
    %531 = arith.addi %c0_i32_492, %457 : i32
    %c1_i32_493 = arith.constant 1 : i32
    %532 = arith.addi %531, %c1_i32_493 : i32
    %c0_494 = arith.constant 0 : index
    %533 = arith.index_cast %532 : i32 to index
    %c0_495 = arith.constant 0 : index
    %c1_496 = arith.constant 1 : index
    %534 = vector.load %arg2[%c0_494, %533, %c0_495, %c1_496] : memref<1x36x4x9xbf16, #tpu.memory_space<vmem>>, vector<1x1x4x8xbf16>
    %535 = vector.shape_cast %534 : vector<1x1x4x8xbf16> to vector<4x8xbf16>
    %c8_497 = arith.constant 8 : index
    %c0_498 = arith.constant 0 : index
    %c0_499 = arith.constant 0 : index
    %536 = vector.load %arg3[%c8_497, %c0_498, %c0_499] : memref<9x8x4xbf16, #tpu.memory_space<vmem>>, vector<1x8x4xbf16>
    %537 = vector.shape_cast %536 : vector<1x8x4xbf16> to vector<8x4xbf16>
    %cst_500 = arith.constant dense<0.000000e+00> : vector<8x8xf32>
    %538 = tpu.matmul %537, %535, %cst_500 {dimension_numbers = #tpu.dot_dimension_numbers<[1], [0], [0], [1], [0, 0, 1, 1], [], []>} : vector<8x4xbf16>, vector<4x8xbf16>, vector<8x8xf32> -> vector<8x8xf32>
    %539 = arith.addf %530, %538 : vector<8x8xf32>
    %540 = vector.broadcast %1 : vector<8x1xf32> to vector<8x8xf32>
    %541 = arith.addf %539, %540 : vector<8x8xf32>
    %cst_501 = arith.constant 0.000000e+00 : f32
    %542 = vector.broadcast %cst_501 : f32 to vector<8x8xf32>
    %543 = arith.maximumf %541, %542 : vector<8x8xf32>
    %c0_502 = arith.constant 0 : index
    %544 = arith.index_cast %c5_i32 : i32 to index
    %c0_503 = arith.constant 0 : index
    %c0_504 = arith.constant 0 : index
    %545 = vector.load %arg5[%c0_502, %544, %c0_503, %c0_504] : memref<1x8x8x8xf32, #tpu.memory_space<vmem>>, vector<1x1x8x8xf32>
    %546 = vector.shape_cast %545 : vector<1x1x8x8xf32> to vector<8x8xf32>
    %547 = vector.shape_cast %543 : vector<8x8xf32> to vector<1x1x8x8xf32>
    tpu.vector_store %arg5[%c0_502, %544, %c0_503, %c0_504], %547 {strides = array<i32>} : memref<1x8x8x8xf32, #tpu.memory_space<vmem>>, vector<1x1x8x8xf32>,
    %c6_i32 = arith.constant 6 : i32
    %548 = arith.addi %0, %c6_i32 : i32
    %cst_505 = arith.constant 0.000000e+00 : f32
    %549 = vector.broadcast %cst_505 : f32 to vector<8x8xf32>
    %c0_i32_506 = arith.constant 0 : i32
    %550 = arith.addi %c0_i32_506, %548 : i32
    %c0_i32_507 = arith.constant 0 : i32
    %551 = arith.addi %550, %c0_i32_507 : i32
    %c0_508 = arith.constant 0 : index
    %552 = arith.index_cast %551 : i32 to index
    %c0_509 = arith.constant 0 : index
    %c0_510 = arith.constant 0 : index
    %553 = vector.load %arg2[%c0_508, %552, %c0_509, %c0_510] : memref<1x36x4x9xbf16, #tpu.memory_space<vmem>>, vector<1x1x4x8xbf16>
    %554 = vector.shape_cast %553 : vector<1x1x4x8xbf16> to vector<4x8xbf16>
    %c0_511 = arith.constant 0 : index
    %c0_512 = arith.constant 0 : index
    %c0_513 = arith.constant 0 : index
    %555 = vector.load %arg3[%c0_511, %c0_512, %c0_513] : memref<9x8x4xbf16, #tpu.memory_space<vmem>>, vector<1x8x4xbf16>
    %556 = vector.shape_cast %555 : vector<1x8x4xbf16> to vector<8x4xbf16>
    %cst_514 = arith.constant dense<0.000000e+00> : vector<8x8xf32>
    %557 = tpu.matmul %556, %554, %cst_514 {dimension_numbers = #tpu.dot_dimension_numbers<[1], [0], [0], [1], [0, 0, 1, 1], [], []>} : vector<8x4xbf16>, vector<4x8xbf16>, vector<8x8xf32> -> vector<8x8xf32>
    %558 = arith.addf %549, %557 : vector<8x8xf32>
    %c9_i32_515 = arith.constant 9 : i32
    %559 = arith.addi %c9_i32_515, %548 : i32
    %c0_i32_516 = arith.constant 0 : i32
    %560 = arith.addi %559, %c0_i32_516 : i32
    %c0_517 = arith.constant 0 : index
    %561 = arith.index_cast %560 : i32 to index
    %c0_518 = arith.constant 0 : index
    %c0_519 = arith.constant 0 : index
    %562 = vector.load %arg2[%c0_517, %561, %c0_518, %c0_519] : memref<1x36x4x9xbf16, #tpu.memory_space<vmem>>, vector<1x1x4x8xbf16>
    %563 = vector.shape_cast %562 : vector<1x1x4x8xbf16> to vector<4x8xbf16>
    %c1_520 = arith.constant 1 : index
    %c0_521 = arith.constant 0 : index
    %c0_522 = arith.constant 0 : index
    %564 = vector.load %arg3[%c1_520, %c0_521, %c0_522] : memref<9x8x4xbf16, #tpu.memory_space<vmem>>, vector<1x8x4xbf16>
    %565 = vector.shape_cast %564 : vector<1x8x4xbf16> to vector<8x4xbf16>
    %cst_523 = arith.constant dense<0.000000e+00> : vector<8x8xf32>
    %566 = tpu.matmul %565, %563, %cst_523 {dimension_numbers = #tpu.dot_dimension_numbers<[1], [0], [0], [1], [0, 0, 1, 1], [], []>} : vector<8x4xbf16>, vector<4x8xbf16>, vector<8x8xf32> -> vector<8x8xf32>
    %567 = arith.addf %558, %566 : vector<8x8xf32>
    %c0_i32_524 = arith.constant 0 : i32
    %568 = arith.addi %c0_i32_524, %548 : i32
    %c0_i32_525 = arith.constant 0 : i32
    %569 = arith.addi %568, %c0_i32_525 : i32
    %c0_526 = arith.constant 0 : index
    %570 = arith.index_cast %569 : i32 to index
    %c0_527 = arith.constant 0 : index
    %c1_528 = arith.constant 1 : index
    %571 = vector.load %arg2[%c0_526, %570, %c0_527, %c1_528] : memref<1x36x4x9xbf16, #tpu.memory_space<vmem>>, vector<1x1x4x8xbf16>
    %572 = vector.shape_cast %571 : vector<1x1x4x8xbf16> to vector<4x8xbf16>
    %c2_529 = arith.constant 2 : index
    %c0_530 = arith.constant 0 : index
    %c0_531 = arith.constant 0 : index
    %573 = vector.load %arg3[%c2_529, %c0_530, %c0_531] : memref<9x8x4xbf16, #tpu.memory_space<vmem>>, vector<1x8x4xbf16>
    %574 = vector.shape_cast %573 : vector<1x8x4xbf16> to vector<8x4xbf16>
    %cst_532 = arith.constant dense<0.000000e+00> : vector<8x8xf32>
    %575 = tpu.matmul %574, %572, %cst_532 {dimension_numbers = #tpu.dot_dimension_numbers<[1], [0], [0], [1], [0, 0, 1, 1], [], []>} : vector<8x4xbf16>, vector<4x8xbf16>, vector<8x8xf32> -> vector<8x8xf32>
    %576 = arith.addf %567, %575 : vector<8x8xf32>
    %c18_i32_533 = arith.constant 18 : i32
    %577 = arith.addi %c18_i32_533, %548 : i32
    %c0_i32_534 = arith.constant 0 : i32
    %578 = arith.addi %577, %c0_i32_534 : i32
    %c0_535 = arith.constant 0 : index
    %579 = arith.index_cast %578 : i32 to index
    %c0_536 = arith.constant 0 : index
    %c0_537 = arith.constant 0 : index
    %580 = vector.load %arg2[%c0_535, %579, %c0_536, %c0_537] : memref<1x36x4x9xbf16, #tpu.memory_space<vmem>>, vector<1x1x4x8xbf16>
    %581 = vector.shape_cast %580 : vector<1x1x4x8xbf16> to vector<4x8xbf16>
    %c3_538 = arith.constant 3 : index
    %c0_539 = arith.constant 0 : index
    %c0_540 = arith.constant 0 : index
    %582 = vector.load %arg3[%c3_538, %c0_539, %c0_540] : memref<9x8x4xbf16, #tpu.memory_space<vmem>>, vector<1x8x4xbf16>
    %583 = vector.shape_cast %582 : vector<1x8x4xbf16> to vector<8x4xbf16>
    %cst_541 = arith.constant dense<0.000000e+00> : vector<8x8xf32>
    %584 = tpu.matmul %583, %581, %cst_541 {dimension_numbers = #tpu.dot_dimension_numbers<[1], [0], [0], [1], [0, 0, 1, 1], [], []>} : vector<8x4xbf16>, vector<4x8xbf16>, vector<8x8xf32> -> vector<8x8xf32>
    %585 = arith.addf %576, %584 : vector<8x8xf32>
    %c27_i32_542 = arith.constant 27 : i32
    %586 = arith.addi %c27_i32_542, %548 : i32
    %c0_i32_543 = arith.constant 0 : i32
    %587 = arith.addi %586, %c0_i32_543 : i32
    %c0_544 = arith.constant 0 : index
    %588 = arith.index_cast %587 : i32 to index
    %c0_545 = arith.constant 0 : index
    %c0_546 = arith.constant 0 : index
    %589 = vector.load %arg2[%c0_544, %588, %c0_545, %c0_546] : memref<1x36x4x9xbf16, #tpu.memory_space<vmem>>, vector<1x1x4x8xbf16>
    %590 = vector.shape_cast %589 : vector<1x1x4x8xbf16> to vector<4x8xbf16>
    %c4_547 = arith.constant 4 : index
    %c0_548 = arith.constant 0 : index
    %c0_549 = arith.constant 0 : index
    %591 = vector.load %arg3[%c4_547, %c0_548, %c0_549] : memref<9x8x4xbf16, #tpu.memory_space<vmem>>, vector<1x8x4xbf16>
    %592 = vector.shape_cast %591 : vector<1x8x4xbf16> to vector<8x4xbf16>
    %cst_550 = arith.constant dense<0.000000e+00> : vector<8x8xf32>
    %593 = tpu.matmul %592, %590, %cst_550 {dimension_numbers = #tpu.dot_dimension_numbers<[1], [0], [0], [1], [0, 0, 1, 1], [], []>} : vector<8x4xbf16>, vector<4x8xbf16>, vector<8x8xf32> -> vector<8x8xf32>
    %594 = arith.addf %585, %593 : vector<8x8xf32>
    %c18_i32_551 = arith.constant 18 : i32
    %595 = arith.addi %c18_i32_551, %548 : i32
    %c0_i32_552 = arith.constant 0 : i32
    %596 = arith.addi %595, %c0_i32_552 : i32
    %c0_553 = arith.constant 0 : index
    %597 = arith.index_cast %596 : i32 to index
    %c0_554 = arith.constant 0 : index
    %c1_555 = arith.constant 1 : index
    %598 = vector.load %arg2[%c0_553, %597, %c0_554, %c1_555] : memref<1x36x4x9xbf16, #tpu.memory_space<vmem>>, vector<1x1x4x8xbf16>
    %599 = vector.shape_cast %598 : vector<1x1x4x8xbf16> to vector<4x8xbf16>
    %c5_556 = arith.constant 5 : index
    %c0_557 = arith.constant 0 : index
    %c0_558 = arith.constant 0 : index
    %600 = vector.load %arg3[%c5_556, %c0_557, %c0_558] : memref<9x8x4xbf16, #tpu.memory_space<vmem>>, vector<1x8x4xbf16>
    %601 = vector.shape_cast %600 : vector<1x8x4xbf16> to vector<8x4xbf16>
    %cst_559 = arith.constant dense<0.000000e+00> : vector<8x8xf32>
    %602 = tpu.matmul %601, %599, %cst_559 {dimension_numbers = #tpu.dot_dimension_numbers<[1], [0], [0], [1], [0, 0, 1, 1], [], []>} : vector<8x4xbf16>, vector<4x8xbf16>, vector<8x8xf32> -> vector<8x8xf32>
    %603 = arith.addf %594, %602 : vector<8x8xf32>
    %c0_i32_560 = arith.constant 0 : i32
    %604 = arith.addi %c0_i32_560, %548 : i32
    %c1_i32_561 = arith.constant 1 : i32
    %605 = arith.addi %604, %c1_i32_561 : i32
    %c0_562 = arith.constant 0 : index
    %606 = arith.index_cast %605 : i32 to index
    %c0_563 = arith.constant 0 : index
    %c0_564 = arith.constant 0 : index
    %607 = vector.load %arg2[%c0_562, %606, %c0_563, %c0_564] : memref<1x36x4x9xbf16, #tpu.memory_space<vmem>>, vector<1x1x4x8xbf16>
    %608 = vector.shape_cast %607 : vector<1x1x4x8xbf16> to vector<4x8xbf16>
    %c6_565 = arith.constant 6 : index
    %c0_566 = arith.constant 0 : index
    %c0_567 = arith.constant 0 : index
    %609 = vector.load %arg3[%c6_565, %c0_566, %c0_567] : memref<9x8x4xbf16, #tpu.memory_space<vmem>>, vector<1x8x4xbf16>
    %610 = vector.shape_cast %609 : vector<1x8x4xbf16> to vector<8x4xbf16>
    %cst_568 = arith.constant dense<0.000000e+00> : vector<8x8xf32>
    %611 = tpu.matmul %610, %608, %cst_568 {dimension_numbers = #tpu.dot_dimension_numbers<[1], [0], [0], [1], [0, 0, 1, 1], [], []>} : vector<8x4xbf16>, vector<4x8xbf16>, vector<8x8xf32> -> vector<8x8xf32>
    %612 = arith.addf %603, %611 : vector<8x8xf32>
    %c9_i32_569 = arith.constant 9 : i32
    %613 = arith.addi %c9_i32_569, %548 : i32
    %c1_i32_570 = arith.constant 1 : i32
    %614 = arith.addi %613, %c1_i32_570 : i32
    %c0_571 = arith.constant 0 : index
    %615 = arith.index_cast %614 : i32 to index
    %c0_572 = arith.constant 0 : index
    %c0_573 = arith.constant 0 : index
    %616 = vector.load %arg2[%c0_571, %615, %c0_572, %c0_573] : memref<1x36x4x9xbf16, #tpu.memory_space<vmem>>, vector<1x1x4x8xbf16>
    %617 = vector.shape_cast %616 : vector<1x1x4x8xbf16> to vector<4x8xbf16>
    %c7_574 = arith.constant 7 : index
    %c0_575 = arith.constant 0 : index
    %c0_576 = arith.constant 0 : index
    %618 = vector.load %arg3[%c7_574, %c0_575, %c0_576] : memref<9x8x4xbf16, #tpu.memory_space<vmem>>, vector<1x8x4xbf16>
    %619 = vector.shape_cast %618 : vector<1x8x4xbf16> to vector<8x4xbf16>
    %cst_577 = arith.constant dense<0.000000e+00> : vector<8x8xf32>
    %620 = tpu.matmul %619, %617, %cst_577 {dimension_numbers = #tpu.dot_dimension_numbers<[1], [0], [0], [1], [0, 0, 1, 1], [], []>} : vector<8x4xbf16>, vector<4x8xbf16>, vector<8x8xf32> -> vector<8x8xf32>
    %621 = arith.addf %612, %620 : vector<8x8xf32>
    %c0_i32_578 = arith.constant 0 : i32
    %622 = arith.addi %c0_i32_578, %548 : i32
    %c1_i32_579 = arith.constant 1 : i32
    %623 = arith.addi %622, %c1_i32_579 : i32
    %c0_580 = arith.constant 0 : index
    %624 = arith.index_cast %623 : i32 to index
    %c0_581 = arith.constant 0 : index
    %c1_582 = arith.constant 1 : index
    %625 = vector.load %arg2[%c0_580, %624, %c0_581, %c1_582] : memref<1x36x4x9xbf16, #tpu.memory_space<vmem>>, vector<1x1x4x8xbf16>
    %626 = vector.shape_cast %625 : vector<1x1x4x8xbf16> to vector<4x8xbf16>
    %c8_583 = arith.constant 8 : index
    %c0_584 = arith.constant 0 : index
    %c0_585 = arith.constant 0 : index
    %627 = vector.load %arg3[%c8_583, %c0_584, %c0_585] : memref<9x8x4xbf16, #tpu.memory_space<vmem>>, vector<1x8x4xbf16>
    %628 = vector.shape_cast %627 : vector<1x8x4xbf16> to vector<8x4xbf16>
    %cst_586 = arith.constant dense<0.000000e+00> : vector<8x8xf32>
    %629 = tpu.matmul %628, %626, %cst_586 {dimension_numbers = #tpu.dot_dimension_numbers<[1], [0], [0], [1], [0, 0, 1, 1], [], []>} : vector<8x4xbf16>, vector<4x8xbf16>, vector<8x8xf32> -> vector<8x8xf32>
    %630 = arith.addf %621, %629 : vector<8x8xf32>
    %631 = vector.broadcast %1 : vector<8x1xf32> to vector<8x8xf32>
    %632 = arith.addf %630, %631 : vector<8x8xf32>
    %cst_587 = arith.constant 0.000000e+00 : f32
    %633 = vector.broadcast %cst_587 : f32 to vector<8x8xf32>
    %634 = arith.maximumf %632, %633 : vector<8x8xf32>
    %c0_588 = arith.constant 0 : index
    %635 = arith.index_cast %c6_i32 : i32 to index
    %c0_589 = arith.constant 0 : index
    %c0_590 = arith.constant 0 : index
    %636 = vector.load %arg5[%c0_588, %635, %c0_589, %c0_590] : memref<1x8x8x8xf32, #tpu.memory_space<vmem>>, vector<1x1x8x8xf32>
    %637 = vector.shape_cast %636 : vector<1x1x8x8xf32> to vector<8x8xf32>
    %638 = vector.shape_cast %634 : vector<8x8xf32> to vector<1x1x8x8xf32>
    tpu.vector_store %arg5[%c0_588, %635, %c0_589, %c0_590], %638 {strides = array<i32>} : memref<1x8x8x8xf32, #tpu.memory_space<vmem>>, vector<1x1x8x8xf32>,
    %c7_i32 = arith.constant 7 : i32
    %639 = arith.addi %0, %c7_i32 : i32
    %cst_591 = arith.constant 0.000000e+00 : f32
    %640 = vector.broadcast %cst_591 : f32 to vector<8x8xf32>
    %c0_i32_592 = arith.constant 0 : i32
    %641 = arith.addi %c0_i32_592, %639 : i32
    %c0_i32_593 = arith.constant 0 : i32
    %642 = arith.addi %641, %c0_i32_593 : i32
    %c0_594 = arith.constant 0 : index
    %643 = arith.index_cast %642 : i32 to index
    %c0_595 = arith.constant 0 : index
    %c0_596 = arith.constant 0 : index
    %644 = vector.load %arg2[%c0_594, %643, %c0_595, %c0_596] : memref<1x36x4x9xbf16, #tpu.memory_space<vmem>>, vector<1x1x4x8xbf16>
    %645 = vector.shape_cast %644 : vector<1x1x4x8xbf16> to vector<4x8xbf16>
    %c0_597 = arith.constant 0 : index
    %c0_598 = arith.constant 0 : index
    %c0_599 = arith.constant 0 : index
    %646 = vector.load %arg3[%c0_597, %c0_598, %c0_599] : memref<9x8x4xbf16, #tpu.memory_space<vmem>>, vector<1x8x4xbf16>
    %647 = vector.shape_cast %646 : vector<1x8x4xbf16> to vector<8x4xbf16>
    %cst_600 = arith.constant dense<0.000000e+00> : vector<8x8xf32>
    %648 = tpu.matmul %647, %645, %cst_600 {dimension_numbers = #tpu.dot_dimension_numbers<[1], [0], [0], [1], [0, 0, 1, 1], [], []>} : vector<8x4xbf16>, vector<4x8xbf16>, vector<8x8xf32> -> vector<8x8xf32>
    %649 = arith.addf %640, %648 : vector<8x8xf32>
    %c9_i32_601 = arith.constant 9 : i32
    %650 = arith.addi %c9_i32_601, %639 : i32
    %c0_i32_602 = arith.constant 0 : i32
    %651 = arith.addi %650, %c0_i32_602 : i32
    %c0_603 = arith.constant 0 : index
    %652 = arith.index_cast %651 : i32 to index
    %c0_604 = arith.constant 0 : index
    %c0_605 = arith.constant 0 : index
    %653 = vector.load %arg2[%c0_603, %652, %c0_604, %c0_605] : memref<1x36x4x9xbf16, #tpu.memory_space<vmem>>, vector<1x1x4x8xbf16>
    %654 = vector.shape_cast %653 : vector<1x1x4x8xbf16> to vector<4x8xbf16>
    %c1_606 = arith.constant 1 : index
    %c0_607 = arith.constant 0 : index
    %c0_608 = arith.constant 0 : index
    %655 = vector.load %arg3[%c1_606, %c0_607, %c0_608] : memref<9x8x4xbf16, #tpu.memory_space<vmem>>, vector<1x8x4xbf16>
    %656 = vector.shape_cast %655 : vector<1x8x4xbf16> to vector<8x4xbf16>
    %cst_609 = arith.constant dense<0.000000e+00> : vector<8x8xf32>
    %657 = tpu.matmul %656, %654, %cst_609 {dimension_numbers = #tpu.dot_dimension_numbers<[1], [0], [0], [1], [0, 0, 1, 1], [], []>} : vector<8x4xbf16>, vector<4x8xbf16>, vector<8x8xf32> -> vector<8x8xf32>
    %658 = arith.addf %649, %657 : vector<8x8xf32>
    %c0_i32_610 = arith.constant 0 : i32
    %659 = arith.addi %c0_i32_610, %639 : i32
    %c0_i32_611 = arith.constant 0 : i32
    %660 = arith.addi %659, %c0_i32_611 : i32
    %c0_612 = arith.constant 0 : index
    %661 = arith.index_cast %660 : i32 to index
    %c0_613 = arith.constant 0 : index
    %c1_614 = arith.constant 1 : index
    %662 = vector.load %arg2[%c0_612, %661, %c0_613, %c1_614] : memref<1x36x4x9xbf16, #tpu.memory_space<vmem>>, vector<1x1x4x8xbf16>
    %663 = vector.shape_cast %662 : vector<1x1x4x8xbf16> to vector<4x8xbf16>
    %c2_615 = arith.constant 2 : index
    %c0_616 = arith.constant 0 : index
    %c0_617 = arith.constant 0 : index
    %664 = vector.load %arg3[%c2_615, %c0_616, %c0_617] : memref<9x8x4xbf16, #tpu.memory_space<vmem>>, vector<1x8x4xbf16>
    %665 = vector.shape_cast %664 : vector<1x8x4xbf16> to vector<8x4xbf16>
    %cst_618 = arith.constant dense<0.000000e+00> : vector<8x8xf32>
    %666 = tpu.matmul %665, %663, %cst_618 {dimension_numbers = #tpu.dot_dimension_numbers<[1], [0], [0], [1], [0, 0, 1, 1], [], []>} : vector<8x4xbf16>, vector<4x8xbf16>, vector<8x8xf32> -> vector<8x8xf32>
    %667 = arith.addf %658, %666 : vector<8x8xf32>
    %c18_i32_619 = arith.constant 18 : i32
    %668 = arith.addi %c18_i32_619, %639 : i32
    %c0_i32_620 = arith.constant 0 : i32
    %669 = arith.addi %668, %c0_i32_620 : i32
    %c0_621 = arith.constant 0 : index
    %670 = arith.index_cast %669 : i32 to index
    %c0_622 = arith.constant 0 : index
    %c0_623 = arith.constant 0 : index
    %671 = vector.load %arg2[%c0_621, %670, %c0_622, %c0_623] : memref<1x36x4x9xbf16, #tpu.memory_space<vmem>>, vector<1x1x4x8xbf16>
    %672 = vector.shape_cast %671 : vector<1x1x4x8xbf16> to vector<4x8xbf16>
    %c3_624 = arith.constant 3 : index
    %c0_625 = arith.constant 0 : index
    %c0_626 = arith.constant 0 : index
    %673 = vector.load %arg3[%c3_624, %c0_625, %c0_626] : memref<9x8x4xbf16, #tpu.memory_space<vmem>>, vector<1x8x4xbf16>
    %674 = vector.shape_cast %673 : vector<1x8x4xbf16> to vector<8x4xbf16>
    %cst_627 = arith.constant dense<0.000000e+00> : vector<8x8xf32>
    %675 = tpu.matmul %674, %672, %cst_627 {dimension_numbers = #tpu.dot_dimension_numbers<[1], [0], [0], [1], [0, 0, 1, 1], [], []>} : vector<8x4xbf16>, vector<4x8xbf16>, vector<8x8xf32> -> vector<8x8xf32>
    %676 = arith.addf %667, %675 : vector<8x8xf32>
    %c27_i32_628 = arith.constant 27 : i32
    %677 = arith.addi %c27_i32_628, %639 : i32
    %c0_i32_629 = arith.constant 0 : i32
    %678 = arith.addi %677, %c0_i32_629 : i32
    %c0_630 = arith.constant 0 : index
    %679 = arith.index_cast %678 : i32 to index
    %c0_631 = arith.constant 0 : index
    %c0_632 = arith.constant 0 : index
    %680 = vector.load %arg2[%c0_630, %679, %c0_631, %c0_632] : memref<1x36x4x9xbf16, #tpu.memory_space<vmem>>, vector<1x1x4x8xbf16>
    %681 = vector.shape_cast %680 : vector<1x1x4x8xbf16> to vector<4x8xbf16>
    %c4_633 = arith.constant 4 : index
    %c0_634 = arith.constant 0 : index
    %c0_635 = arith.constant 0 : index
    %682 = vector.load %arg3[%c4_633, %c0_634, %c0_635] : memref<9x8x4xbf16, #tpu.memory_space<vmem>>, vector<1x8x4xbf16>
    %683 = vector.shape_cast %682 : vector<1x8x4xbf16> to vector<8x4xbf16>
    %cst_636 = arith.constant dense<0.000000e+00> : vector<8x8xf32>
    %684 = tpu.matmul %683, %681, %cst_636 {dimension_numbers = #tpu.dot_dimension_numbers<[1], [0], [0], [1], [0, 0, 1, 1], [], []>} : vector<8x4xbf16>, vector<4x8xbf16>, vector<8x8xf32> -> vector<8x8xf32>
    %685 = arith.addf %676, %684 : vector<8x8xf32>
    %c18_i32_637 = arith.constant 18 : i32
    %686 = arith.addi %c18_i32_637, %639 : i32
    %c0_i32_638 = arith.constant 0 : i32
    %687 = arith.addi %686, %c0_i32_638 : i32
    %c0_639 = arith.constant 0 : index
    %688 = arith.index_cast %687 : i32 to index
    %c0_640 = arith.constant 0 : index
    %c1_641 = arith.constant 1 : index
    %689 = vector.load %arg2[%c0_639, %688, %c0_640, %c1_641] : memref<1x36x4x9xbf16, #tpu.memory_space<vmem>>, vector<1x1x4x8xbf16>
    %690 = vector.shape_cast %689 : vector<1x1x4x8xbf16> to vector<4x8xbf16>
    %c5_642 = arith.constant 5 : index
    %c0_643 = arith.constant 0 : index
    %c0_644 = arith.constant 0 : index
    %691 = vector.load %arg3[%c5_642, %c0_643, %c0_644] : memref<9x8x4xbf16, #tpu.memory_space<vmem>>, vector<1x8x4xbf16>
    %692 = vector.shape_cast %691 : vector<1x8x4xbf16> to vector<8x4xbf16>
    %cst_645 = arith.constant dense<0.000000e+00> : vector<8x8xf32>
    %693 = tpu.matmul %692, %690, %cst_645 {dimension_numbers = #tpu.dot_dimension_numbers<[1], [0], [0], [1], [0, 0, 1, 1], [], []>} : vector<8x4xbf16>, vector<4x8xbf16>, vector<8x8xf32> -> vector<8x8xf32>
    %694 = arith.addf %685, %693 : vector<8x8xf32>
    %c0_i32_646 = arith.constant 0 : i32
    %695 = arith.addi %c0_i32_646, %639 : i32
    %c1_i32_647 = arith.constant 1 : i32
    %696 = arith.addi %695, %c1_i32_647 : i32
    %c0_648 = arith.constant 0 : index
    %697 = arith.index_cast %696 : i32 to index
    %c0_649 = arith.constant 0 : index
    %c0_650 = arith.constant 0 : index
    %698 = vector.load %arg2[%c0_648, %697, %c0_649, %c0_650] : memref<1x36x4x9xbf16, #tpu.memory_space<vmem>>, vector<1x1x4x8xbf16>
    %699 = vector.shape_cast %698 : vector<1x1x4x8xbf16> to vector<4x8xbf16>
    %c6_651 = arith.constant 6 : index
    %c0_652 = arith.constant 0 : index
    %c0_653 = arith.constant 0 : index
    %700 = vector.load %arg3[%c6_651, %c0_652, %c0_653] : memref<9x8x4xbf16, #tpu.memory_space<vmem>>, vector<1x8x4xbf16>
    %701 = vector.shape_cast %700 : vector<1x8x4xbf16> to vector<8x4xbf16>
    %cst_654 = arith.constant dense<0.000000e+00> : vector<8x8xf32>
    %702 = tpu.matmul %701, %699, %cst_654 {dimension_numbers = #tpu.dot_dimension_numbers<[1], [0], [0], [1], [0, 0, 1, 1], [], []>} : vector<8x4xbf16>, vector<4x8xbf16>, vector<8x8xf32> -> vector<8x8xf32>
    %703 = arith.addf %694, %702 : vector<8x8xf32>
    %c9_i32_655 = arith.constant 9 : i32
    %704 = arith.addi %c9_i32_655, %639 : i32
    %c1_i32_656 = arith.constant 1 : i32
    %705 = arith.addi %704, %c1_i32_656 : i32
    %c0_657 = arith.constant 0 : index
    %706 = arith.index_cast %705 : i32 to index
    %c0_658 = arith.constant 0 : index
    %c0_659 = arith.constant 0 : index
    %707 = vector.load %arg2[%c0_657, %706, %c0_658, %c0_659] : memref<1x36x4x9xbf16, #tpu.memory_space<vmem>>, vector<1x1x4x8xbf16>
    %708 = vector.shape_cast %707 : vector<1x1x4x8xbf16> to vector<4x8xbf16>
    %c7_660 = arith.constant 7 : index
    %c0_661 = arith.constant 0 : index
    %c0_662 = arith.constant 0 : index
    %709 = vector.load %arg3[%c7_660, %c0_661, %c0_662] : memref<9x8x4xbf16, #tpu.memory_space<vmem>>, vector<1x8x4xbf16>
    %710 = vector.shape_cast %709 : vector<1x8x4xbf16> to vector<8x4xbf16>
    %cst_663 = arith.constant dense<0.000000e+00> : vector<8x8xf32>
    %711 = tpu.matmul %710, %708, %cst_663 {dimension_numbers = #tpu.dot_dimension_numbers<[1], [0], [0], [1], [0, 0, 1, 1], [], []>} : vector<8x4xbf16>, vector<4x8xbf16>, vector<8x8xf32> -> vector<8x8xf32>
    %712 = arith.addf %703, %711 : vector<8x8xf32>
    %c0_i32_664 = arith.constant 0 : i32
    %713 = arith.addi %c0_i32_664, %639 : i32
    %c1_i32_665 = arith.constant 1 : i32
    %714 = arith.addi %713, %c1_i32_665 : i32
    %c0_666 = arith.constant 0 : index
    %715 = arith.index_cast %714 : i32 to index
    %c0_667 = arith.constant 0 : index
    %c1_668 = arith.constant 1 : index
    %716 = vector.load %arg2[%c0_666, %715, %c0_667, %c1_668] : memref<1x36x4x9xbf16, #tpu.memory_space<vmem>>, vector<1x1x4x8xbf16>
    %717 = vector.shape_cast %716 : vector<1x1x4x8xbf16> to vector<4x8xbf16>
    %c8_669 = arith.constant 8 : index
    %c0_670 = arith.constant 0 : index
    %c0_671 = arith.constant 0 : index
    %718 = vector.load %arg3[%c8_669, %c0_670, %c0_671] : memref<9x8x4xbf16, #tpu.memory_space<vmem>>, vector<1x8x4xbf16>
    %719 = vector.shape_cast %718 : vector<1x8x4xbf16> to vector<8x4xbf16>
    %cst_672 = arith.constant dense<0.000000e+00> : vector<8x8xf32>
    %720 = tpu.matmul %719, %717, %cst_672 {dimension_numbers = #tpu.dot_dimension_numbers<[1], [0], [0], [1], [0, 0, 1, 1], [], []>} : vector<8x4xbf16>, vector<4x8xbf16>, vector<8x8xf32> -> vector<8x8xf32>
    %721 = arith.addf %712, %720 : vector<8x8xf32>
    %722 = vector.broadcast %1 : vector<8x1xf32> to vector<8x8xf32>
    %723 = arith.addf %721, %722 : vector<8x8xf32>
    %cst_673 = arith.constant 0.000000e+00 : f32
    %724 = vector.broadcast %cst_673 : f32 to vector<8x8xf32>
    %725 = arith.maximumf %723, %724 : vector<8x8xf32>
    %c0_674 = arith.constant 0 : index
    %726 = arith.index_cast %c7_i32 : i32 to index
    %c0_675 = arith.constant 0 : index
    %c0_676 = arith.constant 0 : index
    %727 = vector.load %arg5[%c0_674, %726, %c0_675, %c0_676] : memref<1x8x8x8xf32, #tpu.memory_space<vmem>>, vector<1x1x8x8xf32>
    %728 = vector.shape_cast %727 : vector<1x1x8x8xf32> to vector<8x8xf32>
    %729 = vector.shape_cast %725 : vector<8x8xf32> to vector<1x1x8x8xf32>
    tpu.vector_store %arg5[%c0_674, %726, %c0_675, %c0_676], %729 {strides = array<i32>} : memref<1x8x8x8xf32, #tpu.memory_space<vmem>>, vector<1x1x8x8xf32>,
    %c8_i32_677 = arith.constant 8 : i32
    return
  }
  func.func @transform_0(%arg0: i32, %arg1: i32) -> (i32, i32, i32, i32) {
    %c0_i32 = arith.constant 0 : i32
    %c0_i32_0 = arith.constant 0 : i32
    %c0_i32_1 = arith.constant 0 : i32
    %c0_i32_2 = arith.constant 0 : i32
    return %arg0, %c0_i32, %c0_i32_0, %c0_i32_1 : i32, i32, i32, i32
  }
  func.func @transform_1(%arg0: i32, %arg1: i32) -> (i32, i32, i32) {
    %c0_i32 = arith.constant 0 : i32
    %c0_i32_0 = arith.constant 0 : i32
    %c0_i32_1 = arith.constant 0 : i32
    %c0_i32_2 = arith.constant 0 : i32
    return %c0_i32, %c0_i32_0, %c0_i32_1 : i32, i32, i32
  }
  func.func @transform_2(%arg0: i32, %arg1: i32) -> (i32, i32) {
    %c0_i32 = arith.constant 0 : i32
    %c0_i32_0 = arith.constant 0 : i32
    %c0_i32_1 = arith.constant 0 : i32
    return %c0_i32, %c0_i32_0 : i32, i32
  }
  func.func @transform_3(%arg0: i32, %arg1: i32) -> (i32, i32, i32, i32) {
    %c0_i32 = arith.constant 0 : i32
    %c0_i32_0 = arith.constant 0 : i32
    %c0_i32_1 = arith.constant 0 : i32
    return %arg0, %arg1, %c0_i32, %c0_i32_0 : i32, i32, i32, i32
  }
}

</mosaic_0001>

<bundles_post_ra>
// kernel: tpu_custom_call.1
= control target key start
LH: loop header
LB: loop body
LE: loop exit
PB: predicated region body
PF: predicated region fallthrough
CT: control target
= control target key end

     0   :  { %8 = vsyncpa [#allocation3], 0  ;;  %s3256_s0 = inlined_call_operand.vmem [shape: bf16[2,36,4,9], index: 0, kind: input, shape index: {}]   ;;  %s3257_s1 = inlined_call_operand.vmem [shape: bf16[9,8,4], index: 1, kind: input, shape index: {}]   ;;  %s3258_s2 = inlined_call_operand.vmem [shape: f32[8,1], index: 2, kind: input, shape index: {}]   ;;  %s3259_s3 = inlined_call_operand.hbm [shape: f32[2,8,8,8], index: 3, kind: output, shape index: {}]  }
   0x1   :  { %10 = vsyncpa [#allocation3 + $0x1], 0  ;;  %s2592_s12 = smov 0   ;;  %s2594_s13 = smov 0  }
   0x2   :  { %s2596_s14 = smov 0   ;;  %s2598_s15 = smov 0  }
   0x3   :  { %s2600_s16 = smov 0   ;;  %s2602_s17 = smov 0  }
   0x4 LB: > { %s2224_s18 = sadd.s32 4294967295, %s2566_s17   ;;  %s2225_s19 = sadd.s32 4294967294, %s2566_s17   ;;  %s2566_s17 = sphi %s2602_s17, %s16_s17   ;;  %s2562_s16 = sphi %s2600_s16, %s3266_s16   ;;  %s2558_s15 = sphi %s2598_s15, %s3265_s15   ;;  %s2554_s14 = sphi %s2596_s14, %s3264_s14   ;;  %s2550_s13 = sphi %s2594_s13, %s3263_s13   ;;  %s2546_s12 = sphi %s2592_s12, %s3262_s12  }
   0x5   : > { %s28_s20 = sadd.s32 1, %s2562_s16  ;;  %s105_s21 = sadd.s32 1, %s2554_s14 }
   0x6   : > { %p30_p0 = scmp.ge.s32.totalorder %s28_s20, 2  ;;  %p115_p1 = scmp.ne.s32.totalorder %s2554_s14, %s2550_s13 }
   0x7   : > { %p116_p2 = scmp.eq.s32.totalorder %s2224_s18, 1  ;;  %p121_p3 = scmp.ne.s32.totalorder %s2550_s13, %s2546_s12 }
   0x8   : > { %s3268_s20 = smov (%p30_p0, %s28_s20), 0  ;;  %p122_p5 = scmp.eq.s32.totalorder %s2225_s19, 1 }
   0x9   : > { %p2632_p4 = por %p116_p2, %p115_p1  ;;  %s100_s23 = ssub.s32 %s2562_s16, %s3268_s20 }
   0xa   : > { %p2228_p6 = scmp.ge.s32.totalorder %s2566_s17, 1  ;;  %p103_p7 = scmp.eq.s32.totalorder %s100_s23, 0 }
   0xb   : > { %p2639_p8 = por %p122_p5, %p121_p3  ;;  %p154_p9 = scmp.lt.s32.totalorder %s2566_s17, 3 }
   0xc   : > { %s2645_s25 = scalar_select %p103_p7, %s2554_s14, %s105_s21  }
   0xd   : > { %p155_p10 = pnand %p2228_p6, %p154_p9 }
   0xe   : > { %p178_p11 = scmp.lt.s32.totalorder (!%p155_p10), %s2558_s15, 1  ;;  %s2568_s4 = smov (!%p155_p10), 127  }
   0xf   : > { %158 = sbr.rel (%p155_p10) target bundleno = 569 (0x239), region = 32  ;;  %s175_s10 = sand.u32 (!%p155_p10), 1, %s2550_s13  }
  0x10   : > { %s2229_s11 = sshll.u32 (!%p155_p10), %s175_s10, 6  ;;  %s2426_s29 = sshll.u32 (!%p155_p10), %s2558_s15, 6 }
  0x11   : > { %s2013_s6 = scalar_lea.hbm (!%p155_p10), %s3259_s3, %s2426_s29  ;;  %s2508_s21 = scalar_lea.hbm (!%p155_p10), %s3259_s3, 128 }
  0x12   : > { %s2016_s8 = sshll.u32 (!%p155_p10), %s2013_s6, 4  ;;  %s2017_s8 = int_to_ptr.hbm [resolvable:$true] %s2016_s8 }
  0x13   : > { %s2502_s9 = sshra.s32 (!%p155_p10), %s2017_s8, 4  ;;  %s2503_s9 = int_to_ptr.hbm [resolvable:$true] %s2502_s9 }
  0x14   : > { %s179_s26 = scalar_select %p178_p11, %s2558_s15, 1  ;;  %vm201_vm0 = vcmask 1041408   ;;  %v2232_v17 = vld [vmem:[%s3257_s1 + $0x4] sm:$0xf]  ;;  %vm197_vm1 = vcmask 31744   ;;  %vm429_vm2 = vcmask 64512  }
  0x15   : > { %v190_v28 = vld [vmem:[%s3257_s1] sm:$0xf]  ;;  %v2238_v29 = vld [vmem:[%s3257_s1 + $0xc] sm:$0xf]  ;;  %v2241_v36 = vld [vmem:[%s3257_s1 + $0x10] sm:$0xf]  ;;  %p2509_p1 = scmp.lt.s32.totalorder %s2503_s9, %s3259_s3 }
  0x16   : > { %s2427_s27 = smul.u32 72, %s179_s26  ;;  %v2249_v38 = vld [vmem:[%s3257_s1 + $0x1c] sm:$0xf]  ;;  %v2235_v47 = vld [vmem:[%s3257_s1 + $0x8] sm:$0xf]  ;;  %s3074_s26 = scalar_lea.vmem [#allocation2], %s2229_s11 }
  0x17   : > { %v2243_v56 = vld [vmem:[%s3257_s1 + $0x14] sm:$0xf]  ;;  %s2014_s7 = sshll.u32 %s3074_s26, 4  ;;  %s2000_s15 = scalar_lea.sflag [#allocation3], %s175_s10  ;;  %s2015_s7 = int_to_ptr.vmem [resolvable:$true] %s2014_s7 }
  0x18   : > { %s2652_s30 = scalar_lea.vmem %s3256_s0, %s2427_s27  ;;  %s2504_s11 = scalar_lea.hbm %s2503_s9, 64 }
  0x19   : > { %v189_v0 = vld [vmem:[%s2652_s30] sm:$0x3]  ;;  %v2237_v1 = vld [vmem:[%s2652_s30 + $0x24] sm:$0x3]  ;;  %v2658_v3 = vld [vmem:[%s2652_s30 + $0x2] sm:$0x3]  ;;  %p2505_p12 = scmp.ne.s32.totalorder %s2503_s9, %s2504_s11  ;;  %p2510_p2 = scmp.lt.s32.totalorder %s2508_s21, %s2504_s11 }
  0x1a   : > { %239 = vst [vmem:[#allocation1] ss:$4 sm:$0xff] %v189_v0  ;;  %v2663_v5 = vld [vmem:[%s2652_s30 + $0x2] sm:$0x3]  ;;  %v2668_v7 = vld [vmem:[%s2652_s30 + $0x26] sm:$0x3] }
  0x1b   : > { %v2673_v9 = vld [vmem:[%s2652_s30 + $0x4] sm:$0x3]  ;;  %v2231_v13 = vld [vmem:[%s2652_s30 + $0x12] sm:$0x3]  ;;  %v222_v15 = vsel %vm201_vm0, %v189_v0, 0  ;;  %v274_v16 = vsel %vm201_vm0, %v2237_v1, 0  ;;  %p2506_p13 = pnand %p2505_p12, %p2632_p4  ;;  %p2511_p3 = por %p2510_p2, %p2509_p1 }
  0x1c   : > { %v2678_v11 = vld [vmem:[%s2652_s30 + $0x4] sm:$0x3]  ;;  %v203_v14 = vsel %vm201_vm0, %v2231_v13, 0  ;;  %231 = vmatpush.bf16.msra.mxu1 %v222_v15  ;;  %283 = vmatpush.bf16.msra.mxu3 %v274_v16  ;;  %v2690_v18 = vld [vmem:[%s2652_s30 + $0x28] sm:$0x3]  ;;  %v353_v45 = vsel %vm201_vm0, %v2658_v3, 0 }
  0x1d   : > { %212 = vmatpush.bf16.msra.mxu0 %v203_v14  ;;  %v2696_v20 = vld [vmem:[%s2652_s30 + $0x6] sm:$0x3]  ;;  %v2706_v24 = vld [vmem:[%s2652_s30 + $0x2a] sm:$0x3]  ;;  %v2711_v26 = vld [vmem:[%s2652_s30 + $0x8] sm:$0x3]  ;;  %p2507_p0 = pneg %p2506_p13 }
  0x1e   : > { %v2701_v22 = vld [vmem:[%s2652_s30 + $0x6] sm:$0x3]  ;;  %v2724_v30 = vld [vmem:[%s2652_s30 + $0x8] sm:$0x3]  ;;  %v2240_v31 = vld [vmem:[%s2652_s30 + $0x36] sm:$0x3] }
  0x1f   : > { %2234 = vmatmul.msk.bf16.vlgmr.msra.gmra.mxu1 %vm197_vm1, %v190_v28  ;;  %2239 = vmatmul.msk.bf16.vlgmr.msra.gmra.mxu3 %vm197_vm1, %v2238_v29  ;;  %v2248_v32 = vld [vmem:[%s2652_s30 + $0x14] sm:$0x3]  ;;  %v300_v33 = vsel %vm201_vm0, %v2240_v31, 0  ;;  %v2737_v37 = vld [vmem:[%s2652_s30 + $0x2c] sm:$0x3]  ;;  %v458_v48 = vsel %vm201_vm0, %v2663_v5, 0  ;;  %p2512_p5 = pnand %p2511_p3, %p2507_p0 }
  0x20   : > { %2233 = vmatmul.msk.bf16.vlgmr.msra.gmra.mxu0 %vm197_vm1, %v2232_v17  ;;  %v379_v34 = vsel %vm201_vm0, %v2248_v32, 0  ;;  %v2746_v40 = vld [vmem:[%s2652_s30 + $0xa] sm:$0x3]  ;;  %v2254_v49 = vld [vmem:[%s2652_s30 + $0x14] sm:$0x3]  ;;  %v508_v62 = vsel %vm201_vm0, %v2668_v7, 0 }
  0x21   : > { %v240_v2 = vld.sshfl [vmem:[#allocation1] sm:$0xff pattern:$0x73625140]  ;;  %309 = vmatpush.bf16.msrb.mxu0 %v300_v33  ;;  %388 = vmatpush.bf16.msrb.mxu3 %v379_v34  ;;  %v2751_v42 = vld [vmem:[%s2652_s30 + $0xa] sm:$0x3]  ;;  %v439_v53 = vsel %vm201_vm0, %v2254_v49, 0 }
  0x22   : > { %242 = vrot.lane.b32.xlu0 %v240_v2, %s2568_s4  ;;  %318 = vst [vmem:[#allocation1] ss:$4 sm:$0xff] %v2237_v1  ;;  %v2766_v50 = vld [vmem:[%s2652_s30 + $0x2e] sm:$0x3]  ;;  %v2263_v54 = vld [vmem:[%s2652_s30 + $0x38] sm:$0x3] }
  0x23   : > { %v533_v57 = vsel %vm201_vm0, %v2263_v54, 0  ;;  %v2779_v58 = vld [vmem:[%s2652_s30 + $0xc] sm:$0x3]  ;;  %v2246_v0 = vld [vmem:[%s3257_s1 + $0x18] sm:$0xf]  ;;  %v682_v14 = vsel %vm201_vm0, %v2678_v11, 0 }
  0x24   : > { %v2251_v1 = vld [vmem:[%s3257_s1 + $0x20] sm:$0xf]  ;;  %v2255_v13 = vld [vmem:[%s3257_s1 + $0x4] sm:$0xf]  ;;  %v2569_v16 = vmov 0   ;;  %v732_v32 = vsel %vm201_vm0, %v2690_v18, 0 }
  0x25   : > { %2487 = vset.pattern.permute.xlu0 %v2569_v16  ;;  %v2817_v17 = vld [vmem:[%s2652_s30 + $0x30] sm:$0x3]  ;;  %v2269_v31 = vld [vmem:[%s3257_s1 + $0x18] sm:$0xf]  ;;  %v2847_v33 = vld [vmem:[%s2652_s30 + $0xe] sm:$0x3] }
  0x26   : > { %v2264_v29 = vld [vmem:[%s3257_s1 + $0x10] sm:$0xf]  ;;  %v2274_v49 = vld [vmem:[%s3257_s1 + $0x20] sm:$0xf]  ;;  %v2319_v16 = vld [vmem:[%s2652_s30 + $0x1a] sm:$0x3] }
  0x29   : > { %v319_v4 = vld.sshfl [vmem:[#allocation1] sm:$0xff pattern:$0x73625140] }
  0x2a   : > { %321 = vrot.lane.b32.xlu0 %v319_v4, %s2568_s4  ;;  %397 = vst [vmem:[#allocation1] ss:$4 sm:$0xff] %v2658_v3  ;;  %v2796_v3 = vld [vmem:[%s2652_s30 + $0xc] sm:$0x3] }
  0x2f   : > { %2250 = vmatmul.msk.bf16.vlgmr.msrb.gmra.mxu3 %vm197_vm1, %v2249_v38 }
  0x30   : > { %2242 = vmatmul.msk.bf16.vlgmr.msrb.gmra.mxu0 %vm197_vm1, %v2241_v36 }
  0x31   : > { %v398_v6 = vld.sshfl [vmem:[#allocation1] sm:$0xff pattern:$0x73625140] }
  0x32   : > { %400 = vrot.lane.b32.xlu1 %v398_v6, %s2568_s4  ;;  %474 = vst [vmem:[#allocation1] ss:$4 sm:$0xff] %v2663_v5  ;;  %v584_v6 = vsel %vm201_vm0, %v2673_v9, 0 }
  0x39   : > { %v475_v8 = vld.sshfl [vmem:[#allocation1] sm:$0xff pattern:$0x73625140] }
  0x3a   : > { %477 = vrot.lane.b32.xlu1 %v475_v8, %s2568_s4  ;;  %550 = vst [vmem:[#allocation1] ss:$4 sm:$0xff] %v2668_v7  ;;  %v2271_v7 = vld [vmem:[%s2652_s30 + $0x16] sm:$0x3] }
  0x41   : > { %v551_v10 = vld.sshfl [vmem:[#allocation1] sm:$0xff pattern:$0x73625140] }
  0x42   : > { %553 = vrot.lane.b32.xlu2 %v551_v10, %s2568_s4  ;;  %626 = vst [vmem:[#allocation1] ss:$4 sm:$0xff] %v2673_v9  ;;  %v2258_v9 = vld [vmem:[%s3257_s1 + $0x8] sm:$0xf] }
  0x49   : > { %v627_v12 = vld.sshfl [vmem:[#allocation1] sm:$0xff pattern:$0x73625140] }
  0x4a   : > { %698 = vst [vmem:[#allocation1] ss:$4 sm:$0xff] %v2678_v11  ;;  %629 = vrot.lane.b32.xlu2 %v627_v12, %s2568_s4  ;;  %v609_v12 = vsel %vm201_vm0, %v2271_v7, 0  ;;  %v432_v11 = vld [vmem:[%s3257_s1] sm:$0xf] }
  0x51   : > { %v699_v19 = vld.sshfl [vmem:[#allocation1] sm:$0xff pattern:$0x73625140] }
  0x52   : > { %701 = vrot.lane.b32.xlu0 %v699_v19, %s2568_s4  ;;  %774 = vst [vmem:[#allocation1] ss:$4 sm:$0xff] %v2690_v18  ;;  %v2266_v18 = vld [vmem:[%s3257_s1 + $0x14] sm:$0xf] }
  0x59   : > { %v775_v21 = vld.sshfl [vmem:[#allocation1] sm:$0xff pattern:$0x73625140] }
  0x5a   : > { %777 = vrot.lane.b32.xlu1 %v775_v21, %s2568_s4  ;;  %850 = vst [vmem:[#allocation1] ss:$4 sm:$0xff] %v2696_v20  ;;  %v2278_v21 = vld [vmem:[%s2652_s30 + $0x16] sm:$0x3] }
  0x61   : > { %v851_v23 = vld.sshfl [vmem:[#allocation1] sm:$0xff pattern:$0x73625140] }
  0x62   : > { %922 = vst [vmem:[#allocation1] ss:$4 sm:$0xff] %v2701_v22  ;;  %853 = vrot.lane.b32.xlu2 %v851_v23, %s2568_s4  ;;  %v2261_v23 = vld [vmem:[%s3257_s1 + $0xc] sm:$0xf] }
  0x69   : > { %v923_v25 = vld.sshfl [vmem:[#allocation1] sm:$0xff pattern:$0x73625140] }
  0x6a   : > { %925 = vrot.lane.b32.xlu0 %v923_v25, %s2568_s4  ;;  %998 = vst [vmem:[#allocation1] ss:$4 sm:$0xff] %v2706_v24  ;;  %v663_v25 = vsel %vm201_vm0, %v2278_v21, 0  ;;  %v880_v21 = vld [vmem:[%s3257_s1] sm:$0xf] }
  0x71   : > { %v999_v27 = vld.sshfl [vmem:[#allocation1] sm:$0xff pattern:$0x73625140] }
  0x72   : > { %1001 = vrot.lane.b32.xlu1 %v999_v27, %s2568_s4  ;;  %1074 = vst [vmem:[#allocation1] ss:$4 sm:$0xff] %v2711_v26  ;;  %v2831_v27 = vld [vmem:[%s2652_s30 + $0xe] sm:$0x3] }
  0x79   : > { %v1075_v35 = vld.sshfl [vmem:[#allocation1] sm:$0xff pattern:$0x73625140] }
  0x7a   : > { %1146 = vst [vmem:[#allocation1] ss:$4 sm:$0xff] %v2724_v30  ;;  %1077 = vrot.lane.b32.xlu2 %v1075_v35, %s2568_s4  ;;  %v2287_v35 = vld [vmem:[%s2652_s30 + $0x3a] sm:$0x3] }
  0x81   : > { %v1147_v39 = vld.sshfl [vmem:[#allocation1] sm:$0xff pattern:$0x73625140] }
  0x82   : > { %1149 = vrot.lane.b32.xlu0 %v1147_v39, %s2568_s4  ;;  %1222 = vst [vmem:[#allocation1] ss:$4 sm:$0xff] %v2737_v37  ;;  %v2272_v39 = vld [vmem:[%s3257_s1 + $0x1c] sm:$0xf] }
  0x89   : > { %v1223_v41 = vld.sshfl [vmem:[#allocation1] sm:$0xff pattern:$0x73625140] }
  0x8a   : > { %1298 = vst [vmem:[#allocation1] ss:$4 sm:$0xff] %v2746_v40  ;;  %1225 = vrot.lane.b32.xlu1 %v1223_v41, %s2568_s4  ;;  %v757_v41 = vsel %vm201_vm0, %v2287_v35, 0 }
  0x91   : > { %v1299_v43 = vld.sshfl [vmem:[#allocation1] sm:$0xff pattern:$0x73625140] }
  0x92   : > { %1370 = vst [vmem:[#allocation1] ss:$4 sm:$0xff] %v2751_v42  ;;  %1301 = vrot.lane.b32.xlu2 %v1299_v43, %s2568_s4  ;;  %v808_v43 = vsel %vm201_vm0, %v2696_v20, 0 }
  0x94   : > { %v243_v44 = vpop.permute.xlu0 %242 }
  0x95   : > { %v248_v46 = vsel %vm201_vm0, %v243_v44, 0 }
  0x96   : > { %257 = vmatpush.bf16.msra.mxu2 %v248_v46  ;;  %v2302_v46 = vld [vmem:[%s2652_s30 + $0x18] sm:$0x3] }
  0x97   : > { %v887_v20 = vsel %vm201_vm0, %v2302_v46, 0  ;;  %v2335_v46 = vld [vmem:[%s2652_s30 + $0x3e] sm:$0x3] }
  0x99   : > { %2236 = vmatmul.msk.bf16.vlgmr.msra.gmra.mxu2 %vm197_vm1, %v2235_v47  ;;  %v1371_v51 = vld.sshfl [vmem:[#allocation1] sm:$0xff pattern:$0x73625140]  ;;  %v2295_v47 = vld [vmem:[%s2652_s30 + $0x18] sm:$0x3] }
  0x9a   : > { %362 = vmatpush.bf16.msrb.mxu2 %v353_v45  ;;  %1373 = vrot.lane.b32.xlu0 %v1371_v51, %s2568_s4  ;;  %1446 = vst [vmem:[#allocation1] ss:$4 sm:$0xff] %v2766_v50  ;;  %v656_v51 = vld [vmem:[%s3257_s1] sm:$0xf] }
  0x9c   : > { %v322_v52 = vpop.permute.xlu0 %321  ;;  %v554_v61 = vpop.permute.xlu2 %553 }
  0x9d   : > { %v327_v55 = vsel %vm201_vm0, %v322_v52, 0  ;;  %v559_v2 = vsel %vm201_vm0, %v554_v61, 0  ;;  %v833_v52 = vsel %vm201_vm0, %v2295_v47, 0  ;;  %v214_v7 = vpop.f32.mrf.mxu0 }
  0x9e   : > { %467 = vmatpush.bf16.msra.mxu2 %v458_v48  ;;  %336 = vmatpush.bf16.msrb.mxu1 %v327_v55  ;;  %v2279_v55 = vld [vmem:[%s3257_s1 + $0x4] sm:$0xf] }
  0xa1   : > { %2244 = vmatmul.msk.bf16.vlgmr.msrb.gmra.mxu1 %vm197_vm1, %v2243_v56  ;;  %v1447_v59 = vld.sshfl [vmem:[#allocation1] sm:$0xff pattern:$0x73625140]  ;;  %v2282_v56 = vld [vmem:[%s3257_s1 + $0x8] sm:$0xf] }
  0xa2   : > { %448 = vmatpush.bf16.msra.mxu1 %v439_v53  ;;  %1522 = vst [vmem:[#allocation1] ss:$4 sm:$0xff] %v2779_v58  ;;  %1449 = vrot.lane.b32.xlu1 %v1447_v59, %s2568_s4  ;;  %v186_v53 = vld [vmem:[%s3258_s2] sm:$0xff]  ;;  %v906_v59 = vsel %vm201_vm0, %v2701_v22, 0  ;;  %v2288_v22 = vld [vmem:[%s3257_s1 + $0x10] sm:$0xf] }
  0xa4   : > { %v401_v60 = vpop.permute.xlu1 %400  ;;  %v630_v8 = vpop.permute.xlu2 %629 }
  0xa5   : > { %v406_v63 = vsel %vm201_vm0, %v401_v60, 0  ;;  %v635_v15 = vsel %vm201_vm0, %v630_v8, 0  ;;  %v2311_v60 = vld [vmem:[%s2652_s30 + $0x3c] sm:$0x3] }
  0xa6   : > { %542 = vmatpush.bf16.msrb.mxu1 %v533_v57  ;;  %415 = vmatpush.bf16.msra.mxu0 %v406_v63  ;;  %v2290_v63 = vld [vmem:[%s3257_s1 + $0x14] sm:$0xf] }
  0xa9   : > { %2247 = vmatmul.msk.bf16.vlgmr.msrb.gmra.mxu2 %vm197_vm1, %v2246_v0  ;;  %2252 = vmatmul.msk.bf16.vlgmr.msra.gmra.mxu0 %vm197_vm1, %v2251_v1  ;;  %v1523_v4 = vld.sshfl [vmem:[#allocation1] sm:$0xff pattern:$0x73625140]  ;;  %v981_v0 = vsel %vm201_vm0, %v2311_v60, 0 }
  0xaa   : > { %517 = vmatpush.bf16.msrb.mxu0 %v508_v62  ;;  %568 = vmatpush.bf16.msrb.mxu2 %v559_v2  ;;  %1594 = vst [vmem:[#allocation1] ss:$4 sm:$0xff] %v2796_v3  ;;  %v2285_v62 = vld [vmem:[%s3257_s1 + $0xc] sm:$0xf]  ;;  %v2293_v2 = vld [vmem:[%s3257_s1 + $0x18] sm:$0xf] }
  0xab   : > { %1525 = vrot.lane.b32.xlu2 %v1523_v4, %s2568_s4  ;;  %v956_v4 = vsel %vm201_vm0, %v2706_v24, 0  ;;  %v2303_v24 = vld [vmem:[%s3257_s1 + $0x4] sm:$0xf]  ;;  %v1104_v60 = vld [vmem:[%s3257_s1] sm:$0xf] }
  0xac   : > { %v478_v5 = vpop.permute.xlu1 %477 }
  0xad   : > { %v483_v10 = vsel %vm201_vm0, %v478_v5, 0 }
  0xae   : > { %492 = vmatpush.bf16.msra.mxu3 %v483_v10  ;;  %618 = vmatpush.bf16.msra.mxu0 %v609_v12  ;;  %v2296_v10 = vld [vmem:[%s3257_s1 + $0x1c] sm:$0xf] }
  0xb1   : > { %2256 = vmatmul.msk.bf16.vlgmr.msra.gmra.mxu1 %vm197_vm1, %v2255_v13  ;;  %2259 = vmatmul.msk.bf16.vlgmr.msra.gmra.mxu3 %vm197_vm1, %v2258_v9  ;;  %v1595_v19 = vld.sshfl [vmem:[#allocation1] sm:$0xff pattern:$0x73625140]  ;;  %v1032_v13 = vsel %vm201_vm0, %v2711_v26, 0  ;;  %v233_v9 = vpop.f32.mrf.mxu1  ;;  %v285_v26 = vpop.f32.mrf.mxu3 }
  0xb2   : > { %593 = vmatpush.bf16.msrb.mxu3 %v584_v6  ;;  %644 = vmatpush.bf16.msra.mxu1 %v635_v15  ;;  %1670 = vst [vmem:[#allocation1] ss:$4 sm:$0xff] %v2817_v17  ;;  %v216_v15 = vpop.f32.mrf.mxu0 }
  0xb3   : > { %1597 = vrot.lane.b32.xlu0 %v1595_v19, %s2568_s4  ;;  %v2298_v19 = vld [vmem:[%s3257_s1 + $0x20] sm:$0xf] }
  0xb6   : > { %691 = vmatpush.bf16.msra.mxu3 %v682_v14  ;;  %v234_v14 = vadd.f32 %v233_v9, %v214_v7 }
  0xb9   : > { %2257 = vmatmul.msk.bf16.vlgmr.msra.gmra.mxu2 %vm197_vm1, %v432_v11  ;;  %2262 = vmatmul.msk.bf16.vlgmr.msrb.gmra.mxu0 %vm197_vm1, %v2261_v23  ;;  %v1671_v28 = vld.sshfl [vmem:[#allocation1] sm:$0xff pattern:$0x73625140]  ;;  %v1057_v11 = vsel %vm201_vm0, %v2319_v16, 0  ;;  %v235_v23 = vpop.f32.mrf.mxu1  ;;  %v2338_v16 = vld [vmem:[%s3257_s1 + $0x14] sm:$0xf] }
  0xba   : > { %672 = vmatpush.bf16.msra.mxu2 %v663_v25  ;;  %1746 = vst [vmem:[#allocation1] ss:$4 sm:$0xff] %v2831_v27  ;;  %1673 = vrot.lane.b32.xlu1 %v1671_v28, %s2568_s4  ;;  %v2326_v25 = vld [vmem:[%s2652_s30 + $0x1a] sm:$0x3]  ;;  %v2306_v28 = vld [vmem:[%s3257_s1 + $0x8] sm:$0xf]  ;;  %v2945_v35 = vpop.f32.mrf.mxu0 }
  0xbc   : > { %v854_v54 = vpop.permute.xlu2 %853 }
  0xbd   : > { %v859_v57 = vsel %vm201_vm0, %v854_v54, 0  ;;  %v2320_v54 = vld [vmem:[%s3257_s1 + $0x1c] sm:$0xf] }
  0xc1   : > { %2265 = vmatmul.msk.bf16.vlgmr.msrb.gmra.mxu1 %vm197_vm1, %v2264_v29  ;;  %2270 = vmatmul.msk.bf16.vlgmr.msrb.gmra.mxu3 %vm197_vm1, %v2269_v31  ;;  %v1747_v34 = vld.sshfl [vmem:[#allocation1] sm:$0xff pattern:$0x73625140]  ;;  %v2312_v29 = vld [vmem:[%s3257_s1 + $0x10] sm:$0xf]  ;;  %v1111_v31 = vsel %vm201_vm0, %v2326_v25, 0 }
  0xc2   : > { %741 = vmatpush.bf16.msrb.mxu1 %v732_v32  ;;  %1818 = vst [vmem:[#allocation1] ss:$4 sm:$0xff] %v2847_v33  ;;  %1749 = vrot.lane.b32.xlu2 %v1747_v34, %s2568_s4  ;;  %v287_v32 = vpop.f32.mrf.mxu3  ;;  %v1180_v34 = vsel %vm201_vm0, %v2737_v37, 0  ;;  %v2314_v37 = vld [vmem:[%s3257_s1 + $0x14] sm:$0xf] }
  0xc3   : > { %v2346_v32 = vld [vmem:[%s3257_s1 + $0x20] sm:$0xf] }
  0xc4   : > { %v702_v36 = vpop.permute.xlu0 %701 }
  0xc5   : > { %v707_v38 = vsel %vm201_vm0, %v702_v36, 0  ;;  %v1130_v36 = vsel %vm201_vm0, %v2724_v30, 0 }
  0xc6   : > { %716 = vmatpush.bf16.msrb.mxu0 %v707_v38 }
  0xc9   : > { %2267 = vmatmul.msk.bf16.vlgmr.msrb.gmra.mxu2 %vm197_vm1, %v2266_v18  ;;  %2273 = vmatmul.msk.bf16.vlgmr.msra.gmra.mxu0 %vm197_vm1, %v2272_v39  ;;  %v1819_v44 = vld.sshfl [vmem:[#allocation1] sm:$0xff pattern:$0x73625140]  ;;  %v2952_v18 = vld [vmem:[%s2652_s30 + $0x32] sm:$0x3] }
  0xca   : > { %766 = vmatpush.bf16.msrb.mxu2 %v757_v41  ;;  %817 = vmatpush.bf16.msra.mxu0 %v808_v43  ;;  %v2309_v39 = vld [vmem:[%s3257_s1 + $0xc] sm:$0xf]  ;;  %v2960_v41 = vpop.f32.mrf.mxu3  ;;  %1894 = vst [vmem:[#allocation1] ss:$4 sm:$0xff] %v2952_v18  ;;  %v313_v43 = vpop.f32.mrf.mxu0 }
  0xcb   : > { %1821 = vrot.lane.b32.xlu0 %v1819_v44, %s2568_s4  ;;  %v2317_v44 = vld [vmem:[%s3257_s1 + $0x18] sm:$0xf]  ;;  %v2367_v43 = vld [vmem:[%s2652_s30 + $0x1e] sm:$0x3] }
  0xcc   : > { %v778_v45 = vpop.permute.xlu1 %777 }
  0xcd   : > { %v783_v48 = vsel %vm201_vm0, %v778_v45, 0 }
  0xce   : > { %792 = vmatpush.bf16.msrb.mxu3 %v783_v48  ;;  %v2322_v48 = vld [vmem:[%s3257_s1 + $0x20] sm:$0xf] }
  0xd1   : > { %2275 = vmatmul.msk.bf16.vlgmr.msra.gmra.mxu1 %vm197_vm1, %v2274_v49  ;;  %2281 = vmatmul.msk.bf16.vlgmr.msra.gmra.mxu3 %vm197_vm1, %v656_v51  ;;  %v1895_v45 = vld.sshfl [vmem:[#allocation1] sm:$0xff pattern:$0x73625140]  ;;  %v1205_v49 = vsel %vm201_vm0, %v2335_v46, 0  ;;  %v2343_v51 = vld [vmem:[%s2652_s30 + $0x1c] sm:$0x3] }
  0xd2   : > { %896 = vmatpush.bf16.msra.mxu3 %v887_v20  ;;  %842 = vmatpush.bf16.msra.mxu1 %v833_v52  ;;  %v392_v20 = vpop.f32.mrf.mxu3  ;;  %v1281_v52 = vsel %vm201_vm0, %v2343_v51, 0 }
  0xd3   : > { %424 = vperm.xlu0 %2487, %v186_v53   ;;  %1897 = vrot.lane.b32.xlu1 %v1895_v45, %s2568_s4  ;;  %v1578_v20 = vsel %vm201_vm0, %v2796_v3, 0  ;;  %v1328_v3 = vld [vmem:[%s3257_s1] sm:$0xf] }
  0xd4   : > { %v1078_v8 = vpop.permute.xlu2 %1077 }
  0xd5   : > { %v1083_v12 = vsel %vm201_vm0, %v1078_v8, 0  ;;  %v2330_v8 = vld [vmem:[%s3257_s1 + $0x8] sm:$0xf] }
  0xd9   : > { %2280 = vmatmul.msk.bf16.vlgmr.msra.gmra.mxu2 %vm197_vm1, %v2279_v55  ;;  %2283 = vmatmul.msk.bf16.vlgmr.msrb.gmra.mxu0 %vm197_vm1, %v2282_v56  ;;  %v2327_v55 = vld [vmem:[%s3257_s1 + $0x4] sm:$0xf]  ;;  %v1256_v56 = vsel %vm201_vm0, %v2746_v40, 0  ;;  %v2333_v40 = vld [vmem:[%s3257_s1 + $0xc] sm:$0xf] }
  0xda   : > { %868 = vmatpush.bf16.msra.mxu2 %v859_v57  ;;  %915 = vmatpush.bf16.msrb.mxu0 %v906_v59 }
  0xdc   : > { %v926_v61 = vpop.permute.xlu0 %925 }
  0xdd   : > { %v931_v1 = vsel %vm201_vm0, %v926_v61, 0 }
  0xe1   : > { %2286 = vmatmul.msk.bf16.vlgmr.msrb.gmra.mxu1 %vm197_vm1, %v2285_v62  ;;  %2291 = vmatmul.msk.bf16.vlgmr.msrb.gmra.mxu3 %vm197_vm1, %v2290_v63  ;;  %v2994_v62 = vld [vmem:[%s2652_s30 + $0x10] sm:$0x3] }
  0xe2   : > { %990 = vmatpush.bf16.msrb.mxu3 %v981_v0  ;;  %940 = vmatpush.bf16.msrb.mxu1 %v931_v1  ;;  %1970 = vst [vmem:[#allocation1] ss:$4 sm:$0xff] %v2994_v62 }
  0xe4   : > { %v1002_v5 = vpop.permute.xlu1 %1001 }
  0xe5   : > { %v1007_v6 = vsel %vm201_vm0, %v1002_v5, 0 }
  0xe9   : > { %2289 = vmatmul.msk.bf16.vlgmr.msrb.gmra.mxu2 %vm197_vm1, %v2288_v22  ;;  %2294 = vmatmul.msk.bf16.vlgmr.msra.gmra.mxu0 %vm197_vm1, %v2293_v2  ;;  %v1971_v7 = vld.sshfl [vmem:[#allocation1] sm:$0xff pattern:$0x73625140] }
  0xea   : > { %965 = vmatpush.bf16.msrb.mxu2 %v956_v4  ;;  %1016 = vmatpush.bf16.msra.mxu0 %v1007_v6  ;;  %v2350_v4 = vld [vmem:[%s2652_s30 + $0x1c] sm:$0x3] }
  0xeb   : > { %v1335_v5 = vsel %vm201_vm0, %v2350_v4, 0  ;;  %1973 = vrot.lane.b32.xlu2 %v1971_v7, %s2568_s4 }
  0xec   : > { %v1302_v61 = vpop.permute.xlu2 %1301 }
  0xed   : > { %v1307_v1 = vsel %vm201_vm0, %v1302_v61, 0  ;;  %v2357_v61 = vld [vmem:[%s3257_s1 + $0xc] sm:$0xf] }
  0xf1   : > { %2297 = vmatmul.msk.bf16.vlgmr.msra.gmra.mxu1 %vm197_vm1, %v2296_v10  ;;  %2304 = vmatmul.msk.bf16.vlgmr.msra.gmra.mxu3 %vm197_vm1, %v2303_v24 }
  0xf2   : > { %1092 = vmatpush.bf16.msra.mxu3 %v1083_v12  ;;  %1041 = vmatpush.bf16.msra.mxu1 %v1032_v13  ;;  %v2336_v12 = vld [vmem:[%s3257_s1 + $0x10] sm:$0xf]  ;;  %v1354_v13 = vsel %vm201_vm0, %v2751_v42, 0  ;;  %v1480_v42 = vsel %vm201_vm0, %v2779_v58, 0 }
  0xf4   : > { %v1150_v38 = vpop.permute.xlu0 %1149 }
  0xf5   : > { %v1155_v30 = vsel %vm201_vm0, %v1150_v38, 0 }
  0xf9   : > { %2299 = vmatmul.msk.bf16.vlgmr.msra.gmra.mxu2 %vm197_vm1, %v2298_v19  ;;  %2305 = vmatmul.msk.bf16.vlgmr.msrb.gmra.mxu0 %vm197_vm1, %v880_v21  ;;  %v2344_v19 = vld [vmem:[%s3257_s1 + $0x1c] sm:$0xf] }
  0xfa   : > { %1066 = vmatpush.bf16.msra.mxu2 %v1057_v11  ;;  %1120 = vmatpush.bf16.msrb.mxu0 %v1111_v31 }
  0xfc   : > { %v1226_v47 = vpop.permute.xlu1 %1225 }
  0xfd   : > { %v1231_v53 = vsel %vm201_vm0, %v1226_v47, 0  ;;  %v2354_v47 = vld [vmem:[%s3257_s1 + $0x8] sm:$0xf] }
 0x101   : > { %2307 = vmatmul.msk.bf16.vlgmr.msrb.gmra.mxu1 %vm197_vm1, %v2306_v28  ;;  %2313 = vmatmul.msk.bf16.vlgmr.msrb.gmra.mxu3 %vm197_vm1, %v2312_v29  ;;  %v2341_v29 = vld [vmem:[%s3257_s1 + $0x18] sm:$0xf] }
 0x102   : > { %1189 = vmatpush.bf16.msrb.mxu3 %v1180_v34  ;;  %1139 = vmatpush.bf16.msrb.mxu1 %v1130_v36 }
 0x109   : > { %2310 = vmatmul.msk.bf16.vlgmr.msrb.gmra.mxu2 %vm197_vm1, %v2309_v39  ;;  %2315 = vmatmul.msk.bf16.vlgmr.msra.gmra.mxu0 %vm197_vm1, %v2314_v37 }
 0x10a   : > { %1164 = vmatpush.bf16.msrb.mxu2 %v1155_v30  ;;  %1214 = vmatpush.bf16.msra.mxu0 %v1205_v49 }
 0x10c   : > { %v1374_v0 = vpop.permute.xlu0 %1373 }
 0x10d   : > { %v1379_v2 = vsel %vm201_vm0, %v1374_v0, 0 }
 0x111   : > { %2318 = vmatmul.msk.bf16.vlgmr.msra.gmra.mxu1 %vm197_vm1, %v2317_v44  ;;  %2323 = vmatmul.msk.bf16.vlgmr.msra.gmra.mxu3 %vm197_vm1, %v2322_v48  ;;  %v1526_v44 = vpop.permute.xlu2 %1525  ;;  %v1505_v48 = vsel %vm201_vm0, %v2367_v43, 0 }
 0x112   : > { %1290 = vmatpush.bf16.msra.mxu3 %v1281_v52  ;;  %1240 = vmatpush.bf16.msra.mxu1 %v1231_v53  ;;  %v1531_v52 = vsel %vm201_vm0, %v1526_v44, 0 }
 0x114   : > { %v1450_v23 = vpop.permute.xlu1 %1449 }
 0x115   : > { %v1455_v36 = vsel %vm201_vm0, %v1450_v23, 0 }
 0x119   : > { %2321 = vmatmul.msk.bf16.vlgmr.msra.gmra.mxu2 %vm197_vm1, %v2320_v54  ;;  %2328 = vmatmul.msk.bf16.vlgmr.msrb.gmra.mxu0 %vm197_vm1, %v2327_v55 }
 0x11a   : > { %1265 = vmatpush.bf16.msra.mxu2 %v1256_v56  ;;  %1316 = vmatpush.bf16.msrb.mxu0 %v1307_v1 }
 0x11c   : > { %v259_v57 = vpop.f32.mrf.mxu2 }
 0x11d   : > { %v263_v59 = vadd.f32 %v259_v57, %v234_v14  ;;  %v1404_v14 = vsel %vm201_vm0, %v2766_v50, 0  ;;  %v2374_v57 = vld [vmem:[%s2652_s30 + $0x1e] sm:$0x3] }
 0x11e   : > { %v338_v63 = vpop.f32.mrf.mxu1 }
 0x11f   : > { %v289_v22 = vadd.f32 %v285_v26, %v263_v59  ;;  %v2359_v26 = vld [vmem:[%s2652_s30 + $0x40] sm:$0x3] }
 0x120   : > { %v1429_v50 = vsel %vm201_vm0, %v2359_v26, 0  ;;  %v2383_v26 = vld [vmem:[%s2652_s30 + $0x42] sm:$0x3] }
 0x121   : > { %2329 = vmatmul.msk.bf16.vlgmr.msrb.gmra.mxu1 %vm197_vm1, %v1104_v60  ;;  %2334 = vmatmul.msk.bf16.vlgmr.msrb.gmra.mxu3 %vm197_vm1, %v2333_v40  ;;  %v315_v34 = vadd.f32 %v2945_v35, %v289_v22  ;;  %v2351_v35 = vld [vmem:[%s3257_s1 + $0x4] sm:$0xf]  ;;  %v1559_v22 = vsel %vm201_vm0, %v2374_v57, 0  ;;  %v1802_v57 = vsel %vm201_vm0, %v2847_v33, 0 }
 0x122   : > { %1388 = vmatpush.bf16.msrb.mxu3 %v1379_v2  ;;  %1344 = vmatpush.bf16.msrb.mxu1 %v1335_v5 }
 0x123   : > { %v342_v38 = vadd.f32 %v338_v63, %v315_v34  ;;  %v2370_v34 = vld [vmem:[%s3257_s1 + $0x20] sm:$0xf] }
 0x124   : > { %v261_v6 = vpop.f32.mrf.mxu2 }
 0x125   : > { %v1598_v11 = vpop.permute.xlu0 %1597 }
 0x126   : > { %v340_v10 = vpop.f32.mrf.mxu1  ;;  %v417_v24 = vpop.f32.mrf.mxu0  ;;  %v1603_v63 = vsel %vm201_vm0, %v1598_v11, 0  ;;  %v2362_v11 = vld [vmem:[%s3257_s1 + $0x14] sm:$0xf] }
 0x129   : > { %2331 = vmatmul.msk.bf16.vlgmr.msrb.gmra.mxu2 %vm197_vm1, %v2330_v8  ;;  %2337 = vmatmul.msk.bf16.vlgmr.msra.gmra.mxu0 %vm197_vm1, %v2336_v12  ;;  %v2365_v12 = vld [vmem:[%s3257_s1 + $0x18] sm:$0xf] }
 0x12a   : > { %1363 = vmatpush.bf16.msrb.mxu2 %v1354_v13  ;;  %1413 = vmatpush.bf16.msra.mxu0 %v1404_v14 }
 0x12c   : > { %v364_v9 = vpop.f32.mrf.mxu2  ;;  %v1674_v8 = vpop.permute.xlu1 %1673 }
 0x12d   : > { %v368_v30 = vadd.f32 %v364_v9, %v342_v38  ;;  %v1679_v14 = vsel %vm201_vm0, %v1674_v8, 0  ;;  %v1852_v8 = vsel %vm201_vm0, %v2952_v18, 0 }
 0x12e   : > { %v450_v15 = vpop.f32.mrf.mxu1  ;;  %v419_v21 = vpop.f32.mrf.mxu0 }
 0x12f   : > { %v394_v53 = vadd.f32 %v2960_v41, %v368_v30  ;;  %v2391_v30 = vld [vmem:[%s2652_s30 + $0x20] sm:$0x3] }
 0x130   : > { %v1729_v44 = vsel %vm201_vm0, %v2391_v30, 0  ;;  %v2408_v30 = vld [vmem:[%s3257_s1 + $0x10] sm:$0xf] }
 0x131   : > { %2339 = vmatmul.msk.bf16.vlgmr.msra.gmra.mxu1 %vm197_vm1, %v2338_v16  ;;  %2345 = vmatmul.msk.bf16.vlgmr.msra.gmra.mxu3 %vm197_vm1, %v2344_v19  ;;  %v421_v59 = vadd.f32 %v417_v24, %v394_v53  ;;  %v2360_v24 = vld [vmem:[%s3257_s1 + $0x10] sm:$0xf]  ;;  %v1628_v16 = vsel %vm201_vm0, %v2817_v17, 0 }
 0x132   : > { %1489 = vmatpush.bf16.msra.mxu3 %v1480_v42  ;;  %1438 = vmatpush.bf16.msra.mxu1 %v1429_v50 }
 0x134   : > { %v366_v25 = vpop.f32.mrf.mxu2  ;;  %v494_v28 = vpop.f32.mrf.mxu3 }
 0x135   : > { %v2368_v25 = vld [vmem:[%s3257_s1 + $0x1c] sm:$0xf] }
 0x136   : > { %v452_v31 = vpop.f32.mrf.mxu1  ;;  %v519_v58 = vpop.f32.mrf.mxu0 }
 0x139   : > { %2342 = vmatmul.msk.bf16.vlgmr.msra.gmra.mxu2 %vm197_vm1, %v2341_v29  ;;  %2347 = vmatmul.msk.bf16.vlgmr.msrb.gmra.mxu0 %vm197_vm1, %v2346_v32  ;;  %v1653_v29 = vsel %vm201_vm0, %v2383_v26, 0 }
 0x13a   : > { %1464 = vmatpush.bf16.msra.mxu2 %v1455_v36  ;;  %1514 = vmatpush.bf16.msrb.mxu0 %v1505_v48  ;;  %v1552_v36 = vld [vmem:[%s3257_s1] sm:$0xf] }
 0x13c   : > { %v469_v39 = vpop.f32.mrf.mxu2  ;;  %v496_v37 = vpop.f32.mrf.mxu3 }
 0x13d   : > { %v3042_v45 = vpop.permute.xlu0 %1821  ;;  %v470_v49 = vadd.f32 %v469_v39, %v450_v15  ;;  %v1704_v39 = vsel %vm201_vm0, %v2831_v27, 0  ;;  %v2398_v37 = vld [vmem:[%s2652_s30 + $0x20] sm:$0x3]  ;;  %v2375_v27 = vld [vmem:[%s3257_s1 + $0x4] sm:$0xf] }
 0x13e   : > { %v544_v46 = vpop.f32.mrf.mxu1  ;;  %v521_v51 = vpop.f32.mrf.mxu0  ;;  %v1783_v43 = vsel %vm201_vm0, %v2398_v37, 0  ;;  %v2402_v37 = vld [vmem:[%s3257_s1 + $0x8] sm:$0xf] }
 0x13f   : > { %v498_v54 = vadd.f32 %v494_v28, %v470_v49  ;;  %v2378_v51 = vld [vmem:[%s3257_s1 + $0x8] sm:$0xf] }
 0x141   : > { %2352 = vmatmul.msk.bf16.vlgmr.msrb.gmra.mxu1 %vm197_vm1, %v2351_v35  ;;  %2355 = vmatmul.msk.bf16.vlgmr.msrb.gmra.mxu3 %vm197_vm1, %v2354_v47  ;;  %v523_v40 = vadd.f32 %v519_v58, %v498_v54 }
 0x142   : > { %1587 = vmatpush.bf16.msrb.mxu3 %v1578_v20  ;;  %1540 = vmatpush.bf16.msrb.mxu1 %v1531_v52 }
 0x143   : > { %v548_v4 = vadd.f32 %v544_v46, %v523_v40  ;;  %v1750_v46 = vpop.permute.xlu2 %1749 }
 0x144   : > { %v471_v55 = vpop.f32.mrf.mxu2  ;;  %v595_v56 = vpop.f32.mrf.mxu3  ;;  %v1755_v52 = vsel %vm201_vm0, %v1750_v46, 0 }
 0x145   : > { %v3061_v60 = vpop.permute.xlu0 %424 }
 0x146   : > { %v546_v41 = vpop.f32.mrf.mxu1  ;;  %v427_v0 = vadd.f32 %v3061_v60, %v421_v59  ;;  %v620_v1 = vpop.f32.mrf.mxu0  ;;  %v2407_v59 = vld [vmem:[%s2652_s30 + $0x44] sm:$0x3] }
 0x147   : > { %v2381_v41 = vld [vmem:[%s3257_s1 + $0xc] sm:$0xf] }
 0x148   : > { %v428_v2 = vmax.f32 %v427_v0, 0.0 }
 0x149   : > { %2353 = vmatmul.msk.bf16.vlgmr.msrb.gmra.mxu2 %vm197_vm1, %v1328_v3  ;;  %2358 = vmatmul.msk.bf16.vlgmr.msra.gmra.mxu0 %vm197_vm1, %v2357_v61  ;;  %v2386_v61 = vld [vmem:[%s3257_s1 + $0x14] sm:$0xf] }
 0x14a   : > { %1568 = vmatpush.bf16.msrb.mxu2 %v1559_v22  ;;  %1612 = vmatpush.bf16.msra.mxu0 %v1603_v63  ;;  %430 = vst.msk [vmem:[%s3074_s26] sm:$0xff] %vm429_vm2, %v428_v2  ;;  %v1827_v63 = vsel %vm201_vm0, %v3042_v45, 0  ;;  %v2389_v45 = vld [vmem:[%s3257_s1 + $0x18] sm:$0xf] }
 0x14c   : > { %v570_v5 = vpop.f32.mrf.mxu2  ;;  %v597_v6 = vpop.f32.mrf.mxu3 }
 0x14d   : > { %v574_v7 = vadd.f32 %v570_v5, %v548_v4  ;;  %v2384_v4 = vld [vmem:[%s3257_s1 + $0x10] sm:$0xf] }
 0x14e   : > { %v646_v10 = vpop.f32.mrf.mxu1  ;;  %v622_v9 = vpop.f32.mrf.mxu0 }
 0x14f   : > { %v599_v13 = vadd.f32 %v595_v56, %v574_v7 }
 0x151   : > { %v624_v15 = vadd.f32 %v620_v1, %v599_v13  ;;  %2361 = vmatmul.msk.bf16.vlgmr.msra.gmra.mxu1 %vm197_vm1, %v2360_v24  ;;  %2366 = vmatmul.msk.bf16.vlgmr.msra.gmra.mxu3 %vm197_vm1, %v2365_v12  ;;  %v1877_v1 = vsel %vm201_vm0, %v2407_v59, 0  ;;  %v2418_v59 = vld [vmem:[%s3257_s1 + $0x20] sm:$0xf] }
 0x152   : > { %1688 = vmatpush.bf16.msra.mxu3 %v1679_v14  ;;  %1637 = vmatpush.bf16.msra.mxu1 %v1628_v16  ;;  %v2392_v14 = vld [vmem:[%s3257_s1 + $0x1c] sm:$0xf] }
 0x153   : > { %v650_v19 = vadd.f32 %v646_v10, %v624_v15  ;;  %v2399_v15 = vld [vmem:[%s3257_s1 + $0x4] sm:$0xf] }
 0x154   : > { %v572_v21 = vpop.f32.mrf.mxu2  ;;  %v693_v42 = vpop.f32.mrf.mxu3 }
 0x155   : > { %v651_v50 = vadd.f32 %v650_v19, %v3061_v60  ;;  %v1898_v19 = vpop.permute.xlu1 %1897  ;;  %v1974_v21 = vpop.permute.xlu2 %1973 }
 0x156   : > { %v648_v23 = vpop.f32.mrf.mxu1  ;;  %v718_v17 = vpop.f32.mrf.mxu0  ;;  %v1903_v26 = vsel %vm201_vm0, %v1898_v19, 0 }
 0x157   : > { %v652_v28 = vmax.f32 %v651_v50, 0.0  ;;  %v1979_v50 = vsel %vm201_vm0, %v1974_v21, 0 }
 0x159   : > { %2276 = vst.msk [vmem:[%s3074_s26 + $0x8] sm:$0xff] %vm429_vm2, %v652_v28  ;;  %2363 = vmatmul.msk.bf16.vlgmr.msra.gmra.mxu2 %vm197_vm1, %v2362_v11  ;;  %2369 = vmatmul.msk.bf16.vlgmr.msrb.gmra.mxu0 %vm197_vm1, %v2368_v25  ;;  %v1928_v11 = vsel %vm201_vm0, %v2994_v62, 0  ;;  %v2415_v28 = vld [vmem:[%s2652_s30 + $0x22] sm:$0x3] }
 0x15a   : > { %1662 = vmatpush.bf16.msra.mxu2 %v1653_v29  ;;  %1713 = vmatpush.bf16.msrb.mxu0 %v1704_v39 }
 0x15c   : > { %v674_v31 = vpop.f32.mrf.mxu2  ;;  %v695_v58 = vpop.f32.mrf.mxu3 }
 0x15d   : > { %v694_v48 = vadd.f32 %v693_v42, %v674_v31  ;;  %v1776_v31 = vld [vmem:[%s3257_s1] sm:$0xf] }
 0x15e   : > { %v743_v32 = vpop.f32.mrf.mxu1  ;;  %v720_v38 = vpop.f32.mrf.mxu0 }
 0x15f   : > { %v722_v53 = vadd.f32 %v718_v17, %v694_v48  ;;  %v2394_v17 = vld [vmem:[%s3257_s1 + $0x20] sm:$0xf]  ;;  %v2405_v48 = vld [vmem:[%s3257_s1 + $0xc] sm:$0xf] }
 0x161   : > { %2371 = vmatmul.msk.bf16.vlgmr.msrb.gmra.mxu1 %vm197_vm1, %v2370_v34  ;;  %2377 = vmatmul.msk.bf16.vlgmr.msrb.gmra.mxu3 %vm197_vm1, %v1552_v36  ;;  %v747_v56 = vadd.f32 %v743_v32, %v722_v53  ;;  %v1953_v32 = vsel %vm201_vm0, %v2415_v28, 0 }
 0x162   : > { %1792 = vmatpush.bf16.msrb.mxu3 %v1783_v43  ;;  %1738 = vmatpush.bf16.msrb.mxu1 %v1729_v44 }
 0x164   : > { %v676_v35 = vpop.f32.mrf.mxu2  ;;  %v794_v47 = vpop.f32.mrf.mxu3 }
 0x166   : > { %v745_v49 = vpop.f32.mrf.mxu1  ;;  %v819_v20 = vpop.f32.mrf.mxu0 }
 0x167   : > { %v2410_v49 = vld [vmem:[%s3257_s1 + $0x14] sm:$0xf] }
 0x169   : > { %2376 = vmatmul.msk.bf16.vlgmr.msrb.gmra.mxu2 %vm197_vm1, %v2375_v27  ;;  %2379 = vmatmul.msk.bf16.vlgmr.msra.gmra.mxu0 %vm197_vm1, %v2378_v51 }
 0x16a   : > { %1764 = vmatpush.bf16.msrb.mxu2 %v1755_v52  ;;  %1811 = vmatpush.bf16.msra.mxu0 %v1802_v57  ;;  %v2413_v57 = vld [vmem:[%s3257_s1 + $0x18] sm:$0xf] }
 0x16c   : > { %v768_v54 = vpop.f32.mrf.mxu2  ;;  %v796_v55 = vpop.f32.mrf.mxu3 }
 0x16d   : > { %v772_v40 = vadd.f32 %v768_v54, %v747_v56 }
 0x16e   : > { %v844_v3 = vpop.f32.mrf.mxu1  ;;  %v821_v0 = vpop.f32.mrf.mxu0 }
 0x16f   : > { %v798_v33 = vadd.f32 %v794_v47, %v772_v40 }
 0x171   : > { %2382 = vmatmul.msk.bf16.vlgmr.msra.gmra.mxu1 %vm197_vm1, %v2381_v41  ;;  %2387 = vmatmul.msk.bf16.vlgmr.msra.gmra.mxu3 %vm197_vm1, %v2386_v61  ;;  %v823_v6 = vadd.f32 %v819_v20, %v798_v33 }
 0x172   : > { %1886 = vmatpush.bf16.msra.mxu3 %v1877_v1  ;;  %1836 = vmatpush.bf16.msra.mxu1 %v1827_v63  ;;  %v2416_v1 = vld [vmem:[%s3257_s1 + $0x1c] sm:$0xf] }
 0x173   : > { %v848_v10 = vadd.f32 %v844_v3, %v823_v6 }
 0x174   : > { %v770_v22 = vpop.f32.mrf.mxu2  ;;  %v898_v2 = vpop.f32.mrf.mxu3 }
 0x176   : > { %v846_v5 = vpop.f32.mrf.mxu1  ;;  %v917_v7 = vpop.f32.mrf.mxu0 }
 0x177   : > { %v918_v34 = vadd.f32 %v917_v7, %v898_v2 }
 0x179   : > { %2385 = vmatmul.msk.bf16.vlgmr.msra.gmra.mxu2 %vm197_vm1, %v2384_v4  ;;  %2390 = vmatmul.msk.bf16.vlgmr.msrb.gmra.mxu0 %vm197_vm1, %v2389_v45 }
 0x17a   : > { %1861 = vmatpush.bf16.msra.mxu2 %v1852_v8  ;;  %1912 = vmatpush.bf16.msrb.mxu0 %v1903_v26 }
 0x17c   : > { %v870_v24 = vpop.f32.mrf.mxu2  ;;  %v900_v12 = vpop.f32.mrf.mxu3 }
 0x17d   : > { %v874_v13 = vadd.f32 %v870_v24, %v848_v10 }
 0x17e   : > { %v942_v9 = vpop.f32.mrf.mxu1  ;;  %v919_v16 = vpop.f32.mrf.mxu0 }
 0x17f   : > { %v875_v18 = vadd.f32 %v874_v13, %v3061_v60  ;;  %v946_v38 = vadd.f32 %v942_v9, %v918_v34 }
 0x181   : > { %v876_v42 = vmax.f32 %v875_v18, 0.0  ;;  %2393 = vmatmul.msk.bf16.vlgmr.msrb.gmra.mxu1 %vm197_vm1, %v2392_v14  ;;  %2400 = vmatmul.msk.bf16.vlgmr.msrb.gmra.mxu3 %vm197_vm1, %v2399_v15 }
 0x182   : > { %1988 = vmatpush.bf16.msrb.mxu3 %v1979_v50  ;;  %1937 = vmatpush.bf16.msrb.mxu1 %v1928_v11 }
 0x183   : > { %2300 = vst.msk [vmem:[%s3074_s26 + $0x10] sm:$0xff] %vm429_vm2, %v876_v42 }
 0x184   : > { %v872_v23 = vpop.f32.mrf.mxu2  ;;  %v992_v25 = vpop.f32.mrf.mxu3 }
 0x186   : > { %v944_v29 = vpop.f32.mrf.mxu1  ;;  %v1018_v58 = vpop.f32.mrf.mxu0 }
 0x189   : > { %2395 = vmatmul.msk.bf16.vlgmr.msrb.gmra.mxu2 %vm197_vm1, %v2394_v17  ;;  %2401 = vmatmul.msk.bf16.vlgmr.msra.gmra.mxu0 %vm197_vm1, %v1776_v31 }
 0x18a   : > { %1962 = vmatpush.bf16.msrb.mxu2 %v1953_v32 }
 0x18c   : > { %v967_v62 = vpop.f32.mrf.mxu2  ;;  %v994_v36 = vpop.f32.mrf.mxu3 }
 0x18d   : > { %v971_v43 = vadd.f32 %v967_v62, %v946_v38 }
 0x18e   : > { %v1043_v39 = vpop.f32.mrf.mxu1  ;;  %v1020_v44 = vpop.f32.mrf.mxu0 }
 0x18f   : > { %v996_v46 = vadd.f32 %v992_v25, %v971_v43 }
 0x191   : > { %2403 = vmatmul.msk.bf16.vlgmr.msra.gmra.mxu1 %vm197_vm1, %v2402_v37  ;;  %2409 = vmatmul.msk.bf16.vlgmr.msra.gmra.mxu3 %vm197_vm1, %v2408_v30  ;;  %v1022_v51 = vadd.f32 %v1018_v58, %v996_v46 }
 0x193   : > { %v1047_v52 = vadd.f32 %v1043_v39, %v1022_v51 }
 0x194   : > { %v969_v35 = vpop.f32.mrf.mxu2  ;;  %v1094_v47 = vpop.f32.mrf.mxu3 }
 0x196   : > { %v1045_v27 = vpop.f32.mrf.mxu1  ;;  %v1122_v20 = vpop.f32.mrf.mxu0 }
 0x199   : > { %2406 = vmatmul.msk.bf16.vlgmr.msra.gmra.mxu2 %vm197_vm1, %v2405_v48  ;;  %2411 = vmatmul.msk.bf16.vlgmr.msrb.gmra.mxu0 %vm197_vm1, %v2410_v49 }
 0x19c   : > { %v1068_v53 = vpop.f32.mrf.mxu2  ;;  %v1096_v54 = vpop.f32.mrf.mxu3 }
 0x19d   : > { %v1072_v55 = vadd.f32 %v1068_v53, %v1047_v52 }
 0x19e   : > { %v1141_v56 = vpop.f32.mrf.mxu1  ;;  %v1124_v41 = vpop.f32.mrf.mxu0 }
 0x19f   : > { %v1098_v3 = vadd.f32 %v1094_v47, %v1072_v55  ;;  %v1142_v5 = vadd.f32 %v1141_v56, %v1122_v20 }
 0x1a1   : > { %v1099_v61 = vadd.f32 %v1098_v3, %v3061_v60  ;;  %2414 = vmatmul.msk.bf16.vlgmr.msrb.gmra.mxu1 %vm197_vm1, %v2413_v57  ;;  %2419 = vmatmul.msk.bf16.vlgmr.msrb.gmra.mxu3 %vm197_vm1, %v2418_v59 }
 0x1a3   : > { %v1100_v63 = vmax.f32 %v1099_v61, 0.0 }
 0x1a4   : > { %v1070_v40 = vpop.f32.mrf.mxu2  ;;  %v1191_v0 = vpop.f32.mrf.mxu3 }
 0x1a5   : > { %2324 = vst.msk [vmem:[%s3074_s26 + $0x18] sm:$0xff] %vm429_vm2, %v1100_v63 }
 0x1a6   : > { %v1143_v33 = vpop.f32.mrf.mxu1  ;;  %v1216_v22 = vpop.f32.mrf.mxu0 }
 0x1a9   : > { %2417 = vmatmul.msk.bf16.vlgmr.msrb.gmra.mxu2 %vm197_vm1, %v2416_v1 }
 0x1ac   : > { %v1166_v2 = vpop.f32.mrf.mxu2  ;;  %v1193_v4 = vpop.f32.mrf.mxu3 }
 0x1ad   : > { %v1170_v6 = vadd.f32 %v1166_v2, %v1142_v5 }
 0x1ae   : > { %v1242_v45 = vpop.f32.mrf.mxu1  ;;  %v1218_v7 = vpop.f32.mrf.mxu0 }
 0x1af   : > { %v1195_v8 = vadd.f32 %v1191_v0, %v1170_v6 }
 0x1b1   : > { %v1220_v13 = vadd.f32 %v1216_v22, %v1195_v8 }
 0x1b3   : > { %v1246_v14 = vadd.f32 %v1242_v45, %v1220_v13 }
 0x1b4   : > { %v1168_v10 = vpop.f32.mrf.mxu2  ;;  %v1292_v24 = vpop.f32.mrf.mxu3 }
 0x1b6   : > { %v1244_v12 = vpop.f32.mrf.mxu1  ;;  %v1318_v9 = vpop.f32.mrf.mxu0 }
 0x1bc   : > { %v1267_v15 = vpop.f32.mrf.mxu2  ;;  %v1294_v18 = vpop.f32.mrf.mxu3 }
 0x1bd   : > { %v1271_v16 = vadd.f32 %v1267_v15, %v1246_v14 }
 0x1be   : > { %v1346_v19 = vpop.f32.mrf.mxu1  ;;  %v1320_v42 = vpop.f32.mrf.mxu0 }
 0x1bf   : > { %v1296_v21 = vadd.f32 %v1292_v24, %v1271_v16 }
 0x1c1   : > { %v1322_v26 = vadd.f32 %v1318_v9, %v1296_v21 }
 0x1c3   : > { %v1323_v50 = vadd.f32 %v1322_v26, %v3061_v60 }
 0x1c4   : > { %v1269_v11 = vpop.f32.mrf.mxu2  ;;  %v1390_v23 = vpop.f32.mrf.mxu3 }
 0x1c5   : > { %v1324_v25 = vmax.f32 %v1323_v50, 0.0 }
 0x1c6   : > { %v1348_v28 = vpop.f32.mrf.mxu1  ;;  %v1415_v17 = vpop.f32.mrf.mxu0 }
 0x1c7   : > { %2348 = vst.msk [vmem:[%s3074_s26 + $0x20] sm:$0xff] %vm429_vm2, %v1324_v25 }
 0x1cc   : > { %v1365_v29 = vpop.f32.mrf.mxu2  ;;  %v1392_v31 = vpop.f32.mrf.mxu3 }
 0x1cd   : > { %v1366_v32 = vadd.f32 %v1365_v29, %v1346_v19 }
 0x1ce   : > { %v1440_v58 = vpop.f32.mrf.mxu1  ;;  %v1417_v34 = vpop.f32.mrf.mxu0 }
 0x1cf   : > { %v1394_v62 = vadd.f32 %v1390_v23, %v1366_v32 }
 0x1d1   : > { %v1419_v37 = vadd.f32 %v1415_v17, %v1394_v62 }
 0x1d3   : > { %v1444_v43 = vadd.f32 %v1440_v58, %v1419_v37 }
 0x1d4   : > { %v1367_v36 = vpop.f32.mrf.mxu2  ;;  %v1491_v38 = vpop.f32.mrf.mxu3 }
 0x1d6   : > { %v1442_v39 = vpop.f32.mrf.mxu1  ;;  %v1516_v30 = vpop.f32.mrf.mxu0 }
 0x1dc   : > { %v1466_v44 = vpop.f32.mrf.mxu2  ;;  %v1493_v46 = vpop.f32.mrf.mxu3 }
 0x1dd   : > { %v1470_v35 = vadd.f32 %v1466_v44, %v1444_v43 }
 0x1de   : > { %v1542_v47 = vpop.f32.mrf.mxu1  ;;  %v1518_v27 = vpop.f32.mrf.mxu0 }
 0x1df   : > { %v1495_v48 = vadd.f32 %v1491_v38, %v1470_v35 }
 0x1e1   : > { %v1520_v49 = vadd.f32 %v1516_v30, %v1495_v48 }
 0x1e3   : > { %v1546_v51 = vadd.f32 %v1542_v47, %v1520_v49 }
 0x1e4   : > { %v1468_v20 = vpop.f32.mrf.mxu2  ;;  %v1589_v52 = vpop.f32.mrf.mxu3 }
 0x1e5   : > { %v1547_v53 = vadd.f32 %v1546_v51, %v3061_v60 }
 0x1e6   : > { %v1544_v54 = vpop.f32.mrf.mxu1  ;;  %v1614_v56 = vpop.f32.mrf.mxu0 }
 0x1e7   : > { %v1548_v55 = vmax.f32 %v1547_v53, 0.0 }
 0x1e9   : > { %2372 = vst.msk [vmem:[%s3074_s26 + $0x28] sm:$0xff] %vm429_vm2, %v1548_v55 }
 0x1ec   : > { %v1570_v57 = vpop.f32.mrf.mxu2  ;;  %v1591_v59 = vpop.f32.mrf.mxu3 }
 0x1ed   : > { %v1590_v40 = vadd.f32 %v1589_v52, %v1570_v57 }
 0x1ee   : > { %v1639_v3 = vpop.f32.mrf.mxu1  ;;  %v1616_v41 = vpop.f32.mrf.mxu0 }
 0x1ef   : > { %v1618_v33 = vadd.f32 %v1614_v56, %v1590_v40 }
 0x1f1   : > { %v1643_v4 = vadd.f32 %v1639_v3, %v1618_v33 }
 0x1f4   : > { %v1572_v61 = vpop.f32.mrf.mxu2  ;;  %v1690_v63 = vpop.f32.mrf.mxu3 }
 0x1f6   : > { %v1641_v0 = vpop.f32.mrf.mxu1  ;;  %v1715_v1 = vpop.f32.mrf.mxu0 }
 0x1fc   : > { %v1664_v22 = vpop.f32.mrf.mxu2  ;;  %v1692_v2 = vpop.f32.mrf.mxu3 }
 0x1fd   : > { %v1668_v45 = vadd.f32 %v1664_v22, %v1643_v4 }
 0x1fe   : > { %v1740_v5 = vpop.f32.mrf.mxu1  ;;  %v1717_v6 = vpop.f32.mrf.mxu0 }
 0x1ff   : > { %v1694_v7 = vadd.f32 %v1690_v63, %v1668_v45 }
 0x201   : > { %v1719_v12 = vadd.f32 %v1715_v1, %v1694_v7 }
 0x203   : > { %v1744_v9 = vadd.f32 %v1740_v5, %v1719_v12 }
 0x204   : > { %v1666_v8 = vpop.f32.mrf.mxu2  ;;  %v1794_v10 = vpop.f32.mrf.mxu3 }
 0x206   : > { %v1742_v24 = vpop.f32.mrf.mxu1  ;;  %v1813_v13 = vpop.f32.mrf.mxu0 }
 0x207   : > { %v1814_v25 = vadd.f32 %v1813_v13, %v1794_v10 }
 0x20c   : > { %v1766_v14 = vpop.f32.mrf.mxu2  ;;  %v1796_v15 = vpop.f32.mrf.mxu3 }
 0x20d   : > { %v1770_v18 = vadd.f32 %v1766_v14, %v1744_v9 }
 0x20e   : > { %v1838_v16 = vpop.f32.mrf.mxu1  ;;  %v1815_v21 = vpop.f32.mrf.mxu0 }
 0x20f   : > { %v1771_v19 = vadd.f32 %v1770_v18, %v3061_v60  ;;  %v1842_v29 = vadd.f32 %v1838_v16, %v1814_v25 }
 0x211   : > { %v1772_v42 = vmax.f32 %v1771_v19, 0.0 }
 0x213   : > { %2396 = vst.msk [vmem:[%s3074_s26 + $0x30] sm:$0xff] %vm429_vm2, %v1772_v42 }
 0x214   : > { %v1768_v26 = vpop.f32.mrf.mxu2  ;;  %v1888_v50 = vpop.f32.mrf.mxu3 }
 0x216   : > { %v1840_v11 = vpop.f32.mrf.mxu1  ;;  %v1914_v23 = vpop.f32.mrf.mxu0 }
 0x21c   : > { %v1863_v28 = vpop.f32.mrf.mxu2  ;;  %v1890_v17 = vpop.f32.mrf.mxu3 }
 0x21d   : > { %v1867_v58 = vadd.f32 %v1863_v28, %v1842_v29 }
 0x21e   : > { %v1939_v31 = vpop.f32.mrf.mxu1  ;;  %v1916_v32 = vpop.f32.mrf.mxu0 }
 0x21f   : > { %v1892_v34 = vadd.f32 %v1888_v50, %v1867_v58 }
 0x221   : > { %v1918_v39 = vadd.f32 %v1914_v23, %v1892_v34 }
 0x223   : > { %v1943_v37 = vadd.f32 %v1939_v31, %v1918_v39 }
 0x224   : > { %v1865_v62 = vpop.f32.mrf.mxu2  ;;  %v1990_v36 = vpop.f32.mrf.mxu3 }
 0x226   : > { %v1941_v38 = vpop.f32.mrf.mxu1 }
 0x22c   : > { %v1964_v30 = vpop.f32.mrf.mxu2  ;;  %v1992_v43 = vpop.f32.mrf.mxu3 }
 0x22d   : > { %v1968_v44 = vadd.f32 %v1964_v30, %v1943_v37 }
 0x22f   : > { %v1994_v46 = vadd.f32 %v1990_v36, %v1968_v44 }
 0x231   : > { %v1995_v35 = vadd.f32 %v1994_v46, %v3061_v60 }
 0x233   : > { %v1996_v47 = vmax.f32 %v1995_v35, 0.0 }
 0x234   : > { %v1966_v48 = vpop.f32.mrf.mxu2 }
 0x235   : > { %2420 = vst.msk [vmem:[%s3074_s26 + $0x38] sm:$0xff] %vm429_vm2, %v1996_v47 }
 0x236   : > { %2515 = shalt.err (!%p2512_p5)
}
 0x237   : > { %s2570_s10 = smov 128   ;;  %s2571_s26 = smov 8  }
 0x238   : > { %2428 = dma.vmem_to_hbm [thread:$0]  (%p2632_p4), %s2015_s7, 1024, %s2017_s8, %s2000_s15, %s2570_s10, %s2570_s10, %s2571_s26  }
 0x239 PF: > { %p2434_p6 = scmp.ge.s32.totalorder %s2566_s17, 2  ;;  %s2031_s4 = sand.u32 1, %s2546_s12  }
 0x23a   : > { %s2032_s28 = scalar_lea.sflag [#allocation3], %s2031_s4 }
 0x23b   : > { %p2431_p7 = pnand %p2434_p6, %p2639_p8 }
 0x23d   : > { %p2432_p9 = pneg %p2431_p7 }
 0x23f   : > { %2541 = dma.done.wait (%p2432_p9), %s2032_s28, 1024  }
 0x240   : > { %2543 = vsyncadd (%p2432_p9), %s2032_s28, 4294966272  ;;  %s16_s17 = sadd.s32 1, %s2566_s17   ;;  %s3262_s12 = smov %s2550_s13 }
 0x241   : > { %p13_p10 = scmp.ge.s32.totalorder %s16_s17, 4   ;;  %s3263_s13 = smov %s2554_s14 }
 0x242   : > { %s3264_s14 = smov %s2645_s25  ;;  %s3265_s15 = smov %s2562_s16 }
 0x243   : > { %s3266_s16 = smov %s3268_s20  ;;  %15 = sbr.rel (!%p13_p10) target bundleno = 4 (0x4), region = 116 }
 0x248   :  { %2038 = vsyncpa [#allocation3], 1 }
 0x249   :  { %2040 = vsyncpa [#allocation3 + $0x1], 1 }

</bundles_post_ra>
